<compile_context>
chip_gen: v6e
topology: v6e:2x2x1
jax: 0.10.0
libtpu: 0.0.40
codegen_flags: <defaults>
</compile_context>

<pallas_src>
import functools

import jax
import jax.numpy as jnp
import numpy as np
from jax import lax
from jax.experimental import pallas as pl
from jax.experimental.pallas import tpu as pltpu

# ---- MN neuron constants (match the PyTorch module __init__) ----
C = 1.0
EL = -0.07
VR = -0.07
R1 = 0.0
R2 = 1.0
TR = -0.06
TINF = -0.05
B_CONST = 10.0
G = 50.0 * C
K1 = 200.0
K2 = 20.0
DT = 1.0 / 1000.0

# ---- Constant-folded update coefficients (pure algebra on the module's equations) ----
#   i1' = i1 - K1*i1*dt                        = i1 * A_I1
#   i2' = i2 - K2*i2*dt                        = i2 * A_I2
#   V'  = V + dt*(lin + i1 + i2 - G*(V-EL))/C  = V*A_V + DTC*(lin+i1+i2) + C_V
#   Thr'= Thr + dt*(a*(V-EL) - b*(Thr-Tinf))   = Thr*A_T + (a*dt)*(V-EL) + C_T
A_I1 = 1.0 - K1 * DT          # 0.8
A_I2 = 1.0 - K2 * DT          # 0.98
DTC = DT / C                  # 0.001
A_V = 1.0 - G * DT / C        # 0.95
C_V = (G * DT / C) * EL       # -0.0035
A_T = 1.0 - B_CONST * DT      # 0.99
C_T = B_CONST * DT * TINF     # -0.0005


def _round_up(x, m):
    return ((x + m - 1) // m) * m


def _pad_tile(n, align, max_tile):
    """Pad n to `align`, then pick (padded_size, tile) with tile | padded_size."""
    p = _round_up(max(n, 1), align)
    if p <= max_tile:
        return p, p
    return _round_up(p, max_tile), max_tile


def mn_neuron_kernel(x_ref, w_ref, adt_ref, s0_ref, spk_ref, state_ref,
                     *, A1, A2, TT, tail, use_mxu):
    """One grid step = TT fused MN-neuron timesteps on one (n_out-tile, batch-tile) block.

    Layouts (transposed: n_out on sublanes, batch on lanes):
      x_ref     (TT, in_p, tb)   input current chunk
      w_ref     (to, in_p)       weight           (resident: index_map constant in t)
      adt_ref   (to, 1)          a * dt           (resident)
      s0_ref    (4, to, tb)      initial V,i1,i2,Thr
      spk_ref   (TT, to, tb)     spikes out (int8 or f32)
      state_ref (4, to, tb)      V,i1,i2,Thr — VMEM-resident accumulator across the t axis
    """
    tc = pl.program_id(2)

    @pl.when(tc == 0)
    def _():
        state_ref[...] = s0_ref[...]

    w = w_ref[...]          # (to, in_p)
    adt = adt_ref[...]      # (to, 1) — lane-broadcasts over batch

    V = state_ref[0]
    i1 = state_ref[1]
    i2 = state_ref[2]
    Thr = state_ref[3]

    def one_step(tt, V, i1, i2, Thr):
        x_t = x_ref[tt]                                   # (in_p, tb)
        i1 = i1 * A_I1
        i2 = i2 * A_I2
        if use_mxu:                                       # n_in >= 2 -> MXU (idle slot)
            lin = jnp.dot(w, x_t, preferred_element_type=jnp.float32)
        else:                                             # n_in == 1 -> single VPU broadcast mul
            lin = w * x_t                                 # (to,1)*(1,tb) -> (to,tb)
        V = V * A_V + DTC * (lin + i1 + i2) + C_V
        Thr = Thr * A_T + adt * (V - EL) + C_T
        spike = (V - Thr) > 0.0                           # SurrGradSpike.forward
        i1 = jnp.where(spike, A1 if R1 == 0.0 else R1 * i1 + A1, i1)
        i2 = jnp.where(spike, i2 + A2 if R2 == 1.0 else R2 * i2 + A2, i2)
        Thr = jnp.where(spike, jnp.maximum(Thr, TR), Thr)
        V = jnp.where(spike, VR, V)
        spk_ref[tt] = spike.astype(spk_ref.dtype)
        return V, i1, i2, Thr

    # Statically unrolled time chunk.  Steps with tt >= tail only carry real work in chunks
    # other than the last one (time-axis padding guard); their spike writes land in padded
    # rows >= T and are sliced away by the wrapper.
    not_last = tc < pl.num_programs(2) - 1
    for tt in range(TT):
        if tt < tail:
            V, i1, i2, Thr = one_step(tt, V, i1, i2, Thr)
        else:
            Vn, i1n, i2n, Thrn = one_step(tt, V, i1, i2, Thr)
            V = jnp.where(not_last, Vn, V)
            i1 = jnp.where(not_last, i1n, i1)
            i2 = jnp.where(not_last, i2n, i2)
            Thr = jnp.where(not_last, Thrn, Thr)

    state_ref[0] = V
    state_ref[1] = i1
    state_ref[2] = i2
    state_ref[3] = Thr


def mn_neuron_forward(x_seq, weight, a_param, A1, A2, state=None, *, tt_max=32):
    """Run T fused timesteps of MN_neuron.forward.

    x_seq:   (T, batch, n_in) float32
    weight:  (n_out, n_in)    float32 (nn.Linear, bias=False)
    a_param: (1, n_out)       float32
    state:   None or (V, i1, i2, Thr), each (batch, n_out)
    returns: spk_seq (T, batch, n_out) float32, new_state tuple of (batch, n_out)
    """
    x_seq = jnp.asarray(x_seq, jnp.float32)
    weight = jnp.asarray(weight, jnp.float32)
    a_param = jnp.asarray(a_param, jnp.float32)

    T, batch, n_in = x_seq.shape
    n_out = weight.shape[0]

    if state is None:
        V = jnp.full((batch, n_out), EL, jnp.float32)
        i1 = jnp.zeros((batch, n_out), jnp.float32)
        i2 = jnp.zeros((batch, n_out), jnp.float32)
        Thr = jnp.full((batch, n_out), TR, jnp.float32)
    else:
        V, i1, i2, Thr = (jnp.asarray(s, jnp.float32) for s in state)

    # Transposed compute layout: n_out -> sublanes (dense even for n_out=2), batch -> lanes.
    use_mxu = n_in >= 2                         # only n_in == 1 stays on the VPU broadcast-MAC
    in_p = _round_up(n_in, 8) if use_mxu else 1
    out_p, to = _pad_tile(n_out, 8, 128)        # sublane dim
    bp, tb = _pad_tile(batch, 128, 256)         # lane dim (multiple of 128 -> unmasked vst)

    # v7x megacore: make sure at least one "parallel" grid axis has extent >= 2 when possible.
    if out_p // to == 1 and bp // tb == 1 and bp >= 256:
        tb = bp // 2

    # Time chunk: amortize per-grid-step overhead; keep the x block under ~1 MiB.
    # TODO(synk): K-tile the resident weight / x block for very large n_in so it fits VMEM.
    TT = max(1, min(tt_max, T, (1 << 20) // (in_p * tb * 4)))
    n_chunks = -(-T // TT)
    t_pad = n_chunks * TT
    tail = T - (n_chunks - 1) * TT              # number of valid steps in the last chunk

    # int8 spike stream (4x less HBM write traffic) when the sublane tile matches native int8
    # tiling; fall back to f32 for tiny n_out (to = 8) to stay layout-safe.
    spike_dtype = jnp.int8 if to % 32 == 0 else jnp.float32

    # Pad + transpose once per call (amortized over all T steps).  Padded neurons/lanes have
    # weight = a = 0 and start at V = EL < Thr = TR, so they never spike (benign), and they
    # are sliced away below in any case.
    x_p = jnp.pad(jnp.transpose(x_seq, (0, 2, 1)),
                  ((0, t_pad - T), (0, in_p - n_in), (0, bp - batch)))
    w_p = jnp.pad(weight, ((0, out_p - n_out), (0, in_p - n_in)))
    adt_p = jnp.pad(a_param.T * DT, ((0, out_p - n_out), (0, 0)))          # (out_p, 1)
    s0_p = jnp.stack([
        jnp.pad(V.T, ((0, out_p - n_out), (0, bp - batch)), constant_values=EL),
        jnp.pad(i1.T, ((0, out_p - n_out), (0, bp - batch))),
        jnp.pad(i2.T, ((0, out_p - n_out), (0, bp - batch))),
        jnp.pad(Thr.T, ((0, out_p - n_out), (0, bp - batch)), constant_values=TR),
    ])                                                                     # (4, out_p, bp)

    grid = (out_p // to, bp // tb, n_chunks)
    state_spec = pl.BlockSpec((4, to, tb), lambda oi, bi, tc: (0, oi, bi))

    spk_p, state_p = pl.pallas_call(
        functools.partial(mn_neuron_kernel, A1=float(A1), A2=float(A2),
                          TT=TT, tail=tail, use_mxu=use_mxu),
        out_shape=(
            jax.ShapeDtypeStruct((t_pad, out_p, bp), spike_dtype),         # spikes
            jax.ShapeDtypeStruct((4, out_p, bp), jnp.float32),             # V, i1, i2, Thr
        ),
        grid=grid,
        in_specs=[
            pl.BlockSpec((TT, in_p, tb), lambda oi, bi, tc: (tc, 0, bi)),  # x (per-chunk DMA)
            pl.BlockSpec((to, in_p), lambda oi, bi, tc: (oi, 0)),          # weight   (resident)
            pl.BlockSpec((to, 1), lambda oi, bi, tc: (oi, 0)),             # a * dt   (resident)
            state_spec,                                                    # stacked init state
        ],
        out_specs=(
            pl.BlockSpec((TT, to, tb), lambda oi, bi, tc: (tc, oi, bi)),   # spikes (per chunk)
            state_spec,                                                    # state (VMEM accum)
        ),
        compiler_params=pltpu.CompilerParams(
            dimension_semantics=("parallel", "parallel", "arbitrary")),
    )(x_p, w_p, adt_p, s0_p)

    spk = jnp.transpose(spk_p[:T, :n_out, :batch], (0, 2, 1)).astype(jnp.float32)
    new_state = tuple(state_p[k, :n_out, :batch].T for k in range(4))
    return spk, new_state


def mn_neuron_ref_seq(x_seq, weight, a_param, A1, A2, state=None):
    """Pure-JAX reference: lax.scan over T steps of MN_neuron.forward.

    Uses the same (algebraically identical) constant-folded formulation as the kernel so the
    hard spike threshold (V - Thr > 0) compares bit-stably; the formulas are exact rewrites of
    the PyTorch forward, and where(spk, y, x) equals (1-spk)*x + spk*y exactly for spk in {0,1}.
    """
    T, batch, n_in = x_seq.shape
    n_out = weight.shape[0]
    if state is None:
        V = jnp.full((batch, n_out), EL, jnp.float32)
        i1 = jnp.zeros((batch, n_out), jnp.float32)
        i2 = jnp.zeros((batch, n_out), jnp.float32)
        Thr = jnp.full((batch, n_out), TR, jnp.float32)
    else:
        V, i1, i2, Thr = state
    adt = a_param * DT

    def step(carry, x):
        V, i1, i2, Thr = carry
        i1 = i1 * A_I1
        i2 = i2 * A_I2
        if n_in == 1:
            lin = x * weight[:, 0].reshape(1, -1)          # (batch,1)*(1,n_out)
        else:
            lin = jnp.dot(x, weight.T, preferred_element_type=jnp.float32)
        V = V * A_V + DTC * (lin + i1 + i2) + C_V
        Thr = Thr * A_T + adt * (V - EL) + C_T
        spike = (V - Thr) > 0.0
        i1 = jnp.where(spike, A1 if R1 == 0.0 else R1 * i1 + A1, i1)
        i2 = jnp.where(spike, i2 + A2 if R2 == 1.0 else R2 * i2 + A2, i2)
        Thr = jnp.where(spike, jnp.maximum(Thr, TR), Thr)
        V = jnp.where(spike, VR, V)
        return (V, i1, i2, Thr), spike.astype(jnp.float32)

    (V, i1, i2, Thr), spks = lax.scan(step, (V, i1, i2, Thr), x_seq)
    return spks, (V, i1, i2, Thr)


if __name__ == "__main__":
    # Module globals: n_in = 1, n_out = 2.  Deterministic init matching __init__.
    n_in, n_out = 1, 2
    batch = 4
    T1, T2 = 40, 16          # T1 not divisible by the time chunk -> exercises the tail guard
    a_val, A1_val, A2_val = 5.0, 10.0, -0.6

    key = jax.random.PRNGKey(0)
    k1, k2 = jax.random.split(key)
    x_seq1 = jax.random.normal(k1, (T1, batch, n_in), dtype=jnp.float32) * 2.0
    x_seq2 = jax.random.normal(k2, (T2, batch, n_in), dtype=jnp.float32) * 2.0

    weight = jnp.full((n_out, n_in), 2.0, jnp.float32)      # constant_(weight, 2.0)
    a_param = jnp.full((1, n_out), a_val, jnp.float32)       # self.a parameter

    # Two fused segments through the Pallas kernel (state carried between them).
    spk1, state1 = mn_neuron_forward(x_seq1, weight, a_param, A1_val, A2_val, state=None)
    spk2, state2 = mn_neuron_forward(x_seq2, weight, a_param, A1_val, A2_val, state=state1)
    jax.block_until_ready((spk1, spk2, state2))

    # Validate against the pure-JAX reference.
    rspk1, rstate1 = mn_neuron_ref_seq(x_seq1, weight, a_param, A1_val, A2_val, state=None)
    rspk2, rstate2 = mn_neuron_ref_seq(x_seq2, weight, a_param, A1_val, A2_val, state=rstate1)

    np.testing.assert_allclose(np.asarray(spk1), np.asarray(rspk1), rtol=1e-5, atol=1e-5)
    np.testing.assert_allclose(np.asarray(spk2), np.asarray(rspk2), rtol=1e-5, atol=1e-5)
    for got, want in zip(state2, rstate2):
        np.testing.assert_allclose(np.asarray(got), np.asarray(want), rtol=1e-5, atol=1e-6)

    print("KERNEL_OK")
</pallas_src>

<mosaic_0001>
module attributes {stable_mosaic.version = 11 : i64} {
  func.func @mn_neuron_kernel(%arg0: i32, %arg1: i32, %arg2: i32, %arg3: memref<32x1x128xf32, #tpu.memory_space<vmem>>, %arg4: memref<8x1xf32, #tpu.memory_space<vmem>>, %arg5: memref<8x1xf32, #tpu.memory_space<vmem>>, %arg6: memref<4x8x128xf32, #tpu.memory_space<vmem>>, %arg7: memref<32x8x128xf32, #tpu.memory_space<vmem>>, %arg8: memref<4x8x128xf32, #tpu.memory_space<vmem>>) attributes {dimension_semantics = [#tpu.dimension_semantics<parallel>, #tpu.dimension_semantics<parallel>, #tpu.dimension_semantics<arbitrary>], iteration_bounds = array<i64: 1, 1, 2>, scalar_prefetch = 0 : i64, scratch_operands = 0 : i64, tpu.core_type = #tpu.core_type<tc>, window_params = [{transform_indices = @transform_0, window_bounds = array<i64: 32, 1, 128>}, {transform_indices = @transform_1, window_bounds = array<i64: 8, 1>}, {transform_indices = @transform_2, window_bounds = array<i64: 8, 1>}, {transform_indices = @transform_3, window_bounds = array<i64: 4, 8, 128>}, {transform_indices = @transform_4, window_bounds = array<i64: 32, 8, 128>}, {transform_indices = @transform_5, window_bounds = array<i64: 4, 8, 128>}]} {
    %c0_i32 = arith.constant 0 : i32
    %0 = arith.cmpi eq, %arg2, %c0_i32 : i32
    %1 = arith.extui %0 : i1 to i32
    %c0_i32_0 = arith.constant 0 : i32
    %2 = arith.cmpi ne, %1, %c0_i32_0 : i32
    scf.if %2 {
      %c0_604 = arith.constant 0 : index
      %c0_605 = arith.constant 0 : index
      %c0_606 = arith.constant 0 : index
      %1562 = vector.load %arg6[%c0_604, %c0_605, %c0_606] : memref<4x8x128xf32, #tpu.memory_space<vmem>>, vector<4x8x128xf32>
      %c0_607 = arith.constant 0 : index
      %c0_608 = arith.constant 0 : index
      %c0_609 = arith.constant 0 : index
      %1563 = vector.load %arg8[%c0_607, %c0_608, %c0_609] : memref<4x8x128xf32, #tpu.memory_space<vmem>>, vector<4x8x128xf32>
      tpu.vector_store %arg8[%c0_607, %c0_608, %c0_609], %1562 {strides = array<i32>} : memref<4x8x128xf32, #tpu.memory_space<vmem>>, vector<4x8x128xf32>,
    } else {
    }
    %c0 = arith.constant 0 : index
    %c0_1 = arith.constant 0 : index
    %3 = vector.load %arg4[%c0, %c0_1] : memref<8x1xf32, #tpu.memory_space<vmem>>, vector<8x1xf32>
    %c0_2 = arith.constant 0 : index
    %c0_3 = arith.constant 0 : index
    %4 = vector.load %arg5[%c0_2, %c0_3] : memref<8x1xf32, #tpu.memory_space<vmem>>, vector<8x1xf32>
    %c0_4 = arith.constant 0 : index
    %c0_5 = arith.constant 0 : index
    %c0_6 = arith.constant 0 : index
    %5 = vector.load %arg8[%c0_4, %c0_5, %c0_6] : memref<4x8x128xf32, #tpu.memory_space<vmem>>, vector<1x8x128xf32>
    %6 = vector.shape_cast %5 : vector<1x8x128xf32> to vector<8x128xf32>
    %c1 = arith.constant 1 : index
    %c0_7 = arith.constant 0 : index
    %c0_8 = arith.constant 0 : index
    %7 = vector.load %arg8[%c1, %c0_7, %c0_8] : memref<4x8x128xf32, #tpu.memory_space<vmem>>, vector<1x8x128xf32>
    %8 = vector.shape_cast %7 : vector<1x8x128xf32> to vector<8x128xf32>
    %c2 = arith.constant 2 : index
    %c0_9 = arith.constant 0 : index
    %c0_10 = arith.constant 0 : index
    %9 = vector.load %arg8[%c2, %c0_9, %c0_10] : memref<4x8x128xf32, #tpu.memory_space<vmem>>, vector<1x8x128xf32>
    %10 = vector.shape_cast %9 : vector<1x8x128xf32> to vector<8x128xf32>
    %c3 = arith.constant 3 : index
    %c0_11 = arith.constant 0 : index
    %c0_12 = arith.constant 0 : index
    %11 = vector.load %arg8[%c3, %c0_11, %c0_12] : memref<4x8x128xf32, #tpu.memory_space<vmem>>, vector<1x8x128xf32>
    %12 = vector.shape_cast %11 : vector<1x8x128xf32> to vector<8x128xf32>
    %c1_i32 = arith.constant 1 : i32
    %13 = arith.cmpi slt, %arg2, %c1_i32 : i32
    %c0_13 = arith.constant 0 : index
    %c0_14 = arith.constant 0 : index
    %c0_15 = arith.constant 0 : index
    %14 = vector.load %arg3[%c0_13, %c0_14, %c0_15] : memref<32x1x128xf32, #tpu.memory_space<vmem>>, vector<1x1x128xf32>
    %15 = vector.shape_cast %14 : vector<1x1x128xf32> to vector<1x128xf32>
    %cst = arith.constant 8.000000e-01 : f32
    %16 = vector.broadcast %cst : f32 to vector<8x128xf32>
    %17 = arith.mulf %8, %16 : vector<8x128xf32>
    %cst_16 = arith.constant 9.800000e-01 : f32
    %18 = vector.broadcast %cst_16 : f32 to vector<8x128xf32>
    %19 = arith.mulf %10, %18 : vector<8x128xf32>
    %20 = vector.broadcast %3 : vector<8x1xf32> to vector<8x128xf32>
    %21 = vector.broadcast %15 : vector<1x128xf32> to vector<8x128xf32>
    %22 = arith.mulf %20, %21 : vector<8x128xf32>
    %cst_17 = arith.constant 0.949999988 : f32
    %23 = vector.broadcast %cst_17 : f32 to vector<8x128xf32>
    %24 = arith.mulf %6, %23 : vector<8x128xf32>
    %25 = arith.addf %22, %17 : vector<8x128xf32>
    %26 = arith.addf %25, %19 : vector<8x128xf32>
    %cst_18 = arith.constant 1.000000e-03 : f32
    %27 = vector.broadcast %cst_18 : f32 to vector<8x128xf32>
    %28 = arith.mulf %27, %26 : vector<8x128xf32>
    %29 = arith.addf %24, %28 : vector<8x128xf32>
    %cst_19 = arith.constant -3.500000e-03 : f32
    %30 = vector.broadcast %cst_19 : f32 to vector<8x128xf32>
    %31 = arith.addf %29, %30 : vector<8x128xf32>
    %cst_20 = arith.constant 9.900000e-01 : f32
    %32 = vector.broadcast %cst_20 : f32 to vector<8x128xf32>
    %33 = arith.mulf %12, %32 : vector<8x128xf32>
    %cst_21 = arith.constant -7.000000e-02 : f32
    %34 = vector.broadcast %cst_21 : f32 to vector<8x128xf32>
    %35 = arith.subf %31, %34 : vector<8x128xf32>
    %36 = vector.broadcast %4 : vector<8x1xf32> to vector<8x128xf32>
    %37 = arith.mulf %36, %35 : vector<8x128xf32>
    %38 = arith.addf %33, %37 : vector<8x128xf32>
    %cst_22 = arith.constant -5.000000e-04 : f32
    %39 = vector.broadcast %cst_22 : f32 to vector<8x128xf32>
    %40 = arith.addf %38, %39 : vector<8x128xf32>
    %41 = arith.subf %31, %40 : vector<8x128xf32>
    %cst_23 = arith.constant 0.000000e+00 : f32
    %42 = vector.broadcast %cst_23 : f32 to vector<8x128xf32>
    %43 = arith.cmpf ogt, %41, %42 : vector<8x128xf32>
    %cst_24 = arith.constant 1.000000e+01 : f32
    %44 = vector.broadcast %cst_24 : f32 to vector<8x128xf32>
    %45 = arith.select %43, %44, %17 : vector<8x128xi1>, vector<8x128xf32>
    %cst_25 = arith.constant -6.000000e-01 : f32
    %46 = vector.broadcast %cst_25 : f32 to vector<8x128xf32>
    %47 = arith.addf %19, %46 : vector<8x128xf32>
    %48 = arith.select %43, %47, %19 : vector<8x128xi1>, vector<8x128xf32>
    %cst_26 = arith.constant -6.000000e-02 : f32
    %49 = vector.broadcast %cst_26 : f32 to vector<8x128xf32>
    %50 = arith.maximumf %40, %49 : vector<8x128xf32>
    %51 = arith.select %43, %50, %40 : vector<8x128xi1>, vector<8x128xf32>
    %cst_27 = arith.constant -7.000000e-02 : f32
    %52 = vector.broadcast %cst_27 : f32 to vector<8x128xf32>
    %53 = arith.select %43, %52, %31 : vector<8x128xi1>, vector<8x128xf32>
    %54 = arith.extui %43 : vector<8x128xi1> to vector<8x128xi32>
    %55 = arith.sitofp %54 : vector<8x128xi32> to vector<8x128xf32>
    %c0_28 = arith.constant 0 : index
    %c0_29 = arith.constant 0 : index
    %c0_30 = arith.constant 0 : index
    %56 = vector.load %arg7[%c0_28, %c0_29, %c0_30] : memref<32x8x128xf32, #tpu.memory_space<vmem>>, vector<1x8x128xf32>
    %57 = vector.shape_cast %56 : vector<1x8x128xf32> to vector<8x128xf32>
    %58 = vector.shape_cast %55 : vector<8x128xf32> to vector<1x8x128xf32>
    tpu.vector_store %arg7[%c0_28, %c0_29, %c0_30], %58 {strides = array<i32>} : memref<32x8x128xf32, #tpu.memory_space<vmem>>, vector<1x8x128xf32>,
    %c1_31 = arith.constant 1 : index
    %c0_32 = arith.constant 0 : index
    %c0_33 = arith.constant 0 : index
    %59 = vector.load %arg3[%c1_31, %c0_32, %c0_33] : memref<32x1x128xf32, #tpu.memory_space<vmem>>, vector<1x1x128xf32>
    %60 = vector.shape_cast %59 : vector<1x1x128xf32> to vector<1x128xf32>
    %cst_34 = arith.constant 8.000000e-01 : f32
    %61 = vector.broadcast %cst_34 : f32 to vector<8x128xf32>
    %62 = arith.mulf %45, %61 : vector<8x128xf32>
    %cst_35 = arith.constant 9.800000e-01 : f32
    %63 = vector.broadcast %cst_35 : f32 to vector<8x128xf32>
    %64 = arith.mulf %48, %63 : vector<8x128xf32>
    %65 = vector.broadcast %3 : vector<8x1xf32> to vector<8x128xf32>
    %66 = vector.broadcast %60 : vector<1x128xf32> to vector<8x128xf32>
    %67 = arith.mulf %65, %66 : vector<8x128xf32>
    %cst_36 = arith.constant 0.949999988 : f32
    %68 = vector.broadcast %cst_36 : f32 to vector<8x128xf32>
    %69 = arith.mulf %53, %68 : vector<8x128xf32>
    %70 = arith.addf %67, %62 : vector<8x128xf32>
    %71 = arith.addf %70, %64 : vector<8x128xf32>
    %cst_37 = arith.constant 1.000000e-03 : f32
    %72 = vector.broadcast %cst_37 : f32 to vector<8x128xf32>
    %73 = arith.mulf %72, %71 : vector<8x128xf32>
    %74 = arith.addf %69, %73 : vector<8x128xf32>
    %cst_38 = arith.constant -3.500000e-03 : f32
    %75 = vector.broadcast %cst_38 : f32 to vector<8x128xf32>
    %76 = arith.addf %74, %75 : vector<8x128xf32>
    %cst_39 = arith.constant 9.900000e-01 : f32
    %77 = vector.broadcast %cst_39 : f32 to vector<8x128xf32>
    %78 = arith.mulf %51, %77 : vector<8x128xf32>
    %cst_40 = arith.constant -7.000000e-02 : f32
    %79 = vector.broadcast %cst_40 : f32 to vector<8x128xf32>
    %80 = arith.subf %76, %79 : vector<8x128xf32>
    %81 = vector.broadcast %4 : vector<8x1xf32> to vector<8x128xf32>
    %82 = arith.mulf %81, %80 : vector<8x128xf32>
    %83 = arith.addf %78, %82 : vector<8x128xf32>
    %cst_41 = arith.constant -5.000000e-04 : f32
    %84 = vector.broadcast %cst_41 : f32 to vector<8x128xf32>
    %85 = arith.addf %83, %84 : vector<8x128xf32>
    %86 = arith.subf %76, %85 : vector<8x128xf32>
    %cst_42 = arith.constant 0.000000e+00 : f32
    %87 = vector.broadcast %cst_42 : f32 to vector<8x128xf32>
    %88 = arith.cmpf ogt, %86, %87 : vector<8x128xf32>
    %cst_43 = arith.constant 1.000000e+01 : f32
    %89 = vector.broadcast %cst_43 : f32 to vector<8x128xf32>
    %90 = arith.select %88, %89, %62 : vector<8x128xi1>, vector<8x128xf32>
    %cst_44 = arith.constant -6.000000e-01 : f32
    %91 = vector.broadcast %cst_44 : f32 to vector<8x128xf32>
    %92 = arith.addf %64, %91 : vector<8x128xf32>
    %93 = arith.select %88, %92, %64 : vector<8x128xi1>, vector<8x128xf32>
    %cst_45 = arith.constant -6.000000e-02 : f32
    %94 = vector.broadcast %cst_45 : f32 to vector<8x128xf32>
    %95 = arith.maximumf %85, %94 : vector<8x128xf32>
    %96 = arith.select %88, %95, %85 : vector<8x128xi1>, vector<8x128xf32>
    %cst_46 = arith.constant -7.000000e-02 : f32
    %97 = vector.broadcast %cst_46 : f32 to vector<8x128xf32>
    %98 = arith.select %88, %97, %76 : vector<8x128xi1>, vector<8x128xf32>
    %99 = arith.extui %88 : vector<8x128xi1> to vector<8x128xi32>
    %100 = arith.sitofp %99 : vector<8x128xi32> to vector<8x128xf32>
    %c1_47 = arith.constant 1 : index
    %c0_48 = arith.constant 0 : index
    %c0_49 = arith.constant 0 : index
    %101 = vector.load %arg7[%c1_47, %c0_48, %c0_49] : memref<32x8x128xf32, #tpu.memory_space<vmem>>, vector<1x8x128xf32>
    %102 = vector.shape_cast %101 : vector<1x8x128xf32> to vector<8x128xf32>
    %103 = vector.shape_cast %100 : vector<8x128xf32> to vector<1x8x128xf32>
    tpu.vector_store %arg7[%c1_47, %c0_48, %c0_49], %103 {strides = array<i32>} : memref<32x8x128xf32, #tpu.memory_space<vmem>>, vector<1x8x128xf32>,
    %c2_50 = arith.constant 2 : index
    %c0_51 = arith.constant 0 : index
    %c0_52 = arith.constant 0 : index
    %104 = vector.load %arg3[%c2_50, %c0_51, %c0_52] : memref<32x1x128xf32, #tpu.memory_space<vmem>>, vector<1x1x128xf32>
    %105 = vector.shape_cast %104 : vector<1x1x128xf32> to vector<1x128xf32>
    %cst_53 = arith.constant 8.000000e-01 : f32
    %106 = vector.broadcast %cst_53 : f32 to vector<8x128xf32>
    %107 = arith.mulf %90, %106 : vector<8x128xf32>
    %cst_54 = arith.constant 9.800000e-01 : f32
    %108 = vector.broadcast %cst_54 : f32 to vector<8x128xf32>
    %109 = arith.mulf %93, %108 : vector<8x128xf32>
    %110 = vector.broadcast %3 : vector<8x1xf32> to vector<8x128xf32>
    %111 = vector.broadcast %105 : vector<1x128xf32> to vector<8x128xf32>
    %112 = arith.mulf %110, %111 : vector<8x128xf32>
    %cst_55 = arith.constant 0.949999988 : f32
    %113 = vector.broadcast %cst_55 : f32 to vector<8x128xf32>
    %114 = arith.mulf %98, %113 : vector<8x128xf32>
    %115 = arith.addf %112, %107 : vector<8x128xf32>
    %116 = arith.addf %115, %109 : vector<8x128xf32>
    %cst_56 = arith.constant 1.000000e-03 : f32
    %117 = vector.broadcast %cst_56 : f32 to vector<8x128xf32>
    %118 = arith.mulf %117, %116 : vector<8x128xf32>
    %119 = arith.addf %114, %118 : vector<8x128xf32>
    %cst_57 = arith.constant -3.500000e-03 : f32
    %120 = vector.broadcast %cst_57 : f32 to vector<8x128xf32>
    %121 = arith.addf %119, %120 : vector<8x128xf32>
    %cst_58 = arith.constant 9.900000e-01 : f32
    %122 = vector.broadcast %cst_58 : f32 to vector<8x128xf32>
    %123 = arith.mulf %96, %122 : vector<8x128xf32>
    %cst_59 = arith.constant -7.000000e-02 : f32
    %124 = vector.broadcast %cst_59 : f32 to vector<8x128xf32>
    %125 = arith.subf %121, %124 : vector<8x128xf32>
    %126 = vector.broadcast %4 : vector<8x1xf32> to vector<8x128xf32>
    %127 = arith.mulf %126, %125 : vector<8x128xf32>
    %128 = arith.addf %123, %127 : vector<8x128xf32>
    %cst_60 = arith.constant -5.000000e-04 : f32
    %129 = vector.broadcast %cst_60 : f32 to vector<8x128xf32>
    %130 = arith.addf %128, %129 : vector<8x128xf32>
    %131 = arith.subf %121, %130 : vector<8x128xf32>
    %cst_61 = arith.constant 0.000000e+00 : f32
    %132 = vector.broadcast %cst_61 : f32 to vector<8x128xf32>
    %133 = arith.cmpf ogt, %131, %132 : vector<8x128xf32>
    %cst_62 = arith.constant 1.000000e+01 : f32
    %134 = vector.broadcast %cst_62 : f32 to vector<8x128xf32>
    %135 = arith.select %133, %134, %107 : vector<8x128xi1>, vector<8x128xf32>
    %cst_63 = arith.constant -6.000000e-01 : f32
    %136 = vector.broadcast %cst_63 : f32 to vector<8x128xf32>
    %137 = arith.addf %109, %136 : vector<8x128xf32>
    %138 = arith.select %133, %137, %109 : vector<8x128xi1>, vector<8x128xf32>
    %cst_64 = arith.constant -6.000000e-02 : f32
    %139 = vector.broadcast %cst_64 : f32 to vector<8x128xf32>
    %140 = arith.maximumf %130, %139 : vector<8x128xf32>
    %141 = arith.select %133, %140, %130 : vector<8x128xi1>, vector<8x128xf32>
    %cst_65 = arith.constant -7.000000e-02 : f32
    %142 = vector.broadcast %cst_65 : f32 to vector<8x128xf32>
    %143 = arith.select %133, %142, %121 : vector<8x128xi1>, vector<8x128xf32>
    %144 = arith.extui %133 : vector<8x128xi1> to vector<8x128xi32>
    %145 = arith.sitofp %144 : vector<8x128xi32> to vector<8x128xf32>
    %c2_66 = arith.constant 2 : index
    %c0_67 = arith.constant 0 : index
    %c0_68 = arith.constant 0 : index
    %146 = vector.load %arg7[%c2_66, %c0_67, %c0_68] : memref<32x8x128xf32, #tpu.memory_space<vmem>>, vector<1x8x128xf32>
    %147 = vector.shape_cast %146 : vector<1x8x128xf32> to vector<8x128xf32>
    %148 = vector.shape_cast %145 : vector<8x128xf32> to vector<1x8x128xf32>
    tpu.vector_store %arg7[%c2_66, %c0_67, %c0_68], %148 {strides = array<i32>} : memref<32x8x128xf32, #tpu.memory_space<vmem>>, vector<1x8x128xf32>,
    %c3_69 = arith.constant 3 : index
    %c0_70 = arith.constant 0 : index
    %c0_71 = arith.constant 0 : index
    %149 = vector.load %arg3[%c3_69, %c0_70, %c0_71] : memref<32x1x128xf32, #tpu.memory_space<vmem>>, vector<1x1x128xf32>
    %150 = vector.shape_cast %149 : vector<1x1x128xf32> to vector<1x128xf32>
    %cst_72 = arith.constant 8.000000e-01 : f32
    %151 = vector.broadcast %cst_72 : f32 to vector<8x128xf32>
    %152 = arith.mulf %135, %151 : vector<8x128xf32>
    %cst_73 = arith.constant 9.800000e-01 : f32
    %153 = vector.broadcast %cst_73 : f32 to vector<8x128xf32>
    %154 = arith.mulf %138, %153 : vector<8x128xf32>
    %155 = vector.broadcast %3 : vector<8x1xf32> to vector<8x128xf32>
    %156 = vector.broadcast %150 : vector<1x128xf32> to vector<8x128xf32>
    %157 = arith.mulf %155, %156 : vector<8x128xf32>
    %cst_74 = arith.constant 0.949999988 : f32
    %158 = vector.broadcast %cst_74 : f32 to vector<8x128xf32>
    %159 = arith.mulf %143, %158 : vector<8x128xf32>
    %160 = arith.addf %157, %152 : vector<8x128xf32>
    %161 = arith.addf %160, %154 : vector<8x128xf32>
    %cst_75 = arith.constant 1.000000e-03 : f32
    %162 = vector.broadcast %cst_75 : f32 to vector<8x128xf32>
    %163 = arith.mulf %162, %161 : vector<8x128xf32>
    %164 = arith.addf %159, %163 : vector<8x128xf32>
    %cst_76 = arith.constant -3.500000e-03 : f32
    %165 = vector.broadcast %cst_76 : f32 to vector<8x128xf32>
    %166 = arith.addf %164, %165 : vector<8x128xf32>
    %cst_77 = arith.constant 9.900000e-01 : f32
    %167 = vector.broadcast %cst_77 : f32 to vector<8x128xf32>
    %168 = arith.mulf %141, %167 : vector<8x128xf32>
    %cst_78 = arith.constant -7.000000e-02 : f32
    %169 = vector.broadcast %cst_78 : f32 to vector<8x128xf32>
    %170 = arith.subf %166, %169 : vector<8x128xf32>
    %171 = vector.broadcast %4 : vector<8x1xf32> to vector<8x128xf32>
    %172 = arith.mulf %171, %170 : vector<8x128xf32>
    %173 = arith.addf %168, %172 : vector<8x128xf32>
    %cst_79 = arith.constant -5.000000e-04 : f32
    %174 = vector.broadcast %cst_79 : f32 to vector<8x128xf32>
    %175 = arith.addf %173, %174 : vector<8x128xf32>
    %176 = arith.subf %166, %175 : vector<8x128xf32>
    %cst_80 = arith.constant 0.000000e+00 : f32
    %177 = vector.broadcast %cst_80 : f32 to vector<8x128xf32>
    %178 = arith.cmpf ogt, %176, %177 : vector<8x128xf32>
    %cst_81 = arith.constant 1.000000e+01 : f32
    %179 = vector.broadcast %cst_81 : f32 to vector<8x128xf32>
    %180 = arith.select %178, %179, %152 : vector<8x128xi1>, vector<8x128xf32>
    %cst_82 = arith.constant -6.000000e-01 : f32
    %181 = vector.broadcast %cst_82 : f32 to vector<8x128xf32>
    %182 = arith.addf %154, %181 : vector<8x128xf32>
    %183 = arith.select %178, %182, %154 : vector<8x128xi1>, vector<8x128xf32>
    %cst_83 = arith.constant -6.000000e-02 : f32
    %184 = vector.broadcast %cst_83 : f32 to vector<8x128xf32>
    %185 = arith.maximumf %175, %184 : vector<8x128xf32>
    %186 = arith.select %178, %185, %175 : vector<8x128xi1>, vector<8x128xf32>
    %cst_84 = arith.constant -7.000000e-02 : f32
    %187 = vector.broadcast %cst_84 : f32 to vector<8x128xf32>
    %188 = arith.select %178, %187, %166 : vector<8x128xi1>, vector<8x128xf32>
    %189 = arith.extui %178 : vector<8x128xi1> to vector<8x128xi32>
    %190 = arith.sitofp %189 : vector<8x128xi32> to vector<8x128xf32>
    %c3_85 = arith.constant 3 : index
    %c0_86 = arith.constant 0 : index
    %c0_87 = arith.constant 0 : index
    %191 = vector.load %arg7[%c3_85, %c0_86, %c0_87] : memref<32x8x128xf32, #tpu.memory_space<vmem>>, vector<1x8x128xf32>
    %192 = vector.shape_cast %191 : vector<1x8x128xf32> to vector<8x128xf32>
    %193 = vector.shape_cast %190 : vector<8x128xf32> to vector<1x8x128xf32>
    tpu.vector_store %arg7[%c3_85, %c0_86, %c0_87], %193 {strides = array<i32>} : memref<32x8x128xf32, #tpu.memory_space<vmem>>, vector<1x8x128xf32>,
    %c4 = arith.constant 4 : index
    %c0_88 = arith.constant 0 : index
    %c0_89 = arith.constant 0 : index
    %194 = vector.load %arg3[%c4, %c0_88, %c0_89] : memref<32x1x128xf32, #tpu.memory_space<vmem>>, vector<1x1x128xf32>
    %195 = vector.shape_cast %194 : vector<1x1x128xf32> to vector<1x128xf32>
    %cst_90 = arith.constant 8.000000e-01 : f32
    %196 = vector.broadcast %cst_90 : f32 to vector<8x128xf32>
    %197 = arith.mulf %180, %196 : vector<8x128xf32>
    %cst_91 = arith.constant 9.800000e-01 : f32
    %198 = vector.broadcast %cst_91 : f32 to vector<8x128xf32>
    %199 = arith.mulf %183, %198 : vector<8x128xf32>
    %200 = vector.broadcast %3 : vector<8x1xf32> to vector<8x128xf32>
    %201 = vector.broadcast %195 : vector<1x128xf32> to vector<8x128xf32>
    %202 = arith.mulf %200, %201 : vector<8x128xf32>
    %cst_92 = arith.constant 0.949999988 : f32
    %203 = vector.broadcast %cst_92 : f32 to vector<8x128xf32>
    %204 = arith.mulf %188, %203 : vector<8x128xf32>
    %205 = arith.addf %202, %197 : vector<8x128xf32>
    %206 = arith.addf %205, %199 : vector<8x128xf32>
    %cst_93 = arith.constant 1.000000e-03 : f32
    %207 = vector.broadcast %cst_93 : f32 to vector<8x128xf32>
    %208 = arith.mulf %207, %206 : vector<8x128xf32>
    %209 = arith.addf %204, %208 : vector<8x128xf32>
    %cst_94 = arith.constant -3.500000e-03 : f32
    %210 = vector.broadcast %cst_94 : f32 to vector<8x128xf32>
    %211 = arith.addf %209, %210 : vector<8x128xf32>
    %cst_95 = arith.constant 9.900000e-01 : f32
    %212 = vector.broadcast %cst_95 : f32 to vector<8x128xf32>
    %213 = arith.mulf %186, %212 : vector<8x128xf32>
    %cst_96 = arith.constant -7.000000e-02 : f32
    %214 = vector.broadcast %cst_96 : f32 to vector<8x128xf32>
    %215 = arith.subf %211, %214 : vector<8x128xf32>
    %216 = vector.broadcast %4 : vector<8x1xf32> to vector<8x128xf32>
    %217 = arith.mulf %216, %215 : vector<8x128xf32>
    %218 = arith.addf %213, %217 : vector<8x128xf32>
    %cst_97 = arith.constant -5.000000e-04 : f32
    %219 = vector.broadcast %cst_97 : f32 to vector<8x128xf32>
    %220 = arith.addf %218, %219 : vector<8x128xf32>
    %221 = arith.subf %211, %220 : vector<8x128xf32>
    %cst_98 = arith.constant 0.000000e+00 : f32
    %222 = vector.broadcast %cst_98 : f32 to vector<8x128xf32>
    %223 = arith.cmpf ogt, %221, %222 : vector<8x128xf32>
    %cst_99 = arith.constant 1.000000e+01 : f32
    %224 = vector.broadcast %cst_99 : f32 to vector<8x128xf32>
    %225 = arith.select %223, %224, %197 : vector<8x128xi1>, vector<8x128xf32>
    %cst_100 = arith.constant -6.000000e-01 : f32
    %226 = vector.broadcast %cst_100 : f32 to vector<8x128xf32>
    %227 = arith.addf %199, %226 : vector<8x128xf32>
    %228 = arith.select %223, %227, %199 : vector<8x128xi1>, vector<8x128xf32>
    %cst_101 = arith.constant -6.000000e-02 : f32
    %229 = vector.broadcast %cst_101 : f32 to vector<8x128xf32>
    %230 = arith.maximumf %220, %229 : vector<8x128xf32>
    %231 = arith.select %223, %230, %220 : vector<8x128xi1>, vector<8x128xf32>
    %cst_102 = arith.constant -7.000000e-02 : f32
    %232 = vector.broadcast %cst_102 : f32 to vector<8x128xf32>
    %233 = arith.select %223, %232, %211 : vector<8x128xi1>, vector<8x128xf32>
    %234 = arith.extui %223 : vector<8x128xi1> to vector<8x128xi32>
    %235 = arith.sitofp %234 : vector<8x128xi32> to vector<8x128xf32>
    %c4_103 = arith.constant 4 : index
    %c0_104 = arith.constant 0 : index
    %c0_105 = arith.constant 0 : index
    %236 = vector.load %arg7[%c4_103, %c0_104, %c0_105] : memref<32x8x128xf32, #tpu.memory_space<vmem>>, vector<1x8x128xf32>
    %237 = vector.shape_cast %236 : vector<1x8x128xf32> to vector<8x128xf32>
    %238 = vector.shape_cast %235 : vector<8x128xf32> to vector<1x8x128xf32>
    tpu.vector_store %arg7[%c4_103, %c0_104, %c0_105], %238 {strides = array<i32>} : memref<32x8x128xf32, #tpu.memory_space<vmem>>, vector<1x8x128xf32>,
    %c5 = arith.constant 5 : index
    %c0_106 = arith.constant 0 : index
    %c0_107 = arith.constant 0 : index
    %239 = vector.load %arg3[%c5, %c0_106, %c0_107] : memref<32x1x128xf32, #tpu.memory_space<vmem>>, vector<1x1x128xf32>
    %240 = vector.shape_cast %239 : vector<1x1x128xf32> to vector<1x128xf32>
    %cst_108 = arith.constant 8.000000e-01 : f32
    %241 = vector.broadcast %cst_108 : f32 to vector<8x128xf32>
    %242 = arith.mulf %225, %241 : vector<8x128xf32>
    %cst_109 = arith.constant 9.800000e-01 : f32
    %243 = vector.broadcast %cst_109 : f32 to vector<8x128xf32>
    %244 = arith.mulf %228, %243 : vector<8x128xf32>
    %245 = vector.broadcast %3 : vector<8x1xf32> to vector<8x128xf32>
    %246 = vector.broadcast %240 : vector<1x128xf32> to vector<8x128xf32>
    %247 = arith.mulf %245, %246 : vector<8x128xf32>
    %cst_110 = arith.constant 0.949999988 : f32
    %248 = vector.broadcast %cst_110 : f32 to vector<8x128xf32>
    %249 = arith.mulf %233, %248 : vector<8x128xf32>
    %250 = arith.addf %247, %242 : vector<8x128xf32>
    %251 = arith.addf %250, %244 : vector<8x128xf32>
    %cst_111 = arith.constant 1.000000e-03 : f32
    %252 = vector.broadcast %cst_111 : f32 to vector<8x128xf32>
    %253 = arith.mulf %252, %251 : vector<8x128xf32>
    %254 = arith.addf %249, %253 : vector<8x128xf32>
    %cst_112 = arith.constant -3.500000e-03 : f32
    %255 = vector.broadcast %cst_112 : f32 to vector<8x128xf32>
    %256 = arith.addf %254, %255 : vector<8x128xf32>
    %cst_113 = arith.constant 9.900000e-01 : f32
    %257 = vector.broadcast %cst_113 : f32 to vector<8x128xf32>
    %258 = arith.mulf %231, %257 : vector<8x128xf32>
    %cst_114 = arith.constant -7.000000e-02 : f32
    %259 = vector.broadcast %cst_114 : f32 to vector<8x128xf32>
    %260 = arith.subf %256, %259 : vector<8x128xf32>
    %261 = vector.broadcast %4 : vector<8x1xf32> to vector<8x128xf32>
    %262 = arith.mulf %261, %260 : vector<8x128xf32>
    %263 = arith.addf %258, %262 : vector<8x128xf32>
    %cst_115 = arith.constant -5.000000e-04 : f32
    %264 = vector.broadcast %cst_115 : f32 to vector<8x128xf32>
    %265 = arith.addf %263, %264 : vector<8x128xf32>
    %266 = arith.subf %256, %265 : vector<8x128xf32>
    %cst_116 = arith.constant 0.000000e+00 : f32
    %267 = vector.broadcast %cst_116 : f32 to vector<8x128xf32>
    %268 = arith.cmpf ogt, %266, %267 : vector<8x128xf32>
    %cst_117 = arith.constant 1.000000e+01 : f32
    %269 = vector.broadcast %cst_117 : f32 to vector<8x128xf32>
    %270 = arith.select %268, %269, %242 : vector<8x128xi1>, vector<8x128xf32>
    %cst_118 = arith.constant -6.000000e-01 : f32
    %271 = vector.broadcast %cst_118 : f32 to vector<8x128xf32>
    %272 = arith.addf %244, %271 : vector<8x128xf32>
    %273 = arith.select %268, %272, %244 : vector<8x128xi1>, vector<8x128xf32>
    %cst_119 = arith.constant -6.000000e-02 : f32
    %274 = vector.broadcast %cst_119 : f32 to vector<8x128xf32>
    %275 = arith.maximumf %265, %274 : vector<8x128xf32>
    %276 = arith.select %268, %275, %265 : vector<8x128xi1>, vector<8x128xf32>
    %cst_120 = arith.constant -7.000000e-02 : f32
    %277 = vector.broadcast %cst_120 : f32 to vector<8x128xf32>
    %278 = arith.select %268, %277, %256 : vector<8x128xi1>, vector<8x128xf32>
    %279 = arith.extui %268 : vector<8x128xi1> to vector<8x128xi32>
    %280 = arith.sitofp %279 : vector<8x128xi32> to vector<8x128xf32>
    %c5_121 = arith.constant 5 : index
    %c0_122 = arith.constant 0 : index
    %c0_123 = arith.constant 0 : index
    %281 = vector.load %arg7[%c5_121, %c0_122, %c0_123] : memref<32x8x128xf32, #tpu.memory_space<vmem>>, vector<1x8x128xf32>
    %282 = vector.shape_cast %281 : vector<1x8x128xf32> to vector<8x128xf32>
    %283 = vector.shape_cast %280 : vector<8x128xf32> to vector<1x8x128xf32>
    tpu.vector_store %arg7[%c5_121, %c0_122, %c0_123], %283 {strides = array<i32>} : memref<32x8x128xf32, #tpu.memory_space<vmem>>, vector<1x8x128xf32>,
    %c6 = arith.constant 6 : index
    %c0_124 = arith.constant 0 : index
    %c0_125 = arith.constant 0 : index
    %284 = vector.load %arg3[%c6, %c0_124, %c0_125] : memref<32x1x128xf32, #tpu.memory_space<vmem>>, vector<1x1x128xf32>
    %285 = vector.shape_cast %284 : vector<1x1x128xf32> to vector<1x128xf32>
    %cst_126 = arith.constant 8.000000e-01 : f32
    %286 = vector.broadcast %cst_126 : f32 to vector<8x128xf32>
    %287 = arith.mulf %270, %286 : vector<8x128xf32>
    %cst_127 = arith.constant 9.800000e-01 : f32
    %288 = vector.broadcast %cst_127 : f32 to vector<8x128xf32>
    %289 = arith.mulf %273, %288 : vector<8x128xf32>
    %290 = vector.broadcast %3 : vector<8x1xf32> to vector<8x128xf32>
    %291 = vector.broadcast %285 : vector<1x128xf32> to vector<8x128xf32>
    %292 = arith.mulf %290, %291 : vector<8x128xf32>
    %cst_128 = arith.constant 0.949999988 : f32
    %293 = vector.broadcast %cst_128 : f32 to vector<8x128xf32>
    %294 = arith.mulf %278, %293 : vector<8x128xf32>
    %295 = arith.addf %292, %287 : vector<8x128xf32>
    %296 = arith.addf %295, %289 : vector<8x128xf32>
    %cst_129 = arith.constant 1.000000e-03 : f32
    %297 = vector.broadcast %cst_129 : f32 to vector<8x128xf32>
    %298 = arith.mulf %297, %296 : vector<8x128xf32>
    %299 = arith.addf %294, %298 : vector<8x128xf32>
    %cst_130 = arith.constant -3.500000e-03 : f32
    %300 = vector.broadcast %cst_130 : f32 to vector<8x128xf32>
    %301 = arith.addf %299, %300 : vector<8x128xf32>
    %cst_131 = arith.constant 9.900000e-01 : f32
    %302 = vector.broadcast %cst_131 : f32 to vector<8x128xf32>
    %303 = arith.mulf %276, %302 : vector<8x128xf32>
    %cst_132 = arith.constant -7.000000e-02 : f32
    %304 = vector.broadcast %cst_132 : f32 to vector<8x128xf32>
    %305 = arith.subf %301, %304 : vector<8x128xf32>
    %306 = vector.broadcast %4 : vector<8x1xf32> to vector<8x128xf32>
    %307 = arith.mulf %306, %305 : vector<8x128xf32>
    %308 = arith.addf %303, %307 : vector<8x128xf32>
    %cst_133 = arith.constant -5.000000e-04 : f32
    %309 = vector.broadcast %cst_133 : f32 to vector<8x128xf32>
    %310 = arith.addf %308, %309 : vector<8x128xf32>
    %311 = arith.subf %301, %310 : vector<8x128xf32>
    %cst_134 = arith.constant 0.000000e+00 : f32
    %312 = vector.broadcast %cst_134 : f32 to vector<8x128xf32>
    %313 = arith.cmpf ogt, %311, %312 : vector<8x128xf32>
    %cst_135 = arith.constant 1.000000e+01 : f32
    %314 = vector.broadcast %cst_135 : f32 to vector<8x128xf32>
    %315 = arith.select %313, %314, %287 : vector<8x128xi1>, vector<8x128xf32>
    %cst_136 = arith.constant -6.000000e-01 : f32
    %316 = vector.broadcast %cst_136 : f32 to vector<8x128xf32>
    %317 = arith.addf %289, %316 : vector<8x128xf32>
    %318 = arith.select %313, %317, %289 : vector<8x128xi1>, vector<8x128xf32>
    %cst_137 = arith.constant -6.000000e-02 : f32
    %319 = vector.broadcast %cst_137 : f32 to vector<8x128xf32>
    %320 = arith.maximumf %310, %319 : vector<8x128xf32>
    %321 = arith.select %313, %320, %310 : vector<8x128xi1>, vector<8x128xf32>
    %cst_138 = arith.constant -7.000000e-02 : f32
    %322 = vector.broadcast %cst_138 : f32 to vector<8x128xf32>
    %323 = arith.select %313, %322, %301 : vector<8x128xi1>, vector<8x128xf32>
    %324 = arith.extui %313 : vector<8x128xi1> to vector<8x128xi32>
    %325 = arith.sitofp %324 : vector<8x128xi32> to vector<8x128xf32>
    %c6_139 = arith.constant 6 : index
    %c0_140 = arith.constant 0 : index
    %c0_141 = arith.constant 0 : index
    %326 = vector.load %arg7[%c6_139, %c0_140, %c0_141] : memref<32x8x128xf32, #tpu.memory_space<vmem>>, vector<1x8x128xf32>
    %327 = vector.shape_cast %326 : vector<1x8x128xf32> to vector<8x128xf32>
    %328 = vector.shape_cast %325 : vector<8x128xf32> to vector<1x8x128xf32>
    tpu.vector_store %arg7[%c6_139, %c0_140, %c0_141], %328 {strides = array<i32>} : memref<32x8x128xf32, #tpu.memory_space<vmem>>, vector<1x8x128xf32>,
    %c7 = arith.constant 7 : index
    %c0_142 = arith.constant 0 : index
    %c0_143 = arith.constant 0 : index
    %329 = vector.load %arg3[%c7, %c0_142, %c0_143] : memref<32x1x128xf32, #tpu.memory_space<vmem>>, vector<1x1x128xf32>
    %330 = vector.shape_cast %329 : vector<1x1x128xf32> to vector<1x128xf32>
    %cst_144 = arith.constant 8.000000e-01 : f32
    %331 = vector.broadcast %cst_144 : f32 to vector<8x128xf32>
    %332 = arith.mulf %315, %331 : vector<8x128xf32>
    %cst_145 = arith.constant 9.800000e-01 : f32
    %333 = vector.broadcast %cst_145 : f32 to vector<8x128xf32>
    %334 = arith.mulf %318, %333 : vector<8x128xf32>
    %335 = vector.broadcast %3 : vector<8x1xf32> to vector<8x128xf32>
    %336 = vector.broadcast %330 : vector<1x128xf32> to vector<8x128xf32>
    %337 = arith.mulf %335, %336 : vector<8x128xf32>
    %cst_146 = arith.constant 0.949999988 : f32
    %338 = vector.broadcast %cst_146 : f32 to vector<8x128xf32>
    %339 = arith.mulf %323, %338 : vector<8x128xf32>
    %340 = arith.addf %337, %332 : vector<8x128xf32>
    %341 = arith.addf %340, %334 : vector<8x128xf32>
    %cst_147 = arith.constant 1.000000e-03 : f32
    %342 = vector.broadcast %cst_147 : f32 to vector<8x128xf32>
    %343 = arith.mulf %342, %341 : vector<8x128xf32>
    %344 = arith.addf %339, %343 : vector<8x128xf32>
    %cst_148 = arith.constant -3.500000e-03 : f32
    %345 = vector.broadcast %cst_148 : f32 to vector<8x128xf32>
    %346 = arith.addf %344, %345 : vector<8x128xf32>
    %cst_149 = arith.constant 9.900000e-01 : f32
    %347 = vector.broadcast %cst_149 : f32 to vector<8x128xf32>
    %348 = arith.mulf %321, %347 : vector<8x128xf32>
    %cst_150 = arith.constant -7.000000e-02 : f32
    %349 = vector.broadcast %cst_150 : f32 to vector<8x128xf32>
    %350 = arith.subf %346, %349 : vector<8x128xf32>
    %351 = vector.broadcast %4 : vector<8x1xf32> to vector<8x128xf32>
    %352 = arith.mulf %351, %350 : vector<8x128xf32>
    %353 = arith.addf %348, %352 : vector<8x128xf32>
    %cst_151 = arith.constant -5.000000e-04 : f32
    %354 = vector.broadcast %cst_151 : f32 to vector<8x128xf32>
    %355 = arith.addf %353, %354 : vector<8x128xf32>
    %356 = arith.subf %346, %355 : vector<8x128xf32>
    %cst_152 = arith.constant 0.000000e+00 : f32
    %357 = vector.broadcast %cst_152 : f32 to vector<8x128xf32>
    %358 = arith.cmpf ogt, %356, %357 : vector<8x128xf32>
    %cst_153 = arith.constant 1.000000e+01 : f32
    %359 = vector.broadcast %cst_153 : f32 to vector<8x128xf32>
    %360 = arith.select %358, %359, %332 : vector<8x128xi1>, vector<8x128xf32>
    %cst_154 = arith.constant -6.000000e-01 : f32
    %361 = vector.broadcast %cst_154 : f32 to vector<8x128xf32>
    %362 = arith.addf %334, %361 : vector<8x128xf32>
    %363 = arith.select %358, %362, %334 : vector<8x128xi1>, vector<8x128xf32>
    %cst_155 = arith.constant -6.000000e-02 : f32
    %364 = vector.broadcast %cst_155 : f32 to vector<8x128xf32>
    %365 = arith.maximumf %355, %364 : vector<8x128xf32>
    %366 = arith.select %358, %365, %355 : vector<8x128xi1>, vector<8x128xf32>
    %cst_156 = arith.constant -7.000000e-02 : f32
    %367 = vector.broadcast %cst_156 : f32 to vector<8x128xf32>
    %368 = arith.select %358, %367, %346 : vector<8x128xi1>, vector<8x128xf32>
    %369 = arith.extui %358 : vector<8x128xi1> to vector<8x128xi32>
    %370 = arith.sitofp %369 : vector<8x128xi32> to vector<8x128xf32>
    %c7_157 = arith.constant 7 : index
    %c0_158 = arith.constant 0 : index
    %c0_159 = arith.constant 0 : index
    %371 = vector.load %arg7[%c7_157, %c0_158, %c0_159] : memref<32x8x128xf32, #tpu.memory_space<vmem>>, vector<1x8x128xf32>
    %372 = vector.shape_cast %371 : vector<1x8x128xf32> to vector<8x128xf32>
    %373 = vector.shape_cast %370 : vector<8x128xf32> to vector<1x8x128xf32>
    tpu.vector_store %arg7[%c7_157, %c0_158, %c0_159], %373 {strides = array<i32>} : memref<32x8x128xf32, #tpu.memory_space<vmem>>, vector<1x8x128xf32>,
    %c8 = arith.constant 8 : index
    %c0_160 = arith.constant 0 : index
    %c0_161 = arith.constant 0 : index
    %374 = vector.load %arg3[%c8, %c0_160, %c0_161] : memref<32x1x128xf32, #tpu.memory_space<vmem>>, vector<1x1x128xf32>
    %375 = vector.shape_cast %374 : vector<1x1x128xf32> to vector<1x128xf32>
    %cst_162 = arith.constant 8.000000e-01 : f32
    %376 = vector.broadcast %cst_162 : f32 to vector<8x128xf32>
    %377 = arith.mulf %360, %376 : vector<8x128xf32>
    %cst_163 = arith.constant 9.800000e-01 : f32
    %378 = vector.broadcast %cst_163 : f32 to vector<8x128xf32>
    %379 = arith.mulf %363, %378 : vector<8x128xf32>
    %380 = vector.broadcast %3 : vector<8x1xf32> to vector<8x128xf32>
    %381 = vector.broadcast %375 : vector<1x128xf32> to vector<8x128xf32>
    %382 = arith.mulf %380, %381 : vector<8x128xf32>
    %cst_164 = arith.constant 0.949999988 : f32
    %383 = vector.broadcast %cst_164 : f32 to vector<8x128xf32>
    %384 = arith.mulf %368, %383 : vector<8x128xf32>
    %385 = arith.addf %382, %377 : vector<8x128xf32>
    %386 = arith.addf %385, %379 : vector<8x128xf32>
    %cst_165 = arith.constant 1.000000e-03 : f32
    %387 = vector.broadcast %cst_165 : f32 to vector<8x128xf32>
    %388 = arith.mulf %387, %386 : vector<8x128xf32>
    %389 = arith.addf %384, %388 : vector<8x128xf32>
    %cst_166 = arith.constant -3.500000e-03 : f32
    %390 = vector.broadcast %cst_166 : f32 to vector<8x128xf32>
    %391 = arith.addf %389, %390 : vector<8x128xf32>
    %cst_167 = arith.constant 9.900000e-01 : f32
    %392 = vector.broadcast %cst_167 : f32 to vector<8x128xf32>
    %393 = arith.mulf %366, %392 : vector<8x128xf32>
    %cst_168 = arith.constant -7.000000e-02 : f32
    %394 = vector.broadcast %cst_168 : f32 to vector<8x128xf32>
    %395 = arith.subf %391, %394 : vector<8x128xf32>
    %396 = vector.broadcast %4 : vector<8x1xf32> to vector<8x128xf32>
    %397 = arith.mulf %396, %395 : vector<8x128xf32>
    %398 = arith.addf %393, %397 : vector<8x128xf32>
    %cst_169 = arith.constant -5.000000e-04 : f32
    %399 = vector.broadcast %cst_169 : f32 to vector<8x128xf32>
    %400 = arith.addf %398, %399 : vector<8x128xf32>
    %401 = arith.subf %391, %400 : vector<8x128xf32>
    %cst_170 = arith.constant 0.000000e+00 : f32
    %402 = vector.broadcast %cst_170 : f32 to vector<8x128xf32>
    %403 = arith.cmpf ogt, %401, %402 : vector<8x128xf32>
    %cst_171 = arith.constant 1.000000e+01 : f32
    %404 = vector.broadcast %cst_171 : f32 to vector<8x128xf32>
    %405 = arith.select %403, %404, %377 : vector<8x128xi1>, vector<8x128xf32>
    %cst_172 = arith.constant -6.000000e-01 : f32
    %406 = vector.broadcast %cst_172 : f32 to vector<8x128xf32>
    %407 = arith.addf %379, %406 : vector<8x128xf32>
    %408 = arith.select %403, %407, %379 : vector<8x128xi1>, vector<8x128xf32>
    %cst_173 = arith.constant -6.000000e-02 : f32
    %409 = vector.broadcast %cst_173 : f32 to vector<8x128xf32>
    %410 = arith.maximumf %400, %409 : vector<8x128xf32>
    %411 = arith.select %403, %410, %400 : vector<8x128xi1>, vector<8x128xf32>
    %cst_174 = arith.constant -7.000000e-02 : f32
    %412 = vector.broadcast %cst_174 : f32 to vector<8x128xf32>
    %413 = arith.select %403, %412, %391 : vector<8x128xi1>, vector<8x128xf32>
    %414 = arith.extui %403 : vector<8x128xi1> to vector<8x128xi32>
    %415 = arith.sitofp %414 : vector<8x128xi32> to vector<8x128xf32>
    %c8_175 = arith.constant 8 : index
    %c0_176 = arith.constant 0 : index
    %c0_177 = arith.constant 0 : index
    %416 = vector.load %arg7[%c8_175, %c0_176, %c0_177] : memref<32x8x128xf32, #tpu.memory_space<vmem>>, vector<1x8x128xf32>
    %417 = vector.shape_cast %416 : vector<1x8x128xf32> to vector<8x128xf32>
    %418 = vector.shape_cast %415 : vector<8x128xf32> to vector<1x8x128xf32>
    tpu.vector_store %arg7[%c8_175, %c0_176, %c0_177], %418 {strides = array<i32>} : memref<32x8x128xf32, #tpu.memory_space<vmem>>, vector<1x8x128xf32>,
    %419 = arith.select %13, %413, %368 : vector<8x128xf32>
    %420 = arith.select %13, %405, %360 : vector<8x128xf32>
    %421 = arith.select %13, %408, %363 : vector<8x128xf32>
    %422 = arith.select %13, %411, %366 : vector<8x128xf32>
    %c9 = arith.constant 9 : index
    %c0_178 = arith.constant 0 : index
    %c0_179 = arith.constant 0 : index
    %423 = vector.load %arg3[%c9, %c0_178, %c0_179] : memref<32x1x128xf32, #tpu.memory_space<vmem>>, vector<1x1x128xf32>
    %424 = vector.shape_cast %423 : vector<1x1x128xf32> to vector<1x128xf32>
    %cst_180 = arith.constant 8.000000e-01 : f32
    %425 = vector.broadcast %cst_180 : f32 to vector<8x128xf32>
    %426 = arith.mulf %420, %425 : vector<8x128xf32>
    %cst_181 = arith.constant 9.800000e-01 : f32
    %427 = vector.broadcast %cst_181 : f32 to vector<8x128xf32>
    %428 = arith.mulf %421, %427 : vector<8x128xf32>
    %429 = vector.broadcast %3 : vector<8x1xf32> to vector<8x128xf32>
    %430 = vector.broadcast %424 : vector<1x128xf32> to vector<8x128xf32>
    %431 = arith.mulf %429, %430 : vector<8x128xf32>
    %cst_182 = arith.constant 0.949999988 : f32
    %432 = vector.broadcast %cst_182 : f32 to vector<8x128xf32>
    %433 = arith.mulf %419, %432 : vector<8x128xf32>
    %434 = arith.addf %431, %426 : vector<8x128xf32>
    %435 = arith.addf %434, %428 : vector<8x128xf32>
    %cst_183 = arith.constant 1.000000e-03 : f32
    %436 = vector.broadcast %cst_183 : f32 to vector<8x128xf32>
    %437 = arith.mulf %436, %435 : vector<8x128xf32>
    %438 = arith.addf %433, %437 : vector<8x128xf32>
    %cst_184 = arith.constant -3.500000e-03 : f32
    %439 = vector.broadcast %cst_184 : f32 to vector<8x128xf32>
    %440 = arith.addf %438, %439 : vector<8x128xf32>
    %cst_185 = arith.constant 9.900000e-01 : f32
    %441 = vector.broadcast %cst_185 : f32 to vector<8x128xf32>
    %442 = arith.mulf %422, %441 : vector<8x128xf32>
    %cst_186 = arith.constant -7.000000e-02 : f32
    %443 = vector.broadcast %cst_186 : f32 to vector<8x128xf32>
    %444 = arith.subf %440, %443 : vector<8x128xf32>
    %445 = vector.broadcast %4 : vector<8x1xf32> to vector<8x128xf32>
    %446 = arith.mulf %445, %444 : vector<8x128xf32>
    %447 = arith.addf %442, %446 : vector<8x128xf32>
    %cst_187 = arith.constant -5.000000e-04 : f32
    %448 = vector.broadcast %cst_187 : f32 to vector<8x128xf32>
    %449 = arith.addf %447, %448 : vector<8x128xf32>
    %450 = arith.subf %440, %449 : vector<8x128xf32>
    %cst_188 = arith.constant 0.000000e+00 : f32
    %451 = vector.broadcast %cst_188 : f32 to vector<8x128xf32>
    %452 = arith.cmpf ogt, %450, %451 : vector<8x128xf32>
    %cst_189 = arith.constant 1.000000e+01 : f32
    %453 = vector.broadcast %cst_189 : f32 to vector<8x128xf32>
    %454 = arith.select %452, %453, %426 : vector<8x128xi1>, vector<8x128xf32>
    %cst_190 = arith.constant -6.000000e-01 : f32
    %455 = vector.broadcast %cst_190 : f32 to vector<8x128xf32>
    %456 = arith.addf %428, %455 : vector<8x128xf32>
    %457 = arith.select %452, %456, %428 : vector<8x128xi1>, vector<8x128xf32>
    %cst_191 = arith.constant -6.000000e-02 : f32
    %458 = vector.broadcast %cst_191 : f32 to vector<8x128xf32>
    %459 = arith.maximumf %449, %458 : vector<8x128xf32>
    %460 = arith.select %452, %459, %449 : vector<8x128xi1>, vector<8x128xf32>
    %cst_192 = arith.constant -7.000000e-02 : f32
    %461 = vector.broadcast %cst_192 : f32 to vector<8x128xf32>
    %462 = arith.select %452, %461, %440 : vector<8x128xi1>, vector<8x128xf32>
    %463 = arith.extui %452 : vector<8x128xi1> to vector<8x128xi32>
    %464 = arith.sitofp %463 : vector<8x128xi32> to vector<8x128xf32>
    %c9_193 = arith.constant 9 : index
    %c0_194 = arith.constant 0 : index
    %c0_195 = arith.constant 0 : index
    %465 = vector.load %arg7[%c9_193, %c0_194, %c0_195] : memref<32x8x128xf32, #tpu.memory_space<vmem>>, vector<1x8x128xf32>
    %466 = vector.shape_cast %465 : vector<1x8x128xf32> to vector<8x128xf32>
    %467 = vector.shape_cast %464 : vector<8x128xf32> to vector<1x8x128xf32>
    tpu.vector_store %arg7[%c9_193, %c0_194, %c0_195], %467 {strides = array<i32>} : memref<32x8x128xf32, #tpu.memory_space<vmem>>, vector<1x8x128xf32>,
    %468 = arith.select %13, %462, %419 : vector<8x128xf32>
    %469 = arith.select %13, %454, %420 : vector<8x128xf32>
    %470 = arith.select %13, %457, %421 : vector<8x128xf32>
    %471 = arith.select %13, %460, %422 : vector<8x128xf32>
    %c10 = arith.constant 10 : index
    %c0_196 = arith.constant 0 : index
    %c0_197 = arith.constant 0 : index
    %472 = vector.load %arg3[%c10, %c0_196, %c0_197] : memref<32x1x128xf32, #tpu.memory_space<vmem>>, vector<1x1x128xf32>
    %473 = vector.shape_cast %472 : vector<1x1x128xf32> to vector<1x128xf32>
    %cst_198 = arith.constant 8.000000e-01 : f32
    %474 = vector.broadcast %cst_198 : f32 to vector<8x128xf32>
    %475 = arith.mulf %469, %474 : vector<8x128xf32>
    %cst_199 = arith.constant 9.800000e-01 : f32
    %476 = vector.broadcast %cst_199 : f32 to vector<8x128xf32>
    %477 = arith.mulf %470, %476 : vector<8x128xf32>
    %478 = vector.broadcast %3 : vector<8x1xf32> to vector<8x128xf32>
    %479 = vector.broadcast %473 : vector<1x128xf32> to vector<8x128xf32>
    %480 = arith.mulf %478, %479 : vector<8x128xf32>
    %cst_200 = arith.constant 0.949999988 : f32
    %481 = vector.broadcast %cst_200 : f32 to vector<8x128xf32>
    %482 = arith.mulf %468, %481 : vector<8x128xf32>
    %483 = arith.addf %480, %475 : vector<8x128xf32>
    %484 = arith.addf %483, %477 : vector<8x128xf32>
    %cst_201 = arith.constant 1.000000e-03 : f32
    %485 = vector.broadcast %cst_201 : f32 to vector<8x128xf32>
    %486 = arith.mulf %485, %484 : vector<8x128xf32>
    %487 = arith.addf %482, %486 : vector<8x128xf32>
    %cst_202 = arith.constant -3.500000e-03 : f32
    %488 = vector.broadcast %cst_202 : f32 to vector<8x128xf32>
    %489 = arith.addf %487, %488 : vector<8x128xf32>
    %cst_203 = arith.constant 9.900000e-01 : f32
    %490 = vector.broadcast %cst_203 : f32 to vector<8x128xf32>
    %491 = arith.mulf %471, %490 : vector<8x128xf32>
    %cst_204 = arith.constant -7.000000e-02 : f32
    %492 = vector.broadcast %cst_204 : f32 to vector<8x128xf32>
    %493 = arith.subf %489, %492 : vector<8x128xf32>
    %494 = vector.broadcast %4 : vector<8x1xf32> to vector<8x128xf32>
    %495 = arith.mulf %494, %493 : vector<8x128xf32>
    %496 = arith.addf %491, %495 : vector<8x128xf32>
    %cst_205 = arith.constant -5.000000e-04 : f32
    %497 = vector.broadcast %cst_205 : f32 to vector<8x128xf32>
    %498 = arith.addf %496, %497 : vector<8x128xf32>
    %499 = arith.subf %489, %498 : vector<8x128xf32>
    %cst_206 = arith.constant 0.000000e+00 : f32
    %500 = vector.broadcast %cst_206 : f32 to vector<8x128xf32>
    %501 = arith.cmpf ogt, %499, %500 : vector<8x128xf32>
    %cst_207 = arith.constant 1.000000e+01 : f32
    %502 = vector.broadcast %cst_207 : f32 to vector<8x128xf32>
    %503 = arith.select %501, %502, %475 : vector<8x128xi1>, vector<8x128xf32>
    %cst_208 = arith.constant -6.000000e-01 : f32
    %504 = vector.broadcast %cst_208 : f32 to vector<8x128xf32>
    %505 = arith.addf %477, %504 : vector<8x128xf32>
    %506 = arith.select %501, %505, %477 : vector<8x128xi1>, vector<8x128xf32>
    %cst_209 = arith.constant -6.000000e-02 : f32
    %507 = vector.broadcast %cst_209 : f32 to vector<8x128xf32>
    %508 = arith.maximumf %498, %507 : vector<8x128xf32>
    %509 = arith.select %501, %508, %498 : vector<8x128xi1>, vector<8x128xf32>
    %cst_210 = arith.constant -7.000000e-02 : f32
    %510 = vector.broadcast %cst_210 : f32 to vector<8x128xf32>
    %511 = arith.select %501, %510, %489 : vector<8x128xi1>, vector<8x128xf32>
    %512 = arith.extui %501 : vector<8x128xi1> to vector<8x128xi32>
    %513 = arith.sitofp %512 : vector<8x128xi32> to vector<8x128xf32>
    %c10_211 = arith.constant 10 : index
    %c0_212 = arith.constant 0 : index
    %c0_213 = arith.constant 0 : index
    %514 = vector.load %arg7[%c10_211, %c0_212, %c0_213] : memref<32x8x128xf32, #tpu.memory_space<vmem>>, vector<1x8x128xf32>
    %515 = vector.shape_cast %514 : vector<1x8x128xf32> to vector<8x128xf32>
    %516 = vector.shape_cast %513 : vector<8x128xf32> to vector<1x8x128xf32>
    tpu.vector_store %arg7[%c10_211, %c0_212, %c0_213], %516 {strides = array<i32>} : memref<32x8x128xf32, #tpu.memory_space<vmem>>, vector<1x8x128xf32>,
    %517 = arith.select %13, %511, %468 : vector<8x128xf32>
    %518 = arith.select %13, %503, %469 : vector<8x128xf32>
    %519 = arith.select %13, %506, %470 : vector<8x128xf32>
    %520 = arith.select %13, %509, %471 : vector<8x128xf32>
    %c11 = arith.constant 11 : index
    %c0_214 = arith.constant 0 : index
    %c0_215 = arith.constant 0 : index
    %521 = vector.load %arg3[%c11, %c0_214, %c0_215] : memref<32x1x128xf32, #tpu.memory_space<vmem>>, vector<1x1x128xf32>
    %522 = vector.shape_cast %521 : vector<1x1x128xf32> to vector<1x128xf32>
    %cst_216 = arith.constant 8.000000e-01 : f32
    %523 = vector.broadcast %cst_216 : f32 to vector<8x128xf32>
    %524 = arith.mulf %518, %523 : vector<8x128xf32>
    %cst_217 = arith.constant 9.800000e-01 : f32
    %525 = vector.broadcast %cst_217 : f32 to vector<8x128xf32>
    %526 = arith.mulf %519, %525 : vector<8x128xf32>
    %527 = vector.broadcast %3 : vector<8x1xf32> to vector<8x128xf32>
    %528 = vector.broadcast %522 : vector<1x128xf32> to vector<8x128xf32>
    %529 = arith.mulf %527, %528 : vector<8x128xf32>
    %cst_218 = arith.constant 0.949999988 : f32
    %530 = vector.broadcast %cst_218 : f32 to vector<8x128xf32>
    %531 = arith.mulf %517, %530 : vector<8x128xf32>
    %532 = arith.addf %529, %524 : vector<8x128xf32>
    %533 = arith.addf %532, %526 : vector<8x128xf32>
    %cst_219 = arith.constant 1.000000e-03 : f32
    %534 = vector.broadcast %cst_219 : f32 to vector<8x128xf32>
    %535 = arith.mulf %534, %533 : vector<8x128xf32>
    %536 = arith.addf %531, %535 : vector<8x128xf32>
    %cst_220 = arith.constant -3.500000e-03 : f32
    %537 = vector.broadcast %cst_220 : f32 to vector<8x128xf32>
    %538 = arith.addf %536, %537 : vector<8x128xf32>
    %cst_221 = arith.constant 9.900000e-01 : f32
    %539 = vector.broadcast %cst_221 : f32 to vector<8x128xf32>
    %540 = arith.mulf %520, %539 : vector<8x128xf32>
    %cst_222 = arith.constant -7.000000e-02 : f32
    %541 = vector.broadcast %cst_222 : f32 to vector<8x128xf32>
    %542 = arith.subf %538, %541 : vector<8x128xf32>
    %543 = vector.broadcast %4 : vector<8x1xf32> to vector<8x128xf32>
    %544 = arith.mulf %543, %542 : vector<8x128xf32>
    %545 = arith.addf %540, %544 : vector<8x128xf32>
    %cst_223 = arith.constant -5.000000e-04 : f32
    %546 = vector.broadcast %cst_223 : f32 to vector<8x128xf32>
    %547 = arith.addf %545, %546 : vector<8x128xf32>
    %548 = arith.subf %538, %547 : vector<8x128xf32>
    %cst_224 = arith.constant 0.000000e+00 : f32
    %549 = vector.broadcast %cst_224 : f32 to vector<8x128xf32>
    %550 = arith.cmpf ogt, %548, %549 : vector<8x128xf32>
    %cst_225 = arith.constant 1.000000e+01 : f32
    %551 = vector.broadcast %cst_225 : f32 to vector<8x128xf32>
    %552 = arith.select %550, %551, %524 : vector<8x128xi1>, vector<8x128xf32>
    %cst_226 = arith.constant -6.000000e-01 : f32
    %553 = vector.broadcast %cst_226 : f32 to vector<8x128xf32>
    %554 = arith.addf %526, %553 : vector<8x128xf32>
    %555 = arith.select %550, %554, %526 : vector<8x128xi1>, vector<8x128xf32>
    %cst_227 = arith.constant -6.000000e-02 : f32
    %556 = vector.broadcast %cst_227 : f32 to vector<8x128xf32>
    %557 = arith.maximumf %547, %556 : vector<8x128xf32>
    %558 = arith.select %550, %557, %547 : vector<8x128xi1>, vector<8x128xf32>
    %cst_228 = arith.constant -7.000000e-02 : f32
    %559 = vector.broadcast %cst_228 : f32 to vector<8x128xf32>
    %560 = arith.select %550, %559, %538 : vector<8x128xi1>, vector<8x128xf32>
    %561 = arith.extui %550 : vector<8x128xi1> to vector<8x128xi32>
    %562 = arith.sitofp %561 : vector<8x128xi32> to vector<8x128xf32>
    %c11_229 = arith.constant 11 : index
    %c0_230 = arith.constant 0 : index
    %c0_231 = arith.constant 0 : index
    %563 = vector.load %arg7[%c11_229, %c0_230, %c0_231] : memref<32x8x128xf32, #tpu.memory_space<vmem>>, vector<1x8x128xf32>
    %564 = vector.shape_cast %563 : vector<1x8x128xf32> to vector<8x128xf32>
    %565 = vector.shape_cast %562 : vector<8x128xf32> to vector<1x8x128xf32>
    tpu.vector_store %arg7[%c11_229, %c0_230, %c0_231], %565 {strides = array<i32>} : memref<32x8x128xf32, #tpu.memory_space<vmem>>, vector<1x8x128xf32>,
    %566 = arith.select %13, %560, %517 : vector<8x128xf32>
    %567 = arith.select %13, %552, %518 : vector<8x128xf32>
    %568 = arith.select %13, %555, %519 : vector<8x128xf32>
    %569 = arith.select %13, %558, %520 : vector<8x128xf32>
    %c12 = arith.constant 12 : index
    %c0_232 = arith.constant 0 : index
    %c0_233 = arith.constant 0 : index
    %570 = vector.load %arg3[%c12, %c0_232, %c0_233] : memref<32x1x128xf32, #tpu.memory_space<vmem>>, vector<1x1x128xf32>
    %571 = vector.shape_cast %570 : vector<1x1x128xf32> to vector<1x128xf32>
    %cst_234 = arith.constant 8.000000e-01 : f32
    %572 = vector.broadcast %cst_234 : f32 to vector<8x128xf32>
    %573 = arith.mulf %567, %572 : vector<8x128xf32>
    %cst_235 = arith.constant 9.800000e-01 : f32
    %574 = vector.broadcast %cst_235 : f32 to vector<8x128xf32>
    %575 = arith.mulf %568, %574 : vector<8x128xf32>
    %576 = vector.broadcast %3 : vector<8x1xf32> to vector<8x128xf32>
    %577 = vector.broadcast %571 : vector<1x128xf32> to vector<8x128xf32>
    %578 = arith.mulf %576, %577 : vector<8x128xf32>
    %cst_236 = arith.constant 0.949999988 : f32
    %579 = vector.broadcast %cst_236 : f32 to vector<8x128xf32>
    %580 = arith.mulf %566, %579 : vector<8x128xf32>
    %581 = arith.addf %578, %573 : vector<8x128xf32>
    %582 = arith.addf %581, %575 : vector<8x128xf32>
    %cst_237 = arith.constant 1.000000e-03 : f32
    %583 = vector.broadcast %cst_237 : f32 to vector<8x128xf32>
    %584 = arith.mulf %583, %582 : vector<8x128xf32>
    %585 = arith.addf %580, %584 : vector<8x128xf32>
    %cst_238 = arith.constant -3.500000e-03 : f32
    %586 = vector.broadcast %cst_238 : f32 to vector<8x128xf32>
    %587 = arith.addf %585, %586 : vector<8x128xf32>
    %cst_239 = arith.constant 9.900000e-01 : f32
    %588 = vector.broadcast %cst_239 : f32 to vector<8x128xf32>
    %589 = arith.mulf %569, %588 : vector<8x128xf32>
    %cst_240 = arith.constant -7.000000e-02 : f32
    %590 = vector.broadcast %cst_240 : f32 to vector<8x128xf32>
    %591 = arith.subf %587, %590 : vector<8x128xf32>
    %592 = vector.broadcast %4 : vector<8x1xf32> to vector<8x128xf32>
    %593 = arith.mulf %592, %591 : vector<8x128xf32>
    %594 = arith.addf %589, %593 : vector<8x128xf32>
    %cst_241 = arith.constant -5.000000e-04 : f32
    %595 = vector.broadcast %cst_241 : f32 to vector<8x128xf32>
    %596 = arith.addf %594, %595 : vector<8x128xf32>
    %597 = arith.subf %587, %596 : vector<8x128xf32>
    %cst_242 = arith.constant 0.000000e+00 : f32
    %598 = vector.broadcast %cst_242 : f32 to vector<8x128xf32>
    %599 = arith.cmpf ogt, %597, %598 : vector<8x128xf32>
    %cst_243 = arith.constant 1.000000e+01 : f32
    %600 = vector.broadcast %cst_243 : f32 to vector<8x128xf32>
    %601 = arith.select %599, %600, %573 : vector<8x128xi1>, vector<8x128xf32>
    %cst_244 = arith.constant -6.000000e-01 : f32
    %602 = vector.broadcast %cst_244 : f32 to vector<8x128xf32>
    %603 = arith.addf %575, %602 : vector<8x128xf32>
    %604 = arith.select %599, %603, %575 : vector<8x128xi1>, vector<8x128xf32>
    %cst_245 = arith.constant -6.000000e-02 : f32
    %605 = vector.broadcast %cst_245 : f32 to vector<8x128xf32>
    %606 = arith.maximumf %596, %605 : vector<8x128xf32>
    %607 = arith.select %599, %606, %596 : vector<8x128xi1>, vector<8x128xf32>
    %cst_246 = arith.constant -7.000000e-02 : f32
    %608 = vector.broadcast %cst_246 : f32 to vector<8x128xf32>
    %609 = arith.select %599, %608, %587 : vector<8x128xi1>, vector<8x128xf32>
    %610 = arith.extui %599 : vector<8x128xi1> to vector<8x128xi32>
    %611 = arith.sitofp %610 : vector<8x128xi32> to vector<8x128xf32>
    %c12_247 = arith.constant 12 : index
    %c0_248 = arith.constant 0 : index
    %c0_249 = arith.constant 0 : index
    %612 = vector.load %arg7[%c12_247, %c0_248, %c0_249] : memref<32x8x128xf32, #tpu.memory_space<vmem>>, vector<1x8x128xf32>
    %613 = vector.shape_cast %612 : vector<1x8x128xf32> to vector<8x128xf32>
    %614 = vector.shape_cast %611 : vector<8x128xf32> to vector<1x8x128xf32>
    tpu.vector_store %arg7[%c12_247, %c0_248, %c0_249], %614 {strides = array<i32>} : memref<32x8x128xf32, #tpu.memory_space<vmem>>, vector<1x8x128xf32>,
    %615 = arith.select %13, %609, %566 : vector<8x128xf32>
    %616 = arith.select %13, %601, %567 : vector<8x128xf32>
    %617 = arith.select %13, %604, %568 : vector<8x128xf32>
    %618 = arith.select %13, %607, %569 : vector<8x128xf32>
    %c13 = arith.constant 13 : index
    %c0_250 = arith.constant 0 : index
    %c0_251 = arith.constant 0 : index
    %619 = vector.load %arg3[%c13, %c0_250, %c0_251] : memref<32x1x128xf32, #tpu.memory_space<vmem>>, vector<1x1x128xf32>
    %620 = vector.shape_cast %619 : vector<1x1x128xf32> to vector<1x128xf32>
    %cst_252 = arith.constant 8.000000e-01 : f32
    %621 = vector.broadcast %cst_252 : f32 to vector<8x128xf32>
    %622 = arith.mulf %616, %621 : vector<8x128xf32>
    %cst_253 = arith.constant 9.800000e-01 : f32
    %623 = vector.broadcast %cst_253 : f32 to vector<8x128xf32>
    %624 = arith.mulf %617, %623 : vector<8x128xf32>
    %625 = vector.broadcast %3 : vector<8x1xf32> to vector<8x128xf32>
    %626 = vector.broadcast %620 : vector<1x128xf32> to vector<8x128xf32>
    %627 = arith.mulf %625, %626 : vector<8x128xf32>
    %cst_254 = arith.constant 0.949999988 : f32
    %628 = vector.broadcast %cst_254 : f32 to vector<8x128xf32>
    %629 = arith.mulf %615, %628 : vector<8x128xf32>
    %630 = arith.addf %627, %622 : vector<8x128xf32>
    %631 = arith.addf %630, %624 : vector<8x128xf32>
    %cst_255 = arith.constant 1.000000e-03 : f32
    %632 = vector.broadcast %cst_255 : f32 to vector<8x128xf32>
    %633 = arith.mulf %632, %631 : vector<8x128xf32>
    %634 = arith.addf %629, %633 : vector<8x128xf32>
    %cst_256 = arith.constant -3.500000e-03 : f32
    %635 = vector.broadcast %cst_256 : f32 to vector<8x128xf32>
    %636 = arith.addf %634, %635 : vector<8x128xf32>
    %cst_257 = arith.constant 9.900000e-01 : f32
    %637 = vector.broadcast %cst_257 : f32 to vector<8x128xf32>
    %638 = arith.mulf %618, %637 : vector<8x128xf32>
    %cst_258 = arith.constant -7.000000e-02 : f32
    %639 = vector.broadcast %cst_258 : f32 to vector<8x128xf32>
    %640 = arith.subf %636, %639 : vector<8x128xf32>
    %641 = vector.broadcast %4 : vector<8x1xf32> to vector<8x128xf32>
    %642 = arith.mulf %641, %640 : vector<8x128xf32>
    %643 = arith.addf %638, %642 : vector<8x128xf32>
    %cst_259 = arith.constant -5.000000e-04 : f32
    %644 = vector.broadcast %cst_259 : f32 to vector<8x128xf32>
    %645 = arith.addf %643, %644 : vector<8x128xf32>
    %646 = arith.subf %636, %645 : vector<8x128xf32>
    %cst_260 = arith.constant 0.000000e+00 : f32
    %647 = vector.broadcast %cst_260 : f32 to vector<8x128xf32>
    %648 = arith.cmpf ogt, %646, %647 : vector<8x128xf32>
    %cst_261 = arith.constant 1.000000e+01 : f32
    %649 = vector.broadcast %cst_261 : f32 to vector<8x128xf32>
    %650 = arith.select %648, %649, %622 : vector<8x128xi1>, vector<8x128xf32>
    %cst_262 = arith.constant -6.000000e-01 : f32
    %651 = vector.broadcast %cst_262 : f32 to vector<8x128xf32>
    %652 = arith.addf %624, %651 : vector<8x128xf32>
    %653 = arith.select %648, %652, %624 : vector<8x128xi1>, vector<8x128xf32>
    %cst_263 = arith.constant -6.000000e-02 : f32
    %654 = vector.broadcast %cst_263 : f32 to vector<8x128xf32>
    %655 = arith.maximumf %645, %654 : vector<8x128xf32>
    %656 = arith.select %648, %655, %645 : vector<8x128xi1>, vector<8x128xf32>
    %cst_264 = arith.constant -7.000000e-02 : f32
    %657 = vector.broadcast %cst_264 : f32 to vector<8x128xf32>
    %658 = arith.select %648, %657, %636 : vector<8x128xi1>, vector<8x128xf32>
    %659 = arith.extui %648 : vector<8x128xi1> to vector<8x128xi32>
    %660 = arith.sitofp %659 : vector<8x128xi32> to vector<8x128xf32>
    %c13_265 = arith.constant 13 : index
    %c0_266 = arith.constant 0 : index
    %c0_267 = arith.constant 0 : index
    %661 = vector.load %arg7[%c13_265, %c0_266, %c0_267] : memref<32x8x128xf32, #tpu.memory_space<vmem>>, vector<1x8x128xf32>
    %662 = vector.shape_cast %661 : vector<1x8x128xf32> to vector<8x128xf32>
    %663 = vector.shape_cast %660 : vector<8x128xf32> to vector<1x8x128xf32>
    tpu.vector_store %arg7[%c13_265, %c0_266, %c0_267], %663 {strides = array<i32>} : memref<32x8x128xf32, #tpu.memory_space<vmem>>, vector<1x8x128xf32>,
    %664 = arith.select %13, %658, %615 : vector<8x128xf32>
    %665 = arith.select %13, %650, %616 : vector<8x128xf32>
    %666 = arith.select %13, %653, %617 : vector<8x128xf32>
    %667 = arith.select %13, %656, %618 : vector<8x128xf32>
    %c14 = arith.constant 14 : index
    %c0_268 = arith.constant 0 : index
    %c0_269 = arith.constant 0 : index
    %668 = vector.load %arg3[%c14, %c0_268, %c0_269] : memref<32x1x128xf32, #tpu.memory_space<vmem>>, vector<1x1x128xf32>
    %669 = vector.shape_cast %668 : vector<1x1x128xf32> to vector<1x128xf32>
    %cst_270 = arith.constant 8.000000e-01 : f32
    %670 = vector.broadcast %cst_270 : f32 to vector<8x128xf32>
    %671 = arith.mulf %665, %670 : vector<8x128xf32>
    %cst_271 = arith.constant 9.800000e-01 : f32
    %672 = vector.broadcast %cst_271 : f32 to vector<8x128xf32>
    %673 = arith.mulf %666, %672 : vector<8x128xf32>
    %674 = vector.broadcast %3 : vector<8x1xf32> to vector<8x128xf32>
    %675 = vector.broadcast %669 : vector<1x128xf32> to vector<8x128xf32>
    %676 = arith.mulf %674, %675 : vector<8x128xf32>
    %cst_272 = arith.constant 0.949999988 : f32
    %677 = vector.broadcast %cst_272 : f32 to vector<8x128xf32>
    %678 = arith.mulf %664, %677 : vector<8x128xf32>
    %679 = arith.addf %676, %671 : vector<8x128xf32>
    %680 = arith.addf %679, %673 : vector<8x128xf32>
    %cst_273 = arith.constant 1.000000e-03 : f32
    %681 = vector.broadcast %cst_273 : f32 to vector<8x128xf32>
    %682 = arith.mulf %681, %680 : vector<8x128xf32>
    %683 = arith.addf %678, %682 : vector<8x128xf32>
    %cst_274 = arith.constant -3.500000e-03 : f32
    %684 = vector.broadcast %cst_274 : f32 to vector<8x128xf32>
    %685 = arith.addf %683, %684 : vector<8x128xf32>
    %cst_275 = arith.constant 9.900000e-01 : f32
    %686 = vector.broadcast %cst_275 : f32 to vector<8x128xf32>
    %687 = arith.mulf %667, %686 : vector<8x128xf32>
    %cst_276 = arith.constant -7.000000e-02 : f32
    %688 = vector.broadcast %cst_276 : f32 to vector<8x128xf32>
    %689 = arith.subf %685, %688 : vector<8x128xf32>
    %690 = vector.broadcast %4 : vector<8x1xf32> to vector<8x128xf32>
    %691 = arith.mulf %690, %689 : vector<8x128xf32>
    %692 = arith.addf %687, %691 : vector<8x128xf32>
    %cst_277 = arith.constant -5.000000e-04 : f32
    %693 = vector.broadcast %cst_277 : f32 to vector<8x128xf32>
    %694 = arith.addf %692, %693 : vector<8x128xf32>
    %695 = arith.subf %685, %694 : vector<8x128xf32>
    %cst_278 = arith.constant 0.000000e+00 : f32
    %696 = vector.broadcast %cst_278 : f32 to vector<8x128xf32>
    %697 = arith.cmpf ogt, %695, %696 : vector<8x128xf32>
    %cst_279 = arith.constant 1.000000e+01 : f32
    %698 = vector.broadcast %cst_279 : f32 to vector<8x128xf32>
    %699 = arith.select %697, %698, %671 : vector<8x128xi1>, vector<8x128xf32>
    %cst_280 = arith.constant -6.000000e-01 : f32
    %700 = vector.broadcast %cst_280 : f32 to vector<8x128xf32>
    %701 = arith.addf %673, %700 : vector<8x128xf32>
    %702 = arith.select %697, %701, %673 : vector<8x128xi1>, vector<8x128xf32>
    %cst_281 = arith.constant -6.000000e-02 : f32
    %703 = vector.broadcast %cst_281 : f32 to vector<8x128xf32>
    %704 = arith.maximumf %694, %703 : vector<8x128xf32>
    %705 = arith.select %697, %704, %694 : vector<8x128xi1>, vector<8x128xf32>
    %cst_282 = arith.constant -7.000000e-02 : f32
    %706 = vector.broadcast %cst_282 : f32 to vector<8x128xf32>
    %707 = arith.select %697, %706, %685 : vector<8x128xi1>, vector<8x128xf32>
    %708 = arith.extui %697 : vector<8x128xi1> to vector<8x128xi32>
    %709 = arith.sitofp %708 : vector<8x128xi32> to vector<8x128xf32>
    %c14_283 = arith.constant 14 : index
    %c0_284 = arith.constant 0 : index
    %c0_285 = arith.constant 0 : index
    %710 = vector.load %arg7[%c14_283, %c0_284, %c0_285] : memref<32x8x128xf32, #tpu.memory_space<vmem>>, vector<1x8x128xf32>
    %711 = vector.shape_cast %710 : vector<1x8x128xf32> to vector<8x128xf32>
    %712 = vector.shape_cast %709 : vector<8x128xf32> to vector<1x8x128xf32>
    tpu.vector_store %arg7[%c14_283, %c0_284, %c0_285], %712 {strides = array<i32>} : memref<32x8x128xf32, #tpu.memory_space<vmem>>, vector<1x8x128xf32>,
    %713 = arith.select %13, %707, %664 : vector<8x128xf32>
    %714 = arith.select %13, %699, %665 : vector<8x128xf32>
    %715 = arith.select %13, %702, %666 : vector<8x128xf32>
    %716 = arith.select %13, %705, %667 : vector<8x128xf32>
    %c15 = arith.constant 15 : index
    %c0_286 = arith.constant 0 : index
    %c0_287 = arith.constant 0 : index
    %717 = vector.load %arg3[%c15, %c0_286, %c0_287] : memref<32x1x128xf32, #tpu.memory_space<vmem>>, vector<1x1x128xf32>
    %718 = vector.shape_cast %717 : vector<1x1x128xf32> to vector<1x128xf32>
    %cst_288 = arith.constant 8.000000e-01 : f32
    %719 = vector.broadcast %cst_288 : f32 to vector<8x128xf32>
    %720 = arith.mulf %714, %719 : vector<8x128xf32>
    %cst_289 = arith.constant 9.800000e-01 : f32
    %721 = vector.broadcast %cst_289 : f32 to vector<8x128xf32>
    %722 = arith.mulf %715, %721 : vector<8x128xf32>
    %723 = vector.broadcast %3 : vector<8x1xf32> to vector<8x128xf32>
    %724 = vector.broadcast %718 : vector<1x128xf32> to vector<8x128xf32>
    %725 = arith.mulf %723, %724 : vector<8x128xf32>
    %cst_290 = arith.constant 0.949999988 : f32
    %726 = vector.broadcast %cst_290 : f32 to vector<8x128xf32>
    %727 = arith.mulf %713, %726 : vector<8x128xf32>
    %728 = arith.addf %725, %720 : vector<8x128xf32>
    %729 = arith.addf %728, %722 : vector<8x128xf32>
    %cst_291 = arith.constant 1.000000e-03 : f32
    %730 = vector.broadcast %cst_291 : f32 to vector<8x128xf32>
    %731 = arith.mulf %730, %729 : vector<8x128xf32>
    %732 = arith.addf %727, %731 : vector<8x128xf32>
    %cst_292 = arith.constant -3.500000e-03 : f32
    %733 = vector.broadcast %cst_292 : f32 to vector<8x128xf32>
    %734 = arith.addf %732, %733 : vector<8x128xf32>
    %cst_293 = arith.constant 9.900000e-01 : f32
    %735 = vector.broadcast %cst_293 : f32 to vector<8x128xf32>
    %736 = arith.mulf %716, %735 : vector<8x128xf32>
    %cst_294 = arith.constant -7.000000e-02 : f32
    %737 = vector.broadcast %cst_294 : f32 to vector<8x128xf32>
    %738 = arith.subf %734, %737 : vector<8x128xf32>
    %739 = vector.broadcast %4 : vector<8x1xf32> to vector<8x128xf32>
    %740 = arith.mulf %739, %738 : vector<8x128xf32>
    %741 = arith.addf %736, %740 : vector<8x128xf32>
    %cst_295 = arith.constant -5.000000e-04 : f32
    %742 = vector.broadcast %cst_295 : f32 to vector<8x128xf32>
    %743 = arith.addf %741, %742 : vector<8x128xf32>
    %744 = arith.subf %734, %743 : vector<8x128xf32>
    %cst_296 = arith.constant 0.000000e+00 : f32
    %745 = vector.broadcast %cst_296 : f32 to vector<8x128xf32>
    %746 = arith.cmpf ogt, %744, %745 : vector<8x128xf32>
    %cst_297 = arith.constant 1.000000e+01 : f32
    %747 = vector.broadcast %cst_297 : f32 to vector<8x128xf32>
    %748 = arith.select %746, %747, %720 : vector<8x128xi1>, vector<8x128xf32>
    %cst_298 = arith.constant -6.000000e-01 : f32
    %749 = vector.broadcast %cst_298 : f32 to vector<8x128xf32>
    %750 = arith.addf %722, %749 : vector<8x128xf32>
    %751 = arith.select %746, %750, %722 : vector<8x128xi1>, vector<8x128xf32>
    %cst_299 = arith.constant -6.000000e-02 : f32
    %752 = vector.broadcast %cst_299 : f32 to vector<8x128xf32>
    %753 = arith.maximumf %743, %752 : vector<8x128xf32>
    %754 = arith.select %746, %753, %743 : vector<8x128xi1>, vector<8x128xf32>
    %cst_300 = arith.constant -7.000000e-02 : f32
    %755 = vector.broadcast %cst_300 : f32 to vector<8x128xf32>
    %756 = arith.select %746, %755, %734 : vector<8x128xi1>, vector<8x128xf32>
    %757 = arith.extui %746 : vector<8x128xi1> to vector<8x128xi32>
    %758 = arith.sitofp %757 : vector<8x128xi32> to vector<8x128xf32>
    %c15_301 = arith.constant 15 : index
    %c0_302 = arith.constant 0 : index
    %c0_303 = arith.constant 0 : index
    %759 = vector.load %arg7[%c15_301, %c0_302, %c0_303] : memref<32x8x128xf32, #tpu.memory_space<vmem>>, vector<1x8x128xf32>
    %760 = vector.shape_cast %759 : vector<1x8x128xf32> to vector<8x128xf32>
    %761 = vector.shape_cast %758 : vector<8x128xf32> to vector<1x8x128xf32>
    tpu.vector_store %arg7[%c15_301, %c0_302, %c0_303], %761 {strides = array<i32>} : memref<32x8x128xf32, #tpu.memory_space<vmem>>, vector<1x8x128xf32>,
    %762 = arith.select %13, %756, %713 : vector<8x128xf32>
    %763 = arith.select %13, %748, %714 : vector<8x128xf32>
    %764 = arith.select %13, %751, %715 : vector<8x128xf32>
    %765 = arith.select %13, %754, %716 : vector<8x128xf32>
    %c16 = arith.constant 16 : index
    %c0_304 = arith.constant 0 : index
    %c0_305 = arith.constant 0 : index
    %766 = vector.load %arg3[%c16, %c0_304, %c0_305] : memref<32x1x128xf32, #tpu.memory_space<vmem>>, vector<1x1x128xf32>
    %767 = vector.shape_cast %766 : vector<1x1x128xf32> to vector<1x128xf32>
    %cst_306 = arith.constant 8.000000e-01 : f32
    %768 = vector.broadcast %cst_306 : f32 to vector<8x128xf32>
    %769 = arith.mulf %763, %768 : vector<8x128xf32>
    %cst_307 = arith.constant 9.800000e-01 : f32
    %770 = vector.broadcast %cst_307 : f32 to vector<8x128xf32>
    %771 = arith.mulf %764, %770 : vector<8x128xf32>
    %772 = vector.broadcast %3 : vector<8x1xf32> to vector<8x128xf32>
    %773 = vector.broadcast %767 : vector<1x128xf32> to vector<8x128xf32>
    %774 = arith.mulf %772, %773 : vector<8x128xf32>
    %cst_308 = arith.constant 0.949999988 : f32
    %775 = vector.broadcast %cst_308 : f32 to vector<8x128xf32>
    %776 = arith.mulf %762, %775 : vector<8x128xf32>
    %777 = arith.addf %774, %769 : vector<8x128xf32>
    %778 = arith.addf %777, %771 : vector<8x128xf32>
    %cst_309 = arith.constant 1.000000e-03 : f32
    %779 = vector.broadcast %cst_309 : f32 to vector<8x128xf32>
    %780 = arith.mulf %779, %778 : vector<8x128xf32>
    %781 = arith.addf %776, %780 : vector<8x128xf32>
    %cst_310 = arith.constant -3.500000e-03 : f32
    %782 = vector.broadcast %cst_310 : f32 to vector<8x128xf32>
    %783 = arith.addf %781, %782 : vector<8x128xf32>
    %cst_311 = arith.constant 9.900000e-01 : f32
    %784 = vector.broadcast %cst_311 : f32 to vector<8x128xf32>
    %785 = arith.mulf %765, %784 : vector<8x128xf32>
    %cst_312 = arith.constant -7.000000e-02 : f32
    %786 = vector.broadcast %cst_312 : f32 to vector<8x128xf32>
    %787 = arith.subf %783, %786 : vector<8x128xf32>
    %788 = vector.broadcast %4 : vector<8x1xf32> to vector<8x128xf32>
    %789 = arith.mulf %788, %787 : vector<8x128xf32>
    %790 = arith.addf %785, %789 : vector<8x128xf32>
    %cst_313 = arith.constant -5.000000e-04 : f32
    %791 = vector.broadcast %cst_313 : f32 to vector<8x128xf32>
    %792 = arith.addf %790, %791 : vector<8x128xf32>
    %793 = arith.subf %783, %792 : vector<8x128xf32>
    %cst_314 = arith.constant 0.000000e+00 : f32
    %794 = vector.broadcast %cst_314 : f32 to vector<8x128xf32>
    %795 = arith.cmpf ogt, %793, %794 : vector<8x128xf32>
    %cst_315 = arith.constant 1.000000e+01 : f32
    %796 = vector.broadcast %cst_315 : f32 to vector<8x128xf32>
    %797 = arith.select %795, %796, %769 : vector<8x128xi1>, vector<8x128xf32>
    %cst_316 = arith.constant -6.000000e-01 : f32
    %798 = vector.broadcast %cst_316 : f32 to vector<8x128xf32>
    %799 = arith.addf %771, %798 : vector<8x128xf32>
    %800 = arith.select %795, %799, %771 : vector<8x128xi1>, vector<8x128xf32>
    %cst_317 = arith.constant -6.000000e-02 : f32
    %801 = vector.broadcast %cst_317 : f32 to vector<8x128xf32>
    %802 = arith.maximumf %792, %801 : vector<8x128xf32>
    %803 = arith.select %795, %802, %792 : vector<8x128xi1>, vector<8x128xf32>
    %cst_318 = arith.constant -7.000000e-02 : f32
    %804 = vector.broadcast %cst_318 : f32 to vector<8x128xf32>
    %805 = arith.select %795, %804, %783 : vector<8x128xi1>, vector<8x128xf32>
    %806 = arith.extui %795 : vector<8x128xi1> to vector<8x128xi32>
    %807 = arith.sitofp %806 : vector<8x128xi32> to vector<8x128xf32>
    %c16_319 = arith.constant 16 : index
    %c0_320 = arith.constant 0 : index
    %c0_321 = arith.constant 0 : index
    %808 = vector.load %arg7[%c16_319, %c0_320, %c0_321] : memref<32x8x128xf32, #tpu.memory_space<vmem>>, vector<1x8x128xf32>
    %809 = vector.shape_cast %808 : vector<1x8x128xf32> to vector<8x128xf32>
    %810 = vector.shape_cast %807 : vector<8x128xf32> to vector<1x8x128xf32>
    tpu.vector_store %arg7[%c16_319, %c0_320, %c0_321], %810 {strides = array<i32>} : memref<32x8x128xf32, #tpu.memory_space<vmem>>, vector<1x8x128xf32>,
    %811 = arith.select %13, %805, %762 : vector<8x128xf32>
    %812 = arith.select %13, %797, %763 : vector<8x128xf32>
    %813 = arith.select %13, %800, %764 : vector<8x128xf32>
    %814 = arith.select %13, %803, %765 : vector<8x128xf32>
    %c17 = arith.constant 17 : index
    %c0_322 = arith.constant 0 : index
    %c0_323 = arith.constant 0 : index
    %815 = vector.load %arg3[%c17, %c0_322, %c0_323] : memref<32x1x128xf32, #tpu.memory_space<vmem>>, vector<1x1x128xf32>
    %816 = vector.shape_cast %815 : vector<1x1x128xf32> to vector<1x128xf32>
    %cst_324 = arith.constant 8.000000e-01 : f32
    %817 = vector.broadcast %cst_324 : f32 to vector<8x128xf32>
    %818 = arith.mulf %812, %817 : vector<8x128xf32>
    %cst_325 = arith.constant 9.800000e-01 : f32
    %819 = vector.broadcast %cst_325 : f32 to vector<8x128xf32>
    %820 = arith.mulf %813, %819 : vector<8x128xf32>
    %821 = vector.broadcast %3 : vector<8x1xf32> to vector<8x128xf32>
    %822 = vector.broadcast %816 : vector<1x128xf32> to vector<8x128xf32>
    %823 = arith.mulf %821, %822 : vector<8x128xf32>
    %cst_326 = arith.constant 0.949999988 : f32
    %824 = vector.broadcast %cst_326 : f32 to vector<8x128xf32>
    %825 = arith.mulf %811, %824 : vector<8x128xf32>
    %826 = arith.addf %823, %818 : vector<8x128xf32>
    %827 = arith.addf %826, %820 : vector<8x128xf32>
    %cst_327 = arith.constant 1.000000e-03 : f32
    %828 = vector.broadcast %cst_327 : f32 to vector<8x128xf32>
    %829 = arith.mulf %828, %827 : vector<8x128xf32>
    %830 = arith.addf %825, %829 : vector<8x128xf32>
    %cst_328 = arith.constant -3.500000e-03 : f32
    %831 = vector.broadcast %cst_328 : f32 to vector<8x128xf32>
    %832 = arith.addf %830, %831 : vector<8x128xf32>
    %cst_329 = arith.constant 9.900000e-01 : f32
    %833 = vector.broadcast %cst_329 : f32 to vector<8x128xf32>
    %834 = arith.mulf %814, %833 : vector<8x128xf32>
    %cst_330 = arith.constant -7.000000e-02 : f32
    %835 = vector.broadcast %cst_330 : f32 to vector<8x128xf32>
    %836 = arith.subf %832, %835 : vector<8x128xf32>
    %837 = vector.broadcast %4 : vector<8x1xf32> to vector<8x128xf32>
    %838 = arith.mulf %837, %836 : vector<8x128xf32>
    %839 = arith.addf %834, %838 : vector<8x128xf32>
    %cst_331 = arith.constant -5.000000e-04 : f32
    %840 = vector.broadcast %cst_331 : f32 to vector<8x128xf32>
    %841 = arith.addf %839, %840 : vector<8x128xf32>
    %842 = arith.subf %832, %841 : vector<8x128xf32>
    %cst_332 = arith.constant 0.000000e+00 : f32
    %843 = vector.broadcast %cst_332 : f32 to vector<8x128xf32>
    %844 = arith.cmpf ogt, %842, %843 : vector<8x128xf32>
    %cst_333 = arith.constant 1.000000e+01 : f32
    %845 = vector.broadcast %cst_333 : f32 to vector<8x128xf32>
    %846 = arith.select %844, %845, %818 : vector<8x128xi1>, vector<8x128xf32>
    %cst_334 = arith.constant -6.000000e-01 : f32
    %847 = vector.broadcast %cst_334 : f32 to vector<8x128xf32>
    %848 = arith.addf %820, %847 : vector<8x128xf32>
    %849 = arith.select %844, %848, %820 : vector<8x128xi1>, vector<8x128xf32>
    %cst_335 = arith.constant -6.000000e-02 : f32
    %850 = vector.broadcast %cst_335 : f32 to vector<8x128xf32>
    %851 = arith.maximumf %841, %850 : vector<8x128xf32>
    %852 = arith.select %844, %851, %841 : vector<8x128xi1>, vector<8x128xf32>
    %cst_336 = arith.constant -7.000000e-02 : f32
    %853 = vector.broadcast %cst_336 : f32 to vector<8x128xf32>
    %854 = arith.select %844, %853, %832 : vector<8x128xi1>, vector<8x128xf32>
    %855 = arith.extui %844 : vector<8x128xi1> to vector<8x128xi32>
    %856 = arith.sitofp %855 : vector<8x128xi32> to vector<8x128xf32>
    %c17_337 = arith.constant 17 : index
    %c0_338 = arith.constant 0 : index
    %c0_339 = arith.constant 0 : index
    %857 = vector.load %arg7[%c17_337, %c0_338, %c0_339] : memref<32x8x128xf32, #tpu.memory_space<vmem>>, vector<1x8x128xf32>
    %858 = vector.shape_cast %857 : vector<1x8x128xf32> to vector<8x128xf32>
    %859 = vector.shape_cast %856 : vector<8x128xf32> to vector<1x8x128xf32>
    tpu.vector_store %arg7[%c17_337, %c0_338, %c0_339], %859 {strides = array<i32>} : memref<32x8x128xf32, #tpu.memory_space<vmem>>, vector<1x8x128xf32>,
    %860 = arith.select %13, %854, %811 : vector<8x128xf32>
    %861 = arith.select %13, %846, %812 : vector<8x128xf32>
    %862 = arith.select %13, %849, %813 : vector<8x128xf32>
    %863 = arith.select %13, %852, %814 : vector<8x128xf32>
    %c18 = arith.constant 18 : index
    %c0_340 = arith.constant 0 : index
    %c0_341 = arith.constant 0 : index
    %864 = vector.load %arg3[%c18, %c0_340, %c0_341] : memref<32x1x128xf32, #tpu.memory_space<vmem>>, vector<1x1x128xf32>
    %865 = vector.shape_cast %864 : vector<1x1x128xf32> to vector<1x128xf32>
    %cst_342 = arith.constant 8.000000e-01 : f32
    %866 = vector.broadcast %cst_342 : f32 to vector<8x128xf32>
    %867 = arith.mulf %861, %866 : vector<8x128xf32>
    %cst_343 = arith.constant 9.800000e-01 : f32
    %868 = vector.broadcast %cst_343 : f32 to vector<8x128xf32>
    %869 = arith.mulf %862, %868 : vector<8x128xf32>
    %870 = vector.broadcast %3 : vector<8x1xf32> to vector<8x128xf32>
    %871 = vector.broadcast %865 : vector<1x128xf32> to vector<8x128xf32>
    %872 = arith.mulf %870, %871 : vector<8x128xf32>
    %cst_344 = arith.constant 0.949999988 : f32
    %873 = vector.broadcast %cst_344 : f32 to vector<8x128xf32>
    %874 = arith.mulf %860, %873 : vector<8x128xf32>
    %875 = arith.addf %872, %867 : vector<8x128xf32>
    %876 = arith.addf %875, %869 : vector<8x128xf32>
    %cst_345 = arith.constant 1.000000e-03 : f32
    %877 = vector.broadcast %cst_345 : f32 to vector<8x128xf32>
    %878 = arith.mulf %877, %876 : vector<8x128xf32>
    %879 = arith.addf %874, %878 : vector<8x128xf32>
    %cst_346 = arith.constant -3.500000e-03 : f32
    %880 = vector.broadcast %cst_346 : f32 to vector<8x128xf32>
    %881 = arith.addf %879, %880 : vector<8x128xf32>
    %cst_347 = arith.constant 9.900000e-01 : f32
    %882 = vector.broadcast %cst_347 : f32 to vector<8x128xf32>
    %883 = arith.mulf %863, %882 : vector<8x128xf32>
    %cst_348 = arith.constant -7.000000e-02 : f32
    %884 = vector.broadcast %cst_348 : f32 to vector<8x128xf32>
    %885 = arith.subf %881, %884 : vector<8x128xf32>
    %886 = vector.broadcast %4 : vector<8x1xf32> to vector<8x128xf32>
    %887 = arith.mulf %886, %885 : vector<8x128xf32>
    %888 = arith.addf %883, %887 : vector<8x128xf32>
    %cst_349 = arith.constant -5.000000e-04 : f32
    %889 = vector.broadcast %cst_349 : f32 to vector<8x128xf32>
    %890 = arith.addf %888, %889 : vector<8x128xf32>
    %891 = arith.subf %881, %890 : vector<8x128xf32>
    %cst_350 = arith.constant 0.000000e+00 : f32
    %892 = vector.broadcast %cst_350 : f32 to vector<8x128xf32>
    %893 = arith.cmpf ogt, %891, %892 : vector<8x128xf32>
    %cst_351 = arith.constant 1.000000e+01 : f32
    %894 = vector.broadcast %cst_351 : f32 to vector<8x128xf32>
    %895 = arith.select %893, %894, %867 : vector<8x128xi1>, vector<8x128xf32>
    %cst_352 = arith.constant -6.000000e-01 : f32
    %896 = vector.broadcast %cst_352 : f32 to vector<8x128xf32>
    %897 = arith.addf %869, %896 : vector<8x128xf32>
    %898 = arith.select %893, %897, %869 : vector<8x128xi1>, vector<8x128xf32>
    %cst_353 = arith.constant -6.000000e-02 : f32
    %899 = vector.broadcast %cst_353 : f32 to vector<8x128xf32>
    %900 = arith.maximumf %890, %899 : vector<8x128xf32>
    %901 = arith.select %893, %900, %890 : vector<8x128xi1>, vector<8x128xf32>
    %cst_354 = arith.constant -7.000000e-02 : f32
    %902 = vector.broadcast %cst_354 : f32 to vector<8x128xf32>
    %903 = arith.select %893, %902, %881 : vector<8x128xi1>, vector<8x128xf32>
    %904 = arith.extui %893 : vector<8x128xi1> to vector<8x128xi32>
    %905 = arith.sitofp %904 : vector<8x128xi32> to vector<8x128xf32>
    %c18_355 = arith.constant 18 : index
    %c0_356 = arith.constant 0 : index
    %c0_357 = arith.constant 0 : index
    %906 = vector.load %arg7[%c18_355, %c0_356, %c0_357] : memref<32x8x128xf32, #tpu.memory_space<vmem>>, vector<1x8x128xf32>
    %907 = vector.shape_cast %906 : vector<1x8x128xf32> to vector<8x128xf32>
    %908 = vector.shape_cast %905 : vector<8x128xf32> to vector<1x8x128xf32>
    tpu.vector_store %arg7[%c18_355, %c0_356, %c0_357], %908 {strides = array<i32>} : memref<32x8x128xf32, #tpu.memory_space<vmem>>, vector<1x8x128xf32>,
    %909 = arith.select %13, %903, %860 : vector<8x128xf32>
    %910 = arith.select %13, %895, %861 : vector<8x128xf32>
    %911 = arith.select %13, %898, %862 : vector<8x128xf32>
    %912 = arith.select %13, %901, %863 : vector<8x128xf32>
    %c19 = arith.constant 19 : index
    %c0_358 = arith.constant 0 : index
    %c0_359 = arith.constant 0 : index
    %913 = vector.load %arg3[%c19, %c0_358, %c0_359] : memref<32x1x128xf32, #tpu.memory_space<vmem>>, vector<1x1x128xf32>
    %914 = vector.shape_cast %913 : vector<1x1x128xf32> to vector<1x128xf32>
    %cst_360 = arith.constant 8.000000e-01 : f32
    %915 = vector.broadcast %cst_360 : f32 to vector<8x128xf32>
    %916 = arith.mulf %910, %915 : vector<8x128xf32>
    %cst_361 = arith.constant 9.800000e-01 : f32
    %917 = vector.broadcast %cst_361 : f32 to vector<8x128xf32>
    %918 = arith.mulf %911, %917 : vector<8x128xf32>
    %919 = vector.broadcast %3 : vector<8x1xf32> to vector<8x128xf32>
    %920 = vector.broadcast %914 : vector<1x128xf32> to vector<8x128xf32>
    %921 = arith.mulf %919, %920 : vector<8x128xf32>
    %cst_362 = arith.constant 0.949999988 : f32
    %922 = vector.broadcast %cst_362 : f32 to vector<8x128xf32>
    %923 = arith.mulf %909, %922 : vector<8x128xf32>
    %924 = arith.addf %921, %916 : vector<8x128xf32>
    %925 = arith.addf %924, %918 : vector<8x128xf32>
    %cst_363 = arith.constant 1.000000e-03 : f32
    %926 = vector.broadcast %cst_363 : f32 to vector<8x128xf32>
    %927 = arith.mulf %926, %925 : vector<8x128xf32>
    %928 = arith.addf %923, %927 : vector<8x128xf32>
    %cst_364 = arith.constant -3.500000e-03 : f32
    %929 = vector.broadcast %cst_364 : f32 to vector<8x128xf32>
    %930 = arith.addf %928, %929 : vector<8x128xf32>
    %cst_365 = arith.constant 9.900000e-01 : f32
    %931 = vector.broadcast %cst_365 : f32 to vector<8x128xf32>
    %932 = arith.mulf %912, %931 : vector<8x128xf32>
    %cst_366 = arith.constant -7.000000e-02 : f32
    %933 = vector.broadcast %cst_366 : f32 to vector<8x128xf32>
    %934 = arith.subf %930, %933 : vector<8x128xf32>
    %935 = vector.broadcast %4 : vector<8x1xf32> to vector<8x128xf32>
    %936 = arith.mulf %935, %934 : vector<8x128xf32>
    %937 = arith.addf %932, %936 : vector<8x128xf32>
    %cst_367 = arith.constant -5.000000e-04 : f32
    %938 = vector.broadcast %cst_367 : f32 to vector<8x128xf32>
    %939 = arith.addf %937, %938 : vector<8x128xf32>
    %940 = arith.subf %930, %939 : vector<8x128xf32>
    %cst_368 = arith.constant 0.000000e+00 : f32
    %941 = vector.broadcast %cst_368 : f32 to vector<8x128xf32>
    %942 = arith.cmpf ogt, %940, %941 : vector<8x128xf32>
    %cst_369 = arith.constant 1.000000e+01 : f32
    %943 = vector.broadcast %cst_369 : f32 to vector<8x128xf32>
    %944 = arith.select %942, %943, %916 : vector<8x128xi1>, vector<8x128xf32>
    %cst_370 = arith.constant -6.000000e-01 : f32
    %945 = vector.broadcast %cst_370 : f32 to vector<8x128xf32>
    %946 = arith.addf %918, %945 : vector<8x128xf32>
    %947 = arith.select %942, %946, %918 : vector<8x128xi1>, vector<8x128xf32>
    %cst_371 = arith.constant -6.000000e-02 : f32
    %948 = vector.broadcast %cst_371 : f32 to vector<8x128xf32>
    %949 = arith.maximumf %939, %948 : vector<8x128xf32>
    %950 = arith.select %942, %949, %939 : vector<8x128xi1>, vector<8x128xf32>
    %cst_372 = arith.constant -7.000000e-02 : f32
    %951 = vector.broadcast %cst_372 : f32 to vector<8x128xf32>
    %952 = arith.select %942, %951, %930 : vector<8x128xi1>, vector<8x128xf32>
    %953 = arith.extui %942 : vector<8x128xi1> to vector<8x128xi32>
    %954 = arith.sitofp %953 : vector<8x128xi32> to vector<8x128xf32>
    %c19_373 = arith.constant 19 : index
    %c0_374 = arith.constant 0 : index
    %c0_375 = arith.constant 0 : index
    %955 = vector.load %arg7[%c19_373, %c0_374, %c0_375] : memref<32x8x128xf32, #tpu.memory_space<vmem>>, vector<1x8x128xf32>
    %956 = vector.shape_cast %955 : vector<1x8x128xf32> to vector<8x128xf32>
    %957 = vector.shape_cast %954 : vector<8x128xf32> to vector<1x8x128xf32>
    tpu.vector_store %arg7[%c19_373, %c0_374, %c0_375], %957 {strides = array<i32>} : memref<32x8x128xf32, #tpu.memory_space<vmem>>, vector<1x8x128xf32>,
    %958 = arith.select %13, %952, %909 : vector<8x128xf32>
    %959 = arith.select %13, %944, %910 : vector<8x128xf32>
    %960 = arith.select %13, %947, %911 : vector<8x128xf32>
    %961 = arith.select %13, %950, %912 : vector<8x128xf32>
    %c20 = arith.constant 20 : index
    %c0_376 = arith.constant 0 : index
    %c0_377 = arith.constant 0 : index
    %962 = vector.load %arg3[%c20, %c0_376, %c0_377] : memref<32x1x128xf32, #tpu.memory_space<vmem>>, vector<1x1x128xf32>
    %963 = vector.shape_cast %962 : vector<1x1x128xf32> to vector<1x128xf32>
    %cst_378 = arith.constant 8.000000e-01 : f32
    %964 = vector.broadcast %cst_378 : f32 to vector<8x128xf32>
    %965 = arith.mulf %959, %964 : vector<8x128xf32>
    %cst_379 = arith.constant 9.800000e-01 : f32
    %966 = vector.broadcast %cst_379 : f32 to vector<8x128xf32>
    %967 = arith.mulf %960, %966 : vector<8x128xf32>
    %968 = vector.broadcast %3 : vector<8x1xf32> to vector<8x128xf32>
    %969 = vector.broadcast %963 : vector<1x128xf32> to vector<8x128xf32>
    %970 = arith.mulf %968, %969 : vector<8x128xf32>
    %cst_380 = arith.constant 0.949999988 : f32
    %971 = vector.broadcast %cst_380 : f32 to vector<8x128xf32>
    %972 = arith.mulf %958, %971 : vector<8x128xf32>
    %973 = arith.addf %970, %965 : vector<8x128xf32>
    %974 = arith.addf %973, %967 : vector<8x128xf32>
    %cst_381 = arith.constant 1.000000e-03 : f32
    %975 = vector.broadcast %cst_381 : f32 to vector<8x128xf32>
    %976 = arith.mulf %975, %974 : vector<8x128xf32>
    %977 = arith.addf %972, %976 : vector<8x128xf32>
    %cst_382 = arith.constant -3.500000e-03 : f32
    %978 = vector.broadcast %cst_382 : f32 to vector<8x128xf32>
    %979 = arith.addf %977, %978 : vector<8x128xf32>
    %cst_383 = arith.constant 9.900000e-01 : f32
    %980 = vector.broadcast %cst_383 : f32 to vector<8x128xf32>
    %981 = arith.mulf %961, %980 : vector<8x128xf32>
    %cst_384 = arith.constant -7.000000e-02 : f32
    %982 = vector.broadcast %cst_384 : f32 to vector<8x128xf32>
    %983 = arith.subf %979, %982 : vector<8x128xf32>
    %984 = vector.broadcast %4 : vector<8x1xf32> to vector<8x128xf32>
    %985 = arith.mulf %984, %983 : vector<8x128xf32>
    %986 = arith.addf %981, %985 : vector<8x128xf32>
    %cst_385 = arith.constant -5.000000e-04 : f32
    %987 = vector.broadcast %cst_385 : f32 to vector<8x128xf32>
    %988 = arith.addf %986, %987 : vector<8x128xf32>
    %989 = arith.subf %979, %988 : vector<8x128xf32>
    %cst_386 = arith.constant 0.000000e+00 : f32
    %990 = vector.broadcast %cst_386 : f32 to vector<8x128xf32>
    %991 = arith.cmpf ogt, %989, %990 : vector<8x128xf32>
    %cst_387 = arith.constant 1.000000e+01 : f32
    %992 = vector.broadcast %cst_387 : f32 to vector<8x128xf32>
    %993 = arith.select %991, %992, %965 : vector<8x128xi1>, vector<8x128xf32>
    %cst_388 = arith.constant -6.000000e-01 : f32
    %994 = vector.broadcast %cst_388 : f32 to vector<8x128xf32>
    %995 = arith.addf %967, %994 : vector<8x128xf32>
    %996 = arith.select %991, %995, %967 : vector<8x128xi1>, vector<8x128xf32>
    %cst_389 = arith.constant -6.000000e-02 : f32
    %997 = vector.broadcast %cst_389 : f32 to vector<8x128xf32>
    %998 = arith.maximumf %988, %997 : vector<8x128xf32>
    %999 = arith.select %991, %998, %988 : vector<8x128xi1>, vector<8x128xf32>
    %cst_390 = arith.constant -7.000000e-02 : f32
    %1000 = vector.broadcast %cst_390 : f32 to vector<8x128xf32>
    %1001 = arith.select %991, %1000, %979 : vector<8x128xi1>, vector<8x128xf32>
    %1002 = arith.extui %991 : vector<8x128xi1> to vector<8x128xi32>
    %1003 = arith.sitofp %1002 : vector<8x128xi32> to vector<8x128xf32>
    %c20_391 = arith.constant 20 : index
    %c0_392 = arith.constant 0 : index
    %c0_393 = arith.constant 0 : index
    %1004 = vector.load %arg7[%c20_391, %c0_392, %c0_393] : memref<32x8x128xf32, #tpu.memory_space<vmem>>, vector<1x8x128xf32>
    %1005 = vector.shape_cast %1004 : vector<1x8x128xf32> to vector<8x128xf32>
    %1006 = vector.shape_cast %1003 : vector<8x128xf32> to vector<1x8x128xf32>
    tpu.vector_store %arg7[%c20_391, %c0_392, %c0_393], %1006 {strides = array<i32>} : memref<32x8x128xf32, #tpu.memory_space<vmem>>, vector<1x8x128xf32>,
    %1007 = arith.select %13, %1001, %958 : vector<8x128xf32>
    %1008 = arith.select %13, %993, %959 : vector<8x128xf32>
    %1009 = arith.select %13, %996, %960 : vector<8x128xf32>
    %1010 = arith.select %13, %999, %961 : vector<8x128xf32>
    %c21 = arith.constant 21 : index
    %c0_394 = arith.constant 0 : index
    %c0_395 = arith.constant 0 : index
    %1011 = vector.load %arg3[%c21, %c0_394, %c0_395] : memref<32x1x128xf32, #tpu.memory_space<vmem>>, vector<1x1x128xf32>
    %1012 = vector.shape_cast %1011 : vector<1x1x128xf32> to vector<1x128xf32>
    %cst_396 = arith.constant 8.000000e-01 : f32
    %1013 = vector.broadcast %cst_396 : f32 to vector<8x128xf32>
    %1014 = arith.mulf %1008, %1013 : vector<8x128xf32>
    %cst_397 = arith.constant 9.800000e-01 : f32
    %1015 = vector.broadcast %cst_397 : f32 to vector<8x128xf32>
    %1016 = arith.mulf %1009, %1015 : vector<8x128xf32>
    %1017 = vector.broadcast %3 : vector<8x1xf32> to vector<8x128xf32>
    %1018 = vector.broadcast %1012 : vector<1x128xf32> to vector<8x128xf32>
    %1019 = arith.mulf %1017, %1018 : vector<8x128xf32>
    %cst_398 = arith.constant 0.949999988 : f32
    %1020 = vector.broadcast %cst_398 : f32 to vector<8x128xf32>
    %1021 = arith.mulf %1007, %1020 : vector<8x128xf32>
    %1022 = arith.addf %1019, %1014 : vector<8x128xf32>
    %1023 = arith.addf %1022, %1016 : vector<8x128xf32>
    %cst_399 = arith.constant 1.000000e-03 : f32
    %1024 = vector.broadcast %cst_399 : f32 to vector<8x128xf32>
    %1025 = arith.mulf %1024, %1023 : vector<8x128xf32>
    %1026 = arith.addf %1021, %1025 : vector<8x128xf32>
    %cst_400 = arith.constant -3.500000e-03 : f32
    %1027 = vector.broadcast %cst_400 : f32 to vector<8x128xf32>
    %1028 = arith.addf %1026, %1027 : vector<8x128xf32>
    %cst_401 = arith.constant 9.900000e-01 : f32
    %1029 = vector.broadcast %cst_401 : f32 to vector<8x128xf32>
    %1030 = arith.mulf %1010, %1029 : vector<8x128xf32>
    %cst_402 = arith.constant -7.000000e-02 : f32
    %1031 = vector.broadcast %cst_402 : f32 to vector<8x128xf32>
    %1032 = arith.subf %1028, %1031 : vector<8x128xf32>
    %1033 = vector.broadcast %4 : vector<8x1xf32> to vector<8x128xf32>
    %1034 = arith.mulf %1033, %1032 : vector<8x128xf32>
    %1035 = arith.addf %1030, %1034 : vector<8x128xf32>
    %cst_403 = arith.constant -5.000000e-04 : f32
    %1036 = vector.broadcast %cst_403 : f32 to vector<8x128xf32>
    %1037 = arith.addf %1035, %1036 : vector<8x128xf32>
    %1038 = arith.subf %1028, %1037 : vector<8x128xf32>
    %cst_404 = arith.constant 0.000000e+00 : f32
    %1039 = vector.broadcast %cst_404 : f32 to vector<8x128xf32>
    %1040 = arith.cmpf ogt, %1038, %1039 : vector<8x128xf32>
    %cst_405 = arith.constant 1.000000e+01 : f32
    %1041 = vector.broadcast %cst_405 : f32 to vector<8x128xf32>
    %1042 = arith.select %1040, %1041, %1014 : vector<8x128xi1>, vector<8x128xf32>
    %cst_406 = arith.constant -6.000000e-01 : f32
    %1043 = vector.broadcast %cst_406 : f32 to vector<8x128xf32>
    %1044 = arith.addf %1016, %1043 : vector<8x128xf32>
    %1045 = arith.select %1040, %1044, %1016 : vector<8x128xi1>, vector<8x128xf32>
    %cst_407 = arith.constant -6.000000e-02 : f32
    %1046 = vector.broadcast %cst_407 : f32 to vector<8x128xf32>
    %1047 = arith.maximumf %1037, %1046 : vector<8x128xf32>
    %1048 = arith.select %1040, %1047, %1037 : vector<8x128xi1>, vector<8x128xf32>
    %cst_408 = arith.constant -7.000000e-02 : f32
    %1049 = vector.broadcast %cst_408 : f32 to vector<8x128xf32>
    %1050 = arith.select %1040, %1049, %1028 : vector<8x128xi1>, vector<8x128xf32>
    %1051 = arith.extui %1040 : vector<8x128xi1> to vector<8x128xi32>
    %1052 = arith.sitofp %1051 : vector<8x128xi32> to vector<8x128xf32>
    %c21_409 = arith.constant 21 : index
    %c0_410 = arith.constant 0 : index
    %c0_411 = arith.constant 0 : index
    %1053 = vector.load %arg7[%c21_409, %c0_410, %c0_411] : memref<32x8x128xf32, #tpu.memory_space<vmem>>, vector<1x8x128xf32>
    %1054 = vector.shape_cast %1053 : vector<1x8x128xf32> to vector<8x128xf32>
    %1055 = vector.shape_cast %1052 : vector<8x128xf32> to vector<1x8x128xf32>
    tpu.vector_store %arg7[%c21_409, %c0_410, %c0_411], %1055 {strides = array<i32>} : memref<32x8x128xf32, #tpu.memory_space<vmem>>, vector<1x8x128xf32>,
    %1056 = arith.select %13, %1050, %1007 : vector<8x128xf32>
    %1057 = arith.select %13, %1042, %1008 : vector<8x128xf32>
    %1058 = arith.select %13, %1045, %1009 : vector<8x128xf32>
    %1059 = arith.select %13, %1048, %1010 : vector<8x128xf32>
    %c22 = arith.constant 22 : index
    %c0_412 = arith.constant 0 : index
    %c0_413 = arith.constant 0 : index
    %1060 = vector.load %arg3[%c22, %c0_412, %c0_413] : memref<32x1x128xf32, #tpu.memory_space<vmem>>, vector<1x1x128xf32>
    %1061 = vector.shape_cast %1060 : vector<1x1x128xf32> to vector<1x128xf32>
    %cst_414 = arith.constant 8.000000e-01 : f32
    %1062 = vector.broadcast %cst_414 : f32 to vector<8x128xf32>
    %1063 = arith.mulf %1057, %1062 : vector<8x128xf32>
    %cst_415 = arith.constant 9.800000e-01 : f32
    %1064 = vector.broadcast %cst_415 : f32 to vector<8x128xf32>
    %1065 = arith.mulf %1058, %1064 : vector<8x128xf32>
    %1066 = vector.broadcast %3 : vector<8x1xf32> to vector<8x128xf32>
    %1067 = vector.broadcast %1061 : vector<1x128xf32> to vector<8x128xf32>
    %1068 = arith.mulf %1066, %1067 : vector<8x128xf32>
    %cst_416 = arith.constant 0.949999988 : f32
    %1069 = vector.broadcast %cst_416 : f32 to vector<8x128xf32>
    %1070 = arith.mulf %1056, %1069 : vector<8x128xf32>
    %1071 = arith.addf %1068, %1063 : vector<8x128xf32>
    %1072 = arith.addf %1071, %1065 : vector<8x128xf32>
    %cst_417 = arith.constant 1.000000e-03 : f32
    %1073 = vector.broadcast %cst_417 : f32 to vector<8x128xf32>
    %1074 = arith.mulf %1073, %1072 : vector<8x128xf32>
    %1075 = arith.addf %1070, %1074 : vector<8x128xf32>
    %cst_418 = arith.constant -3.500000e-03 : f32
    %1076 = vector.broadcast %cst_418 : f32 to vector<8x128xf32>
    %1077 = arith.addf %1075, %1076 : vector<8x128xf32>
    %cst_419 = arith.constant 9.900000e-01 : f32
    %1078 = vector.broadcast %cst_419 : f32 to vector<8x128xf32>
    %1079 = arith.mulf %1059, %1078 : vector<8x128xf32>
    %cst_420 = arith.constant -7.000000e-02 : f32
    %1080 = vector.broadcast %cst_420 : f32 to vector<8x128xf32>
    %1081 = arith.subf %1077, %1080 : vector<8x128xf32>
    %1082 = vector.broadcast %4 : vector<8x1xf32> to vector<8x128xf32>
    %1083 = arith.mulf %1082, %1081 : vector<8x128xf32>
    %1084 = arith.addf %1079, %1083 : vector<8x128xf32>
    %cst_421 = arith.constant -5.000000e-04 : f32
    %1085 = vector.broadcast %cst_421 : f32 to vector<8x128xf32>
    %1086 = arith.addf %1084, %1085 : vector<8x128xf32>
    %1087 = arith.subf %1077, %1086 : vector<8x128xf32>
    %cst_422 = arith.constant 0.000000e+00 : f32
    %1088 = vector.broadcast %cst_422 : f32 to vector<8x128xf32>
    %1089 = arith.cmpf ogt, %1087, %1088 : vector<8x128xf32>
    %cst_423 = arith.constant 1.000000e+01 : f32
    %1090 = vector.broadcast %cst_423 : f32 to vector<8x128xf32>
    %1091 = arith.select %1089, %1090, %1063 : vector<8x128xi1>, vector<8x128xf32>
    %cst_424 = arith.constant -6.000000e-01 : f32
    %1092 = vector.broadcast %cst_424 : f32 to vector<8x128xf32>
    %1093 = arith.addf %1065, %1092 : vector<8x128xf32>
    %1094 = arith.select %1089, %1093, %1065 : vector<8x128xi1>, vector<8x128xf32>
    %cst_425 = arith.constant -6.000000e-02 : f32
    %1095 = vector.broadcast %cst_425 : f32 to vector<8x128xf32>
    %1096 = arith.maximumf %1086, %1095 : vector<8x128xf32>
    %1097 = arith.select %1089, %1096, %1086 : vector<8x128xi1>, vector<8x128xf32>
    %cst_426 = arith.constant -7.000000e-02 : f32
    %1098 = vector.broadcast %cst_426 : f32 to vector<8x128xf32>
    %1099 = arith.select %1089, %1098, %1077 : vector<8x128xi1>, vector<8x128xf32>
    %1100 = arith.extui %1089 : vector<8x128xi1> to vector<8x128xi32>
    %1101 = arith.sitofp %1100 : vector<8x128xi32> to vector<8x128xf32>
    %c22_427 = arith.constant 22 : index
    %c0_428 = arith.constant 0 : index
    %c0_429 = arith.constant 0 : index
    %1102 = vector.load %arg7[%c22_427, %c0_428, %c0_429] : memref<32x8x128xf32, #tpu.memory_space<vmem>>, vector<1x8x128xf32>
    %1103 = vector.shape_cast %1102 : vector<1x8x128xf32> to vector<8x128xf32>
    %1104 = vector.shape_cast %1101 : vector<8x128xf32> to vector<1x8x128xf32>
    tpu.vector_store %arg7[%c22_427, %c0_428, %c0_429], %1104 {strides = array<i32>} : memref<32x8x128xf32, #tpu.memory_space<vmem>>, vector<1x8x128xf32>,
    %1105 = arith.select %13, %1099, %1056 : vector<8x128xf32>
    %1106 = arith.select %13, %1091, %1057 : vector<8x128xf32>
    %1107 = arith.select %13, %1094, %1058 : vector<8x128xf32>
    %1108 = arith.select %13, %1097, %1059 : vector<8x128xf32>
    %c23 = arith.constant 23 : index
    %c0_430 = arith.constant 0 : index
    %c0_431 = arith.constant 0 : index
    %1109 = vector.load %arg3[%c23, %c0_430, %c0_431] : memref<32x1x128xf32, #tpu.memory_space<vmem>>, vector<1x1x128xf32>
    %1110 = vector.shape_cast %1109 : vector<1x1x128xf32> to vector<1x128xf32>
    %cst_432 = arith.constant 8.000000e-01 : f32
    %1111 = vector.broadcast %cst_432 : f32 to vector<8x128xf32>
    %1112 = arith.mulf %1106, %1111 : vector<8x128xf32>
    %cst_433 = arith.constant 9.800000e-01 : f32
    %1113 = vector.broadcast %cst_433 : f32 to vector<8x128xf32>
    %1114 = arith.mulf %1107, %1113 : vector<8x128xf32>
    %1115 = vector.broadcast %3 : vector<8x1xf32> to vector<8x128xf32>
    %1116 = vector.broadcast %1110 : vector<1x128xf32> to vector<8x128xf32>
    %1117 = arith.mulf %1115, %1116 : vector<8x128xf32>
    %cst_434 = arith.constant 0.949999988 : f32
    %1118 = vector.broadcast %cst_434 : f32 to vector<8x128xf32>
    %1119 = arith.mulf %1105, %1118 : vector<8x128xf32>
    %1120 = arith.addf %1117, %1112 : vector<8x128xf32>
    %1121 = arith.addf %1120, %1114 : vector<8x128xf32>
    %cst_435 = arith.constant 1.000000e-03 : f32
    %1122 = vector.broadcast %cst_435 : f32 to vector<8x128xf32>
    %1123 = arith.mulf %1122, %1121 : vector<8x128xf32>
    %1124 = arith.addf %1119, %1123 : vector<8x128xf32>
    %cst_436 = arith.constant -3.500000e-03 : f32
    %1125 = vector.broadcast %cst_436 : f32 to vector<8x128xf32>
    %1126 = arith.addf %1124, %1125 : vector<8x128xf32>
    %cst_437 = arith.constant 9.900000e-01 : f32
    %1127 = vector.broadcast %cst_437 : f32 to vector<8x128xf32>
    %1128 = arith.mulf %1108, %1127 : vector<8x128xf32>
    %cst_438 = arith.constant -7.000000e-02 : f32
    %1129 = vector.broadcast %cst_438 : f32 to vector<8x128xf32>
    %1130 = arith.subf %1126, %1129 : vector<8x128xf32>
    %1131 = vector.broadcast %4 : vector<8x1xf32> to vector<8x128xf32>
    %1132 = arith.mulf %1131, %1130 : vector<8x128xf32>
    %1133 = arith.addf %1128, %1132 : vector<8x128xf32>
    %cst_439 = arith.constant -5.000000e-04 : f32
    %1134 = vector.broadcast %cst_439 : f32 to vector<8x128xf32>
    %1135 = arith.addf %1133, %1134 : vector<8x128xf32>
    %1136 = arith.subf %1126, %1135 : vector<8x128xf32>
    %cst_440 = arith.constant 0.000000e+00 : f32
    %1137 = vector.broadcast %cst_440 : f32 to vector<8x128xf32>
    %1138 = arith.cmpf ogt, %1136, %1137 : vector<8x128xf32>
    %cst_441 = arith.constant 1.000000e+01 : f32
    %1139 = vector.broadcast %cst_441 : f32 to vector<8x128xf32>
    %1140 = arith.select %1138, %1139, %1112 : vector<8x128xi1>, vector<8x128xf32>
    %cst_442 = arith.constant -6.000000e-01 : f32
    %1141 = vector.broadcast %cst_442 : f32 to vector<8x128xf32>
    %1142 = arith.addf %1114, %1141 : vector<8x128xf32>
    %1143 = arith.select %1138, %1142, %1114 : vector<8x128xi1>, vector<8x128xf32>
    %cst_443 = arith.constant -6.000000e-02 : f32
    %1144 = vector.broadcast %cst_443 : f32 to vector<8x128xf32>
    %1145 = arith.maximumf %1135, %1144 : vector<8x128xf32>
    %1146 = arith.select %1138, %1145, %1135 : vector<8x128xi1>, vector<8x128xf32>
    %cst_444 = arith.constant -7.000000e-02 : f32
    %1147 = vector.broadcast %cst_444 : f32 to vector<8x128xf32>
    %1148 = arith.select %1138, %1147, %1126 : vector<8x128xi1>, vector<8x128xf32>
    %1149 = arith.extui %1138 : vector<8x128xi1> to vector<8x128xi32>
    %1150 = arith.sitofp %1149 : vector<8x128xi32> to vector<8x128xf32>
    %c23_445 = arith.constant 23 : index
    %c0_446 = arith.constant 0 : index
    %c0_447 = arith.constant 0 : index
    %1151 = vector.load %arg7[%c23_445, %c0_446, %c0_447] : memref<32x8x128xf32, #tpu.memory_space<vmem>>, vector<1x8x128xf32>
    %1152 = vector.shape_cast %1151 : vector<1x8x128xf32> to vector<8x128xf32>
    %1153 = vector.shape_cast %1150 : vector<8x128xf32> to vector<1x8x128xf32>
    tpu.vector_store %arg7[%c23_445, %c0_446, %c0_447], %1153 {strides = array<i32>} : memref<32x8x128xf32, #tpu.memory_space<vmem>>, vector<1x8x128xf32>,
    %1154 = arith.select %13, %1148, %1105 : vector<8x128xf32>
    %1155 = arith.select %13, %1140, %1106 : vector<8x128xf32>
    %1156 = arith.select %13, %1143, %1107 : vector<8x128xf32>
    %1157 = arith.select %13, %1146, %1108 : vector<8x128xf32>
    %c24 = arith.constant 24 : index
    %c0_448 = arith.constant 0 : index
    %c0_449 = arith.constant 0 : index
    %1158 = vector.load %arg3[%c24, %c0_448, %c0_449] : memref<32x1x128xf32, #tpu.memory_space<vmem>>, vector<1x1x128xf32>
    %1159 = vector.shape_cast %1158 : vector<1x1x128xf32> to vector<1x128xf32>
    %cst_450 = arith.constant 8.000000e-01 : f32
    %1160 = vector.broadcast %cst_450 : f32 to vector<8x128xf32>
    %1161 = arith.mulf %1155, %1160 : vector<8x128xf32>
    %cst_451 = arith.constant 9.800000e-01 : f32
    %1162 = vector.broadcast %cst_451 : f32 to vector<8x128xf32>
    %1163 = arith.mulf %1156, %1162 : vector<8x128xf32>
    %1164 = vector.broadcast %3 : vector<8x1xf32> to vector<8x128xf32>
    %1165 = vector.broadcast %1159 : vector<1x128xf32> to vector<8x128xf32>
    %1166 = arith.mulf %1164, %1165 : vector<8x128xf32>
    %cst_452 = arith.constant 0.949999988 : f32
    %1167 = vector.broadcast %cst_452 : f32 to vector<8x128xf32>
    %1168 = arith.mulf %1154, %1167 : vector<8x128xf32>
    %1169 = arith.addf %1166, %1161 : vector<8x128xf32>
    %1170 = arith.addf %1169, %1163 : vector<8x128xf32>
    %cst_453 = arith.constant 1.000000e-03 : f32
    %1171 = vector.broadcast %cst_453 : f32 to vector<8x128xf32>
    %1172 = arith.mulf %1171, %1170 : vector<8x128xf32>
    %1173 = arith.addf %1168, %1172 : vector<8x128xf32>
    %cst_454 = arith.constant -3.500000e-03 : f32
    %1174 = vector.broadcast %cst_454 : f32 to vector<8x128xf32>
    %1175 = arith.addf %1173, %1174 : vector<8x128xf32>
    %cst_455 = arith.constant 9.900000e-01 : f32
    %1176 = vector.broadcast %cst_455 : f32 to vector<8x128xf32>
    %1177 = arith.mulf %1157, %1176 : vector<8x128xf32>
    %cst_456 = arith.constant -7.000000e-02 : f32
    %1178 = vector.broadcast %cst_456 : f32 to vector<8x128xf32>
    %1179 = arith.subf %1175, %1178 : vector<8x128xf32>
    %1180 = vector.broadcast %4 : vector<8x1xf32> to vector<8x128xf32>
    %1181 = arith.mulf %1180, %1179 : vector<8x128xf32>
    %1182 = arith.addf %1177, %1181 : vector<8x128xf32>
    %cst_457 = arith.constant -5.000000e-04 : f32
    %1183 = vector.broadcast %cst_457 : f32 to vector<8x128xf32>
    %1184 = arith.addf %1182, %1183 : vector<8x128xf32>
    %1185 = arith.subf %1175, %1184 : vector<8x128xf32>
    %cst_458 = arith.constant 0.000000e+00 : f32
    %1186 = vector.broadcast %cst_458 : f32 to vector<8x128xf32>
    %1187 = arith.cmpf ogt, %1185, %1186 : vector<8x128xf32>
    %cst_459 = arith.constant 1.000000e+01 : f32
    %1188 = vector.broadcast %cst_459 : f32 to vector<8x128xf32>
    %1189 = arith.select %1187, %1188, %1161 : vector<8x128xi1>, vector<8x128xf32>
    %cst_460 = arith.constant -6.000000e-01 : f32
    %1190 = vector.broadcast %cst_460 : f32 to vector<8x128xf32>
    %1191 = arith.addf %1163, %1190 : vector<8x128xf32>
    %1192 = arith.select %1187, %1191, %1163 : vector<8x128xi1>, vector<8x128xf32>
    %cst_461 = arith.constant -6.000000e-02 : f32
    %1193 = vector.broadcast %cst_461 : f32 to vector<8x128xf32>
    %1194 = arith.maximumf %1184, %1193 : vector<8x128xf32>
    %1195 = arith.select %1187, %1194, %1184 : vector<8x128xi1>, vector<8x128xf32>
    %cst_462 = arith.constant -7.000000e-02 : f32
    %1196 = vector.broadcast %cst_462 : f32 to vector<8x128xf32>
    %1197 = arith.select %1187, %1196, %1175 : vector<8x128xi1>, vector<8x128xf32>
    %1198 = arith.extui %1187 : vector<8x128xi1> to vector<8x128xi32>
    %1199 = arith.sitofp %1198 : vector<8x128xi32> to vector<8x128xf32>
    %c24_463 = arith.constant 24 : index
    %c0_464 = arith.constant 0 : index
    %c0_465 = arith.constant 0 : index
    %1200 = vector.load %arg7[%c24_463, %c0_464, %c0_465] : memref<32x8x128xf32, #tpu.memory_space<vmem>>, vector<1x8x128xf32>
    %1201 = vector.shape_cast %1200 : vector<1x8x128xf32> to vector<8x128xf32>
    %1202 = vector.shape_cast %1199 : vector<8x128xf32> to vector<1x8x128xf32>
    tpu.vector_store %arg7[%c24_463, %c0_464, %c0_465], %1202 {strides = array<i32>} : memref<32x8x128xf32, #tpu.memory_space<vmem>>, vector<1x8x128xf32>,
    %1203 = arith.select %13, %1197, %1154 : vector<8x128xf32>
    %1204 = arith.select %13, %1189, %1155 : vector<8x128xf32>
    %1205 = arith.select %13, %1192, %1156 : vector<8x128xf32>
    %1206 = arith.select %13, %1195, %1157 : vector<8x128xf32>
    %c25 = arith.constant 25 : index
    %c0_466 = arith.constant 0 : index
    %c0_467 = arith.constant 0 : index
    %1207 = vector.load %arg3[%c25, %c0_466, %c0_467] : memref<32x1x128xf32, #tpu.memory_space<vmem>>, vector<1x1x128xf32>
    %1208 = vector.shape_cast %1207 : vector<1x1x128xf32> to vector<1x128xf32>
    %cst_468 = arith.constant 8.000000e-01 : f32
    %1209 = vector.broadcast %cst_468 : f32 to vector<8x128xf32>
    %1210 = arith.mulf %1204, %1209 : vector<8x128xf32>
    %cst_469 = arith.constant 9.800000e-01 : f32
    %1211 = vector.broadcast %cst_469 : f32 to vector<8x128xf32>
    %1212 = arith.mulf %1205, %1211 : vector<8x128xf32>
    %1213 = vector.broadcast %3 : vector<8x1xf32> to vector<8x128xf32>
    %1214 = vector.broadcast %1208 : vector<1x128xf32> to vector<8x128xf32>
    %1215 = arith.mulf %1213, %1214 : vector<8x128xf32>
    %cst_470 = arith.constant 0.949999988 : f32
    %1216 = vector.broadcast %cst_470 : f32 to vector<8x128xf32>
    %1217 = arith.mulf %1203, %1216 : vector<8x128xf32>
    %1218 = arith.addf %1215, %1210 : vector<8x128xf32>
    %1219 = arith.addf %1218, %1212 : vector<8x128xf32>
    %cst_471 = arith.constant 1.000000e-03 : f32
    %1220 = vector.broadcast %cst_471 : f32 to vector<8x128xf32>
    %1221 = arith.mulf %1220, %1219 : vector<8x128xf32>
    %1222 = arith.addf %1217, %1221 : vector<8x128xf32>
    %cst_472 = arith.constant -3.500000e-03 : f32
    %1223 = vector.broadcast %cst_472 : f32 to vector<8x128xf32>
    %1224 = arith.addf %1222, %1223 : vector<8x128xf32>
    %cst_473 = arith.constant 9.900000e-01 : f32
    %1225 = vector.broadcast %cst_473 : f32 to vector<8x128xf32>
    %1226 = arith.mulf %1206, %1225 : vector<8x128xf32>
    %cst_474 = arith.constant -7.000000e-02 : f32
    %1227 = vector.broadcast %cst_474 : f32 to vector<8x128xf32>
    %1228 = arith.subf %1224, %1227 : vector<8x128xf32>
    %1229 = vector.broadcast %4 : vector<8x1xf32> to vector<8x128xf32>
    %1230 = arith.mulf %1229, %1228 : vector<8x128xf32>
    %1231 = arith.addf %1226, %1230 : vector<8x128xf32>
    %cst_475 = arith.constant -5.000000e-04 : f32
    %1232 = vector.broadcast %cst_475 : f32 to vector<8x128xf32>
    %1233 = arith.addf %1231, %1232 : vector<8x128xf32>
    %1234 = arith.subf %1224, %1233 : vector<8x128xf32>
    %cst_476 = arith.constant 0.000000e+00 : f32
    %1235 = vector.broadcast %cst_476 : f32 to vector<8x128xf32>
    %1236 = arith.cmpf ogt, %1234, %1235 : vector<8x128xf32>
    %cst_477 = arith.constant 1.000000e+01 : f32
    %1237 = vector.broadcast %cst_477 : f32 to vector<8x128xf32>
    %1238 = arith.select %1236, %1237, %1210 : vector<8x128xi1>, vector<8x128xf32>
    %cst_478 = arith.constant -6.000000e-01 : f32
    %1239 = vector.broadcast %cst_478 : f32 to vector<8x128xf32>
    %1240 = arith.addf %1212, %1239 : vector<8x128xf32>
    %1241 = arith.select %1236, %1240, %1212 : vector<8x128xi1>, vector<8x128xf32>
    %cst_479 = arith.constant -6.000000e-02 : f32
    %1242 = vector.broadcast %cst_479 : f32 to vector<8x128xf32>
    %1243 = arith.maximumf %1233, %1242 : vector<8x128xf32>
    %1244 = arith.select %1236, %1243, %1233 : vector<8x128xi1>, vector<8x128xf32>
    %cst_480 = arith.constant -7.000000e-02 : f32
    %1245 = vector.broadcast %cst_480 : f32 to vector<8x128xf32>
    %1246 = arith.select %1236, %1245, %1224 : vector<8x128xi1>, vector<8x128xf32>
    %1247 = arith.extui %1236 : vector<8x128xi1> to vector<8x128xi32>
    %1248 = arith.sitofp %1247 : vector<8x128xi32> to vector<8x128xf32>
    %c25_481 = arith.constant 25 : index
    %c0_482 = arith.constant 0 : index
    %c0_483 = arith.constant 0 : index
    %1249 = vector.load %arg7[%c25_481, %c0_482, %c0_483] : memref<32x8x128xf32, #tpu.memory_space<vmem>>, vector<1x8x128xf32>
    %1250 = vector.shape_cast %1249 : vector<1x8x128xf32> to vector<8x128xf32>
    %1251 = vector.shape_cast %1248 : vector<8x128xf32> to vector<1x8x128xf32>
    tpu.vector_store %arg7[%c25_481, %c0_482, %c0_483], %1251 {strides = array<i32>} : memref<32x8x128xf32, #tpu.memory_space<vmem>>, vector<1x8x128xf32>,
    %1252 = arith.select %13, %1246, %1203 : vector<8x128xf32>
    %1253 = arith.select %13, %1238, %1204 : vector<8x128xf32>
    %1254 = arith.select %13, %1241, %1205 : vector<8x128xf32>
    %1255 = arith.select %13, %1244, %1206 : vector<8x128xf32>
    %c26 = arith.constant 26 : index
    %c0_484 = arith.constant 0 : index
    %c0_485 = arith.constant 0 : index
    %1256 = vector.load %arg3[%c26, %c0_484, %c0_485] : memref<32x1x128xf32, #tpu.memory_space<vmem>>, vector<1x1x128xf32>
    %1257 = vector.shape_cast %1256 : vector<1x1x128xf32> to vector<1x128xf32>
    %cst_486 = arith.constant 8.000000e-01 : f32
    %1258 = vector.broadcast %cst_486 : f32 to vector<8x128xf32>
    %1259 = arith.mulf %1253, %1258 : vector<8x128xf32>
    %cst_487 = arith.constant 9.800000e-01 : f32
    %1260 = vector.broadcast %cst_487 : f32 to vector<8x128xf32>
    %1261 = arith.mulf %1254, %1260 : vector<8x128xf32>
    %1262 = vector.broadcast %3 : vector<8x1xf32> to vector<8x128xf32>
    %1263 = vector.broadcast %1257 : vector<1x128xf32> to vector<8x128xf32>
    %1264 = arith.mulf %1262, %1263 : vector<8x128xf32>
    %cst_488 = arith.constant 0.949999988 : f32
    %1265 = vector.broadcast %cst_488 : f32 to vector<8x128xf32>
    %1266 = arith.mulf %1252, %1265 : vector<8x128xf32>
    %1267 = arith.addf %1264, %1259 : vector<8x128xf32>
    %1268 = arith.addf %1267, %1261 : vector<8x128xf32>
    %cst_489 = arith.constant 1.000000e-03 : f32
    %1269 = vector.broadcast %cst_489 : f32 to vector<8x128xf32>
    %1270 = arith.mulf %1269, %1268 : vector<8x128xf32>
    %1271 = arith.addf %1266, %1270 : vector<8x128xf32>
    %cst_490 = arith.constant -3.500000e-03 : f32
    %1272 = vector.broadcast %cst_490 : f32 to vector<8x128xf32>
    %1273 = arith.addf %1271, %1272 : vector<8x128xf32>
    %cst_491 = arith.constant 9.900000e-01 : f32
    %1274 = vector.broadcast %cst_491 : f32 to vector<8x128xf32>
    %1275 = arith.mulf %1255, %1274 : vector<8x128xf32>
    %cst_492 = arith.constant -7.000000e-02 : f32
    %1276 = vector.broadcast %cst_492 : f32 to vector<8x128xf32>
    %1277 = arith.subf %1273, %1276 : vector<8x128xf32>
    %1278 = vector.broadcast %4 : vector<8x1xf32> to vector<8x128xf32>
    %1279 = arith.mulf %1278, %1277 : vector<8x128xf32>
    %1280 = arith.addf %1275, %1279 : vector<8x128xf32>
    %cst_493 = arith.constant -5.000000e-04 : f32
    %1281 = vector.broadcast %cst_493 : f32 to vector<8x128xf32>
    %1282 = arith.addf %1280, %1281 : vector<8x128xf32>
    %1283 = arith.subf %1273, %1282 : vector<8x128xf32>
    %cst_494 = arith.constant 0.000000e+00 : f32
    %1284 = vector.broadcast %cst_494 : f32 to vector<8x128xf32>
    %1285 = arith.cmpf ogt, %1283, %1284 : vector<8x128xf32>
    %cst_495 = arith.constant 1.000000e+01 : f32
    %1286 = vector.broadcast %cst_495 : f32 to vector<8x128xf32>
    %1287 = arith.select %1285, %1286, %1259 : vector<8x128xi1>, vector<8x128xf32>
    %cst_496 = arith.constant -6.000000e-01 : f32
    %1288 = vector.broadcast %cst_496 : f32 to vector<8x128xf32>
    %1289 = arith.addf %1261, %1288 : vector<8x128xf32>
    %1290 = arith.select %1285, %1289, %1261 : vector<8x128xi1>, vector<8x128xf32>
    %cst_497 = arith.constant -6.000000e-02 : f32
    %1291 = vector.broadcast %cst_497 : f32 to vector<8x128xf32>
    %1292 = arith.maximumf %1282, %1291 : vector<8x128xf32>
    %1293 = arith.select %1285, %1292, %1282 : vector<8x128xi1>, vector<8x128xf32>
    %cst_498 = arith.constant -7.000000e-02 : f32
    %1294 = vector.broadcast %cst_498 : f32 to vector<8x128xf32>
    %1295 = arith.select %1285, %1294, %1273 : vector<8x128xi1>, vector<8x128xf32>
    %1296 = arith.extui %1285 : vector<8x128xi1> to vector<8x128xi32>
    %1297 = arith.sitofp %1296 : vector<8x128xi32> to vector<8x128xf32>
    %c26_499 = arith.constant 26 : index
    %c0_500 = arith.constant 0 : index
    %c0_501 = arith.constant 0 : index
    %1298 = vector.load %arg7[%c26_499, %c0_500, %c0_501] : memref<32x8x128xf32, #tpu.memory_space<vmem>>, vector<1x8x128xf32>
    %1299 = vector.shape_cast %1298 : vector<1x8x128xf32> to vector<8x128xf32>
    %1300 = vector.shape_cast %1297 : vector<8x128xf32> to vector<1x8x128xf32>
    tpu.vector_store %arg7[%c26_499, %c0_500, %c0_501], %1300 {strides = array<i32>} : memref<32x8x128xf32, #tpu.memory_space<vmem>>, vector<1x8x128xf32>,
    %1301 = arith.select %13, %1295, %1252 : vector<8x128xf32>
    %1302 = arith.select %13, %1287, %1253 : vector<8x128xf32>
    %1303 = arith.select %13, %1290, %1254 : vector<8x128xf32>
    %1304 = arith.select %13, %1293, %1255 : vector<8x128xf32>
    %c27 = arith.constant 27 : index
    %c0_502 = arith.constant 0 : index
    %c0_503 = arith.constant 0 : index
    %1305 = vector.load %arg3[%c27, %c0_502, %c0_503] : memref<32x1x128xf32, #tpu.memory_space<vmem>>, vector<1x1x128xf32>
    %1306 = vector.shape_cast %1305 : vector<1x1x128xf32> to vector<1x128xf32>
    %cst_504 = arith.constant 8.000000e-01 : f32
    %1307 = vector.broadcast %cst_504 : f32 to vector<8x128xf32>
    %1308 = arith.mulf %1302, %1307 : vector<8x128xf32>
    %cst_505 = arith.constant 9.800000e-01 : f32
    %1309 = vector.broadcast %cst_505 : f32 to vector<8x128xf32>
    %1310 = arith.mulf %1303, %1309 : vector<8x128xf32>
    %1311 = vector.broadcast %3 : vector<8x1xf32> to vector<8x128xf32>
    %1312 = vector.broadcast %1306 : vector<1x128xf32> to vector<8x128xf32>
    %1313 = arith.mulf %1311, %1312 : vector<8x128xf32>
    %cst_506 = arith.constant 0.949999988 : f32
    %1314 = vector.broadcast %cst_506 : f32 to vector<8x128xf32>
    %1315 = arith.mulf %1301, %1314 : vector<8x128xf32>
    %1316 = arith.addf %1313, %1308 : vector<8x128xf32>
    %1317 = arith.addf %1316, %1310 : vector<8x128xf32>
    %cst_507 = arith.constant 1.000000e-03 : f32
    %1318 = vector.broadcast %cst_507 : f32 to vector<8x128xf32>
    %1319 = arith.mulf %1318, %1317 : vector<8x128xf32>
    %1320 = arith.addf %1315, %1319 : vector<8x128xf32>
    %cst_508 = arith.constant -3.500000e-03 : f32
    %1321 = vector.broadcast %cst_508 : f32 to vector<8x128xf32>
    %1322 = arith.addf %1320, %1321 : vector<8x128xf32>
    %cst_509 = arith.constant 9.900000e-01 : f32
    %1323 = vector.broadcast %cst_509 : f32 to vector<8x128xf32>
    %1324 = arith.mulf %1304, %1323 : vector<8x128xf32>
    %cst_510 = arith.constant -7.000000e-02 : f32
    %1325 = vector.broadcast %cst_510 : f32 to vector<8x128xf32>
    %1326 = arith.subf %1322, %1325 : vector<8x128xf32>
    %1327 = vector.broadcast %4 : vector<8x1xf32> to vector<8x128xf32>
    %1328 = arith.mulf %1327, %1326 : vector<8x128xf32>
    %1329 = arith.addf %1324, %1328 : vector<8x128xf32>
    %cst_511 = arith.constant -5.000000e-04 : f32
    %1330 = vector.broadcast %cst_511 : f32 to vector<8x128xf32>
    %1331 = arith.addf %1329, %1330 : vector<8x128xf32>
    %1332 = arith.subf %1322, %1331 : vector<8x128xf32>
    %cst_512 = arith.constant 0.000000e+00 : f32
    %1333 = vector.broadcast %cst_512 : f32 to vector<8x128xf32>
    %1334 = arith.cmpf ogt, %1332, %1333 : vector<8x128xf32>
    %cst_513 = arith.constant 1.000000e+01 : f32
    %1335 = vector.broadcast %cst_513 : f32 to vector<8x128xf32>
    %1336 = arith.select %1334, %1335, %1308 : vector<8x128xi1>, vector<8x128xf32>
    %cst_514 = arith.constant -6.000000e-01 : f32
    %1337 = vector.broadcast %cst_514 : f32 to vector<8x128xf32>
    %1338 = arith.addf %1310, %1337 : vector<8x128xf32>
    %1339 = arith.select %1334, %1338, %1310 : vector<8x128xi1>, vector<8x128xf32>
    %cst_515 = arith.constant -6.000000e-02 : f32
    %1340 = vector.broadcast %cst_515 : f32 to vector<8x128xf32>
    %1341 = arith.maximumf %1331, %1340 : vector<8x128xf32>
    %1342 = arith.select %1334, %1341, %1331 : vector<8x128xi1>, vector<8x128xf32>
    %cst_516 = arith.constant -7.000000e-02 : f32
    %1343 = vector.broadcast %cst_516 : f32 to vector<8x128xf32>
    %1344 = arith.select %1334, %1343, %1322 : vector<8x128xi1>, vector<8x128xf32>
    %1345 = arith.extui %1334 : vector<8x128xi1> to vector<8x128xi32>
    %1346 = arith.sitofp %1345 : vector<8x128xi32> to vector<8x128xf32>
    %c27_517 = arith.constant 27 : index
    %c0_518 = arith.constant 0 : index
    %c0_519 = arith.constant 0 : index
    %1347 = vector.load %arg7[%c27_517, %c0_518, %c0_519] : memref<32x8x128xf32, #tpu.memory_space<vmem>>, vector<1x8x128xf32>
    %1348 = vector.shape_cast %1347 : vector<1x8x128xf32> to vector<8x128xf32>
    %1349 = vector.shape_cast %1346 : vector<8x128xf32> to vector<1x8x128xf32>
    tpu.vector_store %arg7[%c27_517, %c0_518, %c0_519], %1349 {strides = array<i32>} : memref<32x8x128xf32, #tpu.memory_space<vmem>>, vector<1x8x128xf32>,
    %1350 = arith.select %13, %1344, %1301 : vector<8x128xf32>
    %1351 = arith.select %13, %1336, %1302 : vector<8x128xf32>
    %1352 = arith.select %13, %1339, %1303 : vector<8x128xf32>
    %1353 = arith.select %13, %1342, %1304 : vector<8x128xf32>
    %c28 = arith.constant 28 : index
    %c0_520 = arith.constant 0 : index
    %c0_521 = arith.constant 0 : index
    %1354 = vector.load %arg3[%c28, %c0_520, %c0_521] : memref<32x1x128xf32, #tpu.memory_space<vmem>>, vector<1x1x128xf32>
    %1355 = vector.shape_cast %1354 : vector<1x1x128xf32> to vector<1x128xf32>
    %cst_522 = arith.constant 8.000000e-01 : f32
    %1356 = vector.broadcast %cst_522 : f32 to vector<8x128xf32>
    %1357 = arith.mulf %1351, %1356 : vector<8x128xf32>
    %cst_523 = arith.constant 9.800000e-01 : f32
    %1358 = vector.broadcast %cst_523 : f32 to vector<8x128xf32>
    %1359 = arith.mulf %1352, %1358 : vector<8x128xf32>
    %1360 = vector.broadcast %3 : vector<8x1xf32> to vector<8x128xf32>
    %1361 = vector.broadcast %1355 : vector<1x128xf32> to vector<8x128xf32>
    %1362 = arith.mulf %1360, %1361 : vector<8x128xf32>
    %cst_524 = arith.constant 0.949999988 : f32
    %1363 = vector.broadcast %cst_524 : f32 to vector<8x128xf32>
    %1364 = arith.mulf %1350, %1363 : vector<8x128xf32>
    %1365 = arith.addf %1362, %1357 : vector<8x128xf32>
    %1366 = arith.addf %1365, %1359 : vector<8x128xf32>
    %cst_525 = arith.constant 1.000000e-03 : f32
    %1367 = vector.broadcast %cst_525 : f32 to vector<8x128xf32>
    %1368 = arith.mulf %1367, %1366 : vector<8x128xf32>
    %1369 = arith.addf %1364, %1368 : vector<8x128xf32>
    %cst_526 = arith.constant -3.500000e-03 : f32
    %1370 = vector.broadcast %cst_526 : f32 to vector<8x128xf32>
    %1371 = arith.addf %1369, %1370 : vector<8x128xf32>
    %cst_527 = arith.constant 9.900000e-01 : f32
    %1372 = vector.broadcast %cst_527 : f32 to vector<8x128xf32>
    %1373 = arith.mulf %1353, %1372 : vector<8x128xf32>
    %cst_528 = arith.constant -7.000000e-02 : f32
    %1374 = vector.broadcast %cst_528 : f32 to vector<8x128xf32>
    %1375 = arith.subf %1371, %1374 : vector<8x128xf32>
    %1376 = vector.broadcast %4 : vector<8x1xf32> to vector<8x128xf32>
    %1377 = arith.mulf %1376, %1375 : vector<8x128xf32>
    %1378 = arith.addf %1373, %1377 : vector<8x128xf32>
    %cst_529 = arith.constant -5.000000e-04 : f32
    %1379 = vector.broadcast %cst_529 : f32 to vector<8x128xf32>
    %1380 = arith.addf %1378, %1379 : vector<8x128xf32>
    %1381 = arith.subf %1371, %1380 : vector<8x128xf32>
    %cst_530 = arith.constant 0.000000e+00 : f32
    %1382 = vector.broadcast %cst_530 : f32 to vector<8x128xf32>
    %1383 = arith.cmpf ogt, %1381, %1382 : vector<8x128xf32>
    %cst_531 = arith.constant 1.000000e+01 : f32
    %1384 = vector.broadcast %cst_531 : f32 to vector<8x128xf32>
    %1385 = arith.select %1383, %1384, %1357 : vector<8x128xi1>, vector<8x128xf32>
    %cst_532 = arith.constant -6.000000e-01 : f32
    %1386 = vector.broadcast %cst_532 : f32 to vector<8x128xf32>
    %1387 = arith.addf %1359, %1386 : vector<8x128xf32>
    %1388 = arith.select %1383, %1387, %1359 : vector<8x128xi1>, vector<8x128xf32>
    %cst_533 = arith.constant -6.000000e-02 : f32
    %1389 = vector.broadcast %cst_533 : f32 to vector<8x128xf32>
    %1390 = arith.maximumf %1380, %1389 : vector<8x128xf32>
    %1391 = arith.select %1383, %1390, %1380 : vector<8x128xi1>, vector<8x128xf32>
    %cst_534 = arith.constant -7.000000e-02 : f32
    %1392 = vector.broadcast %cst_534 : f32 to vector<8x128xf32>
    %1393 = arith.select %1383, %1392, %1371 : vector<8x128xi1>, vector<8x128xf32>
    %1394 = arith.extui %1383 : vector<8x128xi1> to vector<8x128xi32>
    %1395 = arith.sitofp %1394 : vector<8x128xi32> to vector<8x128xf32>
    %c28_535 = arith.constant 28 : index
    %c0_536 = arith.constant 0 : index
    %c0_537 = arith.constant 0 : index
    %1396 = vector.load %arg7[%c28_535, %c0_536, %c0_537] : memref<32x8x128xf32, #tpu.memory_space<vmem>>, vector<1x8x128xf32>
    %1397 = vector.shape_cast %1396 : vector<1x8x128xf32> to vector<8x128xf32>
    %1398 = vector.shape_cast %1395 : vector<8x128xf32> to vector<1x8x128xf32>
    tpu.vector_store %arg7[%c28_535, %c0_536, %c0_537], %1398 {strides = array<i32>} : memref<32x8x128xf32, #tpu.memory_space<vmem>>, vector<1x8x128xf32>,
    %1399 = arith.select %13, %1393, %1350 : vector<8x128xf32>
    %1400 = arith.select %13, %1385, %1351 : vector<8x128xf32>
    %1401 = arith.select %13, %1388, %1352 : vector<8x128xf32>
    %1402 = arith.select %13, %1391, %1353 : vector<8x128xf32>
    %c29 = arith.constant 29 : index
    %c0_538 = arith.constant 0 : index
    %c0_539 = arith.constant 0 : index
    %1403 = vector.load %arg3[%c29, %c0_538, %c0_539] : memref<32x1x128xf32, #tpu.memory_space<vmem>>, vector<1x1x128xf32>
    %1404 = vector.shape_cast %1403 : vector<1x1x128xf32> to vector<1x128xf32>
    %cst_540 = arith.constant 8.000000e-01 : f32
    %1405 = vector.broadcast %cst_540 : f32 to vector<8x128xf32>
    %1406 = arith.mulf %1400, %1405 : vector<8x128xf32>
    %cst_541 = arith.constant 9.800000e-01 : f32
    %1407 = vector.broadcast %cst_541 : f32 to vector<8x128xf32>
    %1408 = arith.mulf %1401, %1407 : vector<8x128xf32>
    %1409 = vector.broadcast %3 : vector<8x1xf32> to vector<8x128xf32>
    %1410 = vector.broadcast %1404 : vector<1x128xf32> to vector<8x128xf32>
    %1411 = arith.mulf %1409, %1410 : vector<8x128xf32>
    %cst_542 = arith.constant 0.949999988 : f32
    %1412 = vector.broadcast %cst_542 : f32 to vector<8x128xf32>
    %1413 = arith.mulf %1399, %1412 : vector<8x128xf32>
    %1414 = arith.addf %1411, %1406 : vector<8x128xf32>
    %1415 = arith.addf %1414, %1408 : vector<8x128xf32>
    %cst_543 = arith.constant 1.000000e-03 : f32
    %1416 = vector.broadcast %cst_543 : f32 to vector<8x128xf32>
    %1417 = arith.mulf %1416, %1415 : vector<8x128xf32>
    %1418 = arith.addf %1413, %1417 : vector<8x128xf32>
    %cst_544 = arith.constant -3.500000e-03 : f32
    %1419 = vector.broadcast %cst_544 : f32 to vector<8x128xf32>
    %1420 = arith.addf %1418, %1419 : vector<8x128xf32>
    %cst_545 = arith.constant 9.900000e-01 : f32
    %1421 = vector.broadcast %cst_545 : f32 to vector<8x128xf32>
    %1422 = arith.mulf %1402, %1421 : vector<8x128xf32>
    %cst_546 = arith.constant -7.000000e-02 : f32
    %1423 = vector.broadcast %cst_546 : f32 to vector<8x128xf32>
    %1424 = arith.subf %1420, %1423 : vector<8x128xf32>
    %1425 = vector.broadcast %4 : vector<8x1xf32> to vector<8x128xf32>
    %1426 = arith.mulf %1425, %1424 : vector<8x128xf32>
    %1427 = arith.addf %1422, %1426 : vector<8x128xf32>
    %cst_547 = arith.constant -5.000000e-04 : f32
    %1428 = vector.broadcast %cst_547 : f32 to vector<8x128xf32>
    %1429 = arith.addf %1427, %1428 : vector<8x128xf32>
    %1430 = arith.subf %1420, %1429 : vector<8x128xf32>
    %cst_548 = arith.constant 0.000000e+00 : f32
    %1431 = vector.broadcast %cst_548 : f32 to vector<8x128xf32>
    %1432 = arith.cmpf ogt, %1430, %1431 : vector<8x128xf32>
    %cst_549 = arith.constant 1.000000e+01 : f32
    %1433 = vector.broadcast %cst_549 : f32 to vector<8x128xf32>
    %1434 = arith.select %1432, %1433, %1406 : vector<8x128xi1>, vector<8x128xf32>
    %cst_550 = arith.constant -6.000000e-01 : f32
    %1435 = vector.broadcast %cst_550 : f32 to vector<8x128xf32>
    %1436 = arith.addf %1408, %1435 : vector<8x128xf32>
    %1437 = arith.select %1432, %1436, %1408 : vector<8x128xi1>, vector<8x128xf32>
    %cst_551 = arith.constant -6.000000e-02 : f32
    %1438 = vector.broadcast %cst_551 : f32 to vector<8x128xf32>
    %1439 = arith.maximumf %1429, %1438 : vector<8x128xf32>
    %1440 = arith.select %1432, %1439, %1429 : vector<8x128xi1>, vector<8x128xf32>
    %cst_552 = arith.constant -7.000000e-02 : f32
    %1441 = vector.broadcast %cst_552 : f32 to vector<8x128xf32>
    %1442 = arith.select %1432, %1441, %1420 : vector<8x128xi1>, vector<8x128xf32>
    %1443 = arith.extui %1432 : vector<8x128xi1> to vector<8x128xi32>
    %1444 = arith.sitofp %1443 : vector<8x128xi32> to vector<8x128xf32>
    %c29_553 = arith.constant 29 : index
    %c0_554 = arith.constant 0 : index
    %c0_555 = arith.constant 0 : index
    %1445 = vector.load %arg7[%c29_553, %c0_554, %c0_555] : memref<32x8x128xf32, #tpu.memory_space<vmem>>, vector<1x8x128xf32>
    %1446 = vector.shape_cast %1445 : vector<1x8x128xf32> to vector<8x128xf32>
    %1447 = vector.shape_cast %1444 : vector<8x128xf32> to vector<1x8x128xf32>
    tpu.vector_store %arg7[%c29_553, %c0_554, %c0_555], %1447 {strides = array<i32>} : memref<32x8x128xf32, #tpu.memory_space<vmem>>, vector<1x8x128xf32>,
    %1448 = arith.select %13, %1442, %1399 : vector<8x128xf32>
    %1449 = arith.select %13, %1434, %1400 : vector<8x128xf32>
    %1450 = arith.select %13, %1437, %1401 : vector<8x128xf32>
    %1451 = arith.select %13, %1440, %1402 : vector<8x128xf32>
    %c30 = arith.constant 30 : index
    %c0_556 = arith.constant 0 : index
    %c0_557 = arith.constant 0 : index
    %1452 = vector.load %arg3[%c30, %c0_556, %c0_557] : memref<32x1x128xf32, #tpu.memory_space<vmem>>, vector<1x1x128xf32>
    %1453 = vector.shape_cast %1452 : vector<1x1x128xf32> to vector<1x128xf32>
    %cst_558 = arith.constant 8.000000e-01 : f32
    %1454 = vector.broadcast %cst_558 : f32 to vector<8x128xf32>
    %1455 = arith.mulf %1449, %1454 : vector<8x128xf32>
    %cst_559 = arith.constant 9.800000e-01 : f32
    %1456 = vector.broadcast %cst_559 : f32 to vector<8x128xf32>
    %1457 = arith.mulf %1450, %1456 : vector<8x128xf32>
    %1458 = vector.broadcast %3 : vector<8x1xf32> to vector<8x128xf32>
    %1459 = vector.broadcast %1453 : vector<1x128xf32> to vector<8x128xf32>
    %1460 = arith.mulf %1458, %1459 : vector<8x128xf32>
    %cst_560 = arith.constant 0.949999988 : f32
    %1461 = vector.broadcast %cst_560 : f32 to vector<8x128xf32>
    %1462 = arith.mulf %1448, %1461 : vector<8x128xf32>
    %1463 = arith.addf %1460, %1455 : vector<8x128xf32>
    %1464 = arith.addf %1463, %1457 : vector<8x128xf32>
    %cst_561 = arith.constant 1.000000e-03 : f32
    %1465 = vector.broadcast %cst_561 : f32 to vector<8x128xf32>
    %1466 = arith.mulf %1465, %1464 : vector<8x128xf32>
    %1467 = arith.addf %1462, %1466 : vector<8x128xf32>
    %cst_562 = arith.constant -3.500000e-03 : f32
    %1468 = vector.broadcast %cst_562 : f32 to vector<8x128xf32>
    %1469 = arith.addf %1467, %1468 : vector<8x128xf32>
    %cst_563 = arith.constant 9.900000e-01 : f32
    %1470 = vector.broadcast %cst_563 : f32 to vector<8x128xf32>
    %1471 = arith.mulf %1451, %1470 : vector<8x128xf32>
    %cst_564 = arith.constant -7.000000e-02 : f32
    %1472 = vector.broadcast %cst_564 : f32 to vector<8x128xf32>
    %1473 = arith.subf %1469, %1472 : vector<8x128xf32>
    %1474 = vector.broadcast %4 : vector<8x1xf32> to vector<8x128xf32>
    %1475 = arith.mulf %1474, %1473 : vector<8x128xf32>
    %1476 = arith.addf %1471, %1475 : vector<8x128xf32>
    %cst_565 = arith.constant -5.000000e-04 : f32
    %1477 = vector.broadcast %cst_565 : f32 to vector<8x128xf32>
    %1478 = arith.addf %1476, %1477 : vector<8x128xf32>
    %1479 = arith.subf %1469, %1478 : vector<8x128xf32>
    %cst_566 = arith.constant 0.000000e+00 : f32
    %1480 = vector.broadcast %cst_566 : f32 to vector<8x128xf32>
    %1481 = arith.cmpf ogt, %1479, %1480 : vector<8x128xf32>
    %cst_567 = arith.constant 1.000000e+01 : f32
    %1482 = vector.broadcast %cst_567 : f32 to vector<8x128xf32>
    %1483 = arith.select %1481, %1482, %1455 : vector<8x128xi1>, vector<8x128xf32>
    %cst_568 = arith.constant -6.000000e-01 : f32
    %1484 = vector.broadcast %cst_568 : f32 to vector<8x128xf32>
    %1485 = arith.addf %1457, %1484 : vector<8x128xf32>
    %1486 = arith.select %1481, %1485, %1457 : vector<8x128xi1>, vector<8x128xf32>
    %cst_569 = arith.constant -6.000000e-02 : f32
    %1487 = vector.broadcast %cst_569 : f32 to vector<8x128xf32>
    %1488 = arith.maximumf %1478, %1487 : vector<8x128xf32>
    %1489 = arith.select %1481, %1488, %1478 : vector<8x128xi1>, vector<8x128xf32>
    %cst_570 = arith.constant -7.000000e-02 : f32
    %1490 = vector.broadcast %cst_570 : f32 to vector<8x128xf32>
    %1491 = arith.select %1481, %1490, %1469 : vector<8x128xi1>, vector<8x128xf32>
    %1492 = arith.extui %1481 : vector<8x128xi1> to vector<8x128xi32>
    %1493 = arith.sitofp %1492 : vector<8x128xi32> to vector<8x128xf32>
    %c30_571 = arith.constant 30 : index
    %c0_572 = arith.constant 0 : index
    %c0_573 = arith.constant 0 : index
    %1494 = vector.load %arg7[%c30_571, %c0_572, %c0_573] : memref<32x8x128xf32, #tpu.memory_space<vmem>>, vector<1x8x128xf32>
    %1495 = vector.shape_cast %1494 : vector<1x8x128xf32> to vector<8x128xf32>
    %1496 = vector.shape_cast %1493 : vector<8x128xf32> to vector<1x8x128xf32>
    tpu.vector_store %arg7[%c30_571, %c0_572, %c0_573], %1496 {strides = array<i32>} : memref<32x8x128xf32, #tpu.memory_space<vmem>>, vector<1x8x128xf32>,
    %1497 = arith.select %13, %1491, %1448 : vector<8x128xf32>
    %1498 = arith.select %13, %1483, %1449 : vector<8x128xf32>
    %1499 = arith.select %13, %1486, %1450 : vector<8x128xf32>
    %1500 = arith.select %13, %1489, %1451 : vector<8x128xf32>
    %c31 = arith.constant 31 : index
    %c0_574 = arith.constant 0 : index
    %c0_575 = arith.constant 0 : index
    %1501 = vector.load %arg3[%c31, %c0_574, %c0_575] : memref<32x1x128xf32, #tpu.memory_space<vmem>>, vector<1x1x128xf32>
    %1502 = vector.shape_cast %1501 : vector<1x1x128xf32> to vector<1x128xf32>
    %cst_576 = arith.constant 8.000000e-01 : f32
    %1503 = vector.broadcast %cst_576 : f32 to vector<8x128xf32>
    %1504 = arith.mulf %1498, %1503 : vector<8x128xf32>
    %cst_577 = arith.constant 9.800000e-01 : f32
    %1505 = vector.broadcast %cst_577 : f32 to vector<8x128xf32>
    %1506 = arith.mulf %1499, %1505 : vector<8x128xf32>
    %1507 = vector.broadcast %3 : vector<8x1xf32> to vector<8x128xf32>
    %1508 = vector.broadcast %1502 : vector<1x128xf32> to vector<8x128xf32>
    %1509 = arith.mulf %1507, %1508 : vector<8x128xf32>
    %cst_578 = arith.constant 0.949999988 : f32
    %1510 = vector.broadcast %cst_578 : f32 to vector<8x128xf32>
    %1511 = arith.mulf %1497, %1510 : vector<8x128xf32>
    %1512 = arith.addf %1509, %1504 : vector<8x128xf32>
    %1513 = arith.addf %1512, %1506 : vector<8x128xf32>
    %cst_579 = arith.constant 1.000000e-03 : f32
    %1514 = vector.broadcast %cst_579 : f32 to vector<8x128xf32>
    %1515 = arith.mulf %1514, %1513 : vector<8x128xf32>
    %1516 = arith.addf %1511, %1515 : vector<8x128xf32>
    %cst_580 = arith.constant -3.500000e-03 : f32
    %1517 = vector.broadcast %cst_580 : f32 to vector<8x128xf32>
    %1518 = arith.addf %1516, %1517 : vector<8x128xf32>
    %cst_581 = arith.constant 9.900000e-01 : f32
    %1519 = vector.broadcast %cst_581 : f32 to vector<8x128xf32>
    %1520 = arith.mulf %1500, %1519 : vector<8x128xf32>
    %cst_582 = arith.constant -7.000000e-02 : f32
    %1521 = vector.broadcast %cst_582 : f32 to vector<8x128xf32>
    %1522 = arith.subf %1518, %1521 : vector<8x128xf32>
    %1523 = vector.broadcast %4 : vector<8x1xf32> to vector<8x128xf32>
    %1524 = arith.mulf %1523, %1522 : vector<8x128xf32>
    %1525 = arith.addf %1520, %1524 : vector<8x128xf32>
    %cst_583 = arith.constant -5.000000e-04 : f32
    %1526 = vector.broadcast %cst_583 : f32 to vector<8x128xf32>
    %1527 = arith.addf %1525, %1526 : vector<8x128xf32>
    %1528 = arith.subf %1518, %1527 : vector<8x128xf32>
    %cst_584 = arith.constant 0.000000e+00 : f32
    %1529 = vector.broadcast %cst_584 : f32 to vector<8x128xf32>
    %1530 = arith.cmpf ogt, %1528, %1529 : vector<8x128xf32>
    %cst_585 = arith.constant 1.000000e+01 : f32
    %1531 = vector.broadcast %cst_585 : f32 to vector<8x128xf32>
    %1532 = arith.select %1530, %1531, %1504 : vector<8x128xi1>, vector<8x128xf32>
    %cst_586 = arith.constant -6.000000e-01 : f32
    %1533 = vector.broadcast %cst_586 : f32 to vector<8x128xf32>
    %1534 = arith.addf %1506, %1533 : vector<8x128xf32>
    %1535 = arith.select %1530, %1534, %1506 : vector<8x128xi1>, vector<8x128xf32>
    %cst_587 = arith.constant -6.000000e-02 : f32
    %1536 = vector.broadcast %cst_587 : f32 to vector<8x128xf32>
    %1537 = arith.maximumf %1527, %1536 : vector<8x128xf32>
    %1538 = arith.select %1530, %1537, %1527 : vector<8x128xi1>, vector<8x128xf32>
    %cst_588 = arith.constant -7.000000e-02 : f32
    %1539 = vector.broadcast %cst_588 : f32 to vector<8x128xf32>
    %1540 = arith.select %1530, %1539, %1518 : vector<8x128xi1>, vector<8x128xf32>
    %1541 = arith.extui %1530 : vector<8x128xi1> to vector<8x128xi32>
    %1542 = arith.sitofp %1541 : vector<8x128xi32> to vector<8x128xf32>
    %c31_589 = arith.constant 31 : index
    %c0_590 = arith.constant 0 : index
    %c0_591 = arith.constant 0 : index
    %1543 = vector.load %arg7[%c31_589, %c0_590, %c0_591] : memref<32x8x128xf32, #tpu.memory_space<vmem>>, vector<1x8x128xf32>
    %1544 = vector.shape_cast %1543 : vector<1x8x128xf32> to vector<8x128xf32>
    %1545 = vector.shape_cast %1542 : vector<8x128xf32> to vector<1x8x128xf32>
    tpu.vector_store %arg7[%c31_589, %c0_590, %c0_591], %1545 {strides = array<i32>} : memref<32x8x128xf32, #tpu.memory_space<vmem>>, vector<1x8x128xf32>,
    %1546 = arith.select %13, %1540, %1497 : vector<8x128xf32>
    %1547 = arith.select %13, %1532, %1498 : vector<8x128xf32>
    %1548 = arith.select %13, %1535, %1499 : vector<8x128xf32>
    %1549 = arith.select %13, %1538, %1500 : vector<8x128xf32>
    %c0_592 = arith.constant 0 : index
    %c0_593 = arith.constant 0 : index
    %c0_594 = arith.constant 0 : index
    %1550 = vector.load %arg8[%c0_592, %c0_593, %c0_594] : memref<4x8x128xf32, #tpu.memory_space<vmem>>, vector<1x8x128xf32>
    %1551 = vector.shape_cast %1550 : vector<1x8x128xf32> to vector<8x128xf32>
    %1552 = vector.shape_cast %1546 : vector<8x128xf32> to vector<1x8x128xf32>
    tpu.vector_store %arg8[%c0_592, %c0_593, %c0_594], %1552 {strides = array<i32>} : memref<4x8x128xf32, #tpu.memory_space<vmem>>, vector<1x8x128xf32>,
    %c1_595 = arith.constant 1 : index
    %c0_596 = arith.constant 0 : index
    %c0_597 = arith.constant 0 : index
    %1553 = vector.load %arg8[%c1_595, %c0_596, %c0_597] : memref<4x8x128xf32, #tpu.memory_space<vmem>>, vector<1x8x128xf32>
    %1554 = vector.shape_cast %1553 : vector<1x8x128xf32> to vector<8x128xf32>
    %1555 = vector.shape_cast %1547 : vector<8x128xf32> to vector<1x8x128xf32>
    tpu.vector_store %arg8[%c1_595, %c0_596, %c0_597], %1555 {strides = array<i32>} : memref<4x8x128xf32, #tpu.memory_space<vmem>>, vector<1x8x128xf32>,
    %c2_598 = arith.constant 2 : index
    %c0_599 = arith.constant 0 : index
    %c0_600 = arith.constant 0 : index
    %1556 = vector.load %arg8[%c2_598, %c0_599, %c0_600] : memref<4x8x128xf32, #tpu.memory_space<vmem>>, vector<1x8x128xf32>
    %1557 = vector.shape_cast %1556 : vector<1x8x128xf32> to vector<8x128xf32>
    %1558 = vector.shape_cast %1548 : vector<8x128xf32> to vector<1x8x128xf32>
    tpu.vector_store %arg8[%c2_598, %c0_599, %c0_600], %1558 {strides = array<i32>} : memref<4x8x128xf32, #tpu.memory_space<vmem>>, vector<1x8x128xf32>,
    %c3_601 = arith.constant 3 : index
    %c0_602 = arith.constant 0 : index
    %c0_603 = arith.constant 0 : index
    %1559 = vector.load %arg8[%c3_601, %c0_602, %c0_603] : memref<4x8x128xf32, #tpu.memory_space<vmem>>, vector<1x8x128xf32>
    %1560 = vector.shape_cast %1559 : vector<1x8x128xf32> to vector<8x128xf32>
    %1561 = vector.shape_cast %1549 : vector<8x128xf32> to vector<1x8x128xf32>
    tpu.vector_store %arg8[%c3_601, %c0_602, %c0_603], %1561 {strides = array<i32>} : memref<4x8x128xf32, #tpu.memory_space<vmem>>, vector<1x8x128xf32>,
    return
  }
  func.func @transform_0(%arg0: i32, %arg1: i32, %arg2: i32) -> (i32, i32, i32) {
    %c0_i32 = arith.constant 0 : i32
    %c0_i32_0 = arith.constant 0 : i32
    return %arg2, %c0_i32, %arg1 : i32, i32, i32
  }
  func.func @transform_1(%arg0: i32, %arg1: i32, %arg2: i32) -> (i32, i32) {
    %c0_i32 = arith.constant 0 : i32
    %c0_i32_0 = arith.constant 0 : i32
    return %arg0, %c0_i32 : i32, i32
  }
  func.func @transform_2(%arg0: i32, %arg1: i32, %arg2: i32) -> (i32, i32) {
    %c0_i32 = arith.constant 0 : i32
    %c0_i32_0 = arith.constant 0 : i32
    return %arg0, %c0_i32 : i32, i32
  }
  func.func @transform_3(%arg0: i32, %arg1: i32, %arg2: i32) -> (i32, i32, i32) {
    %c0_i32 = arith.constant 0 : i32
    %c0_i32_0 = arith.constant 0 : i32
    return %c0_i32, %arg0, %arg1 : i32, i32, i32
  }
  func.func @transform_4(%arg0: i32, %arg1: i32, %arg2: i32) -> (i32, i32, i32) {
    %c0_i32 = arith.constant 0 : i32
    return %arg2, %arg0, %arg1 : i32, i32, i32
  }
  func.func @transform_5(%arg0: i32, %arg1: i32, %arg2: i32) -> (i32, i32, i32) {
    %c0_i32 = arith.constant 0 : i32
    %c0_i32_0 = arith.constant 0 : i32
    return %c0_i32, %arg0, %arg1 : i32, i32, i32
  }
}

</mosaic_0001>

<bundles_post_ra>
// kernel: tpu_custom_call.1
= control target key start
LH: loop header
LB: loop body
LE: loop exit
PB: predicated region body
PF: predicated region fallthrough
CT: control target
= control target key end

     0   :  { %s3331_s0 = inlined_call_operand.hbm [shape: f32[64,1,128], index: 0, kind: input, shape index: {}]   ;;  %s3332_s1 = inlined_call_operand.vmem [shape: f32[8,1], index: 1, kind: input, shape index: {}]   ;;  %s3333_s2 = inlined_call_operand.vmem [shape: f32[8,1], index: 2, kind: input, shape index: {}]   ;;  %s3334_s3 = inlined_call_operand.hbm [shape: f32[4,8,128], index: 3, kind: input, shape index: {}]   ;;  %s3335_s4 = inlined_call_operand.hbm [shape: f32[64,8,128], index: 4, kind: output, shape index: {0}]   ;;  %s3336_s5 = inlined_call_operand.hbm [shape: f32[4,8,128], index: 5, kind: output, shape index: {1}]  }
   0x1   :  { %3342 = sst [smem:[#allocation16_spill]] %s3334_s3 }
   0x2   :  { %11 = vsyncpa [#allocation3], 0 }
   0x3   :  { %13 = vsyncpa [#allocation3 + $0x1], 0 }
   0x4   :  { %14 = vsyncpa [#allocation6], 0 }
   0x5   :  { %15 = vsyncpa [#allocation4], 0 }
   0x6   :  { %17 = vsyncpa [#allocation4 + $0x1], 0 }
   0x7   :  { %18 = vsyncpa [#allocation9], 0  ;;  %s2216_s18 = smov 0   ;;  %s2218_s19 = smov 0  }
   0x8   :  { %s2220_s20 = smov 0   ;;  %s2222_s21 = smov 0  }
   0x9   :  { %s2224_s22 = smov 0   ;;  %s2226_s23 = smov 0  }
   0xa LB: > { %3343 = sst [smem:[#allocation14_spill]] %s2168_s22  ;;  %s1735_s24 = sadd.s32 4294967295, %s2172_s23   ;;  %s2172_s23 = sphi %s2226_s23, %s24_s23   ;;  %s2168_s22 = sphi %s2224_s22, %s3424_s22   ;;  %s2164_s21 = sphi %s2222_s21, %s3423_s21   ;;  %s2160_s20 = sphi %s2220_s20, %s3427_s20   ;;  %s2156_s19 = sphi %s2218_s19, %s3426_s19   ;;  %s2152_s18 = sphi %s2216_s18, %s3425_s18  }
   0xb   : > { %s1736_s25 = sadd.s32 4294967294, %s2172_s23   ;;  %p65_p0 = scmp.ne.s32.totalorder %s2156_s19, %s2152_s18 }
   0xc   : > { %p2250_p1 = scmp.eq.s32.totalorder %s1735_s24, 0  ;;  %p2254_p2 = scmp.eq.s32.totalorder %s1735_s24, 1 }
   0xd   : > { %p179_p3 = scmp.eq.s32.totalorder %s1736_s25, 1  ;;  %p1737_p5 = scmp.ge.s32.totalorder %s2172_s23, 1 }
   0xe   : > { %s3345_s27 = scalar_select %p2254_p2, 1, 0 }
   0xf   : > { %p2260_p4 = por %p2250_p1, %p65_p0  ;;  %p2265_p6 = por %p179_p3, %p65_p0 }
  0x10   : > { %p214_p7 = scmp.lt.s32.totalorder %s2172_s23, 3  ;;  %s2174_s6 = smov [#allocation5]  }
  0x11   : > { %s3346_s28 = scalar_select %p2260_p4, 1, 0 }
  0x12   : > { %s3347_s29 = scalar_select %p2265_p6, 1, 0 }
  0x13   : > { %p2270_p8 = pnand %p1737_p5, %p214_p7  ;;  %s243_s7 = sshll.u32 %s2174_s6, 4  ;;  %s244_s7 = int_to_ptr.vmem [resolvable:$true] %s243_s7 }
  0x14   : > { %s36_s9 = sadd.s32 1, %s2168_s22  ;;  %s2017_s10 = scalar_lea.vmem %s244_s7, 512 }
  0x15   : > { %p1929_p9 = pneg %p2270_p8  ;;  %p2018_p13 = scmp.ne.s32.totalorder %s244_s7, %s2017_s10 }
  0x16   : > { %p2025_p5 = scmp.lt.s32.totalorder %s244_s7, %s244_s7  ;;  %p2026_p7 = scmp.lt.s32.totalorder %s2017_s10, %s2017_s10 }
  0x17   : > { %p2279_p11 = pnand %p1929_p9, %p2250_p1 }
  0x18   : > { %p2027_p6 = por %p2026_p7, %p2025_p5 }
  0x19   : > { %p2008_p12 = pneg %p2279_p11 }
  0x1b   : > { %p2020_p0 = pnand %p2018_p13, %p2008_p12 }
  0x1d   : > { %p2021_p3 = pneg %p2020_p0 }
  0x1f   : > { %p2028_p4 = pnand %p2027_p6, %p2021_p3 }
  0x21   : > { %2031 = shalt.err (!%p2028_p4)
}
  0x22   : > { %s2175_s11 = smov 128   ;;  %s2176_s12 = smov 8  }
  0x23   : > { %s3350_s3 = sld [smem:[#allocation16_spill]]  ;;  %p37_p6 = scmp.ge.s32.totalorder %s36_s9, 2 }
  0x24   : > { %s52_s15 = sadd.s32 1, %s2160_s20  ;;  %p59_p4 = scmp.ne.s32.totalorder %s2160_s20, %s2156_s19 }
  0x25   : > { %p60_p9 = scmp.eq.s32.totalorder %s2172_s23, 0  ;;  %s3429_s9 = smov (%p37_p6, %s36_s9), 0 }
  0x26   : > { %3351 = sst [smem:[#allocation15_spill]] %s3429_s9  ;;  %p2303_p13 = por %p2254_p2, %p59_p4 }
  0x27   : > { %p2297_p12 = por %p60_p9, %p59_p4  ;;  %s47_s24 = ssub.s32 %s2168_s22, %s3429_s9 }
  0x28   : > { %p1942_p0 = scmp.lt.s32.totalorder %s2172_s23, 2  ;;  %s257_s25 = sand.u32 1, %s2160_s20  }
  0x29   : > { %1932 = dma.hbm_to_vmem [thread:$0]  (!%p2279_p11), %s3350_s3, 512, %s244_s7, [#allocation6], %s2175_s11, %s2175_s11, %s2176_s12  }
  0x2a   : > { %p50_p11 = scmp.eq.s32.totalorder %s47_s24, 0  ;;  %s1742_s6 = sshll.u32 %s257_s25, 5 }
  0x2b   : > { %s1915_s8 = sshll.u32 %s2168_s22, 9  ;;  %s261_s13 = scalar_lea.vmem [#allocation2], %s1742_s6 }
  0x2c   : > { %s2312_s7 = scalar_select %p50_p11, %s2160_s20, %s52_s15  }
  0x2d   : > { %s268_s12 = scalar_lea.hbm %s3331_s0, %s1915_s8  ;;  %s269_s14 = sshll.u32 %s261_s13, 4  ;;  %s270_s14 = int_to_ptr.vmem [resolvable:$true] %s269_s14 }
  0x2e   : > { %p2320_p3 = pnand %p1942_p0, %p2297_p12  ;;  %s258_s9 = scalar_lea.sflag [#allocation3], %s257_s25 }
  0x2f   : > { %s2045_s24 = scalar_lea.vmem %s270_s14, 512  ;;  %s2177_s15 = smov [#allocation2]  }
  0x30   : > { %p2034_p5 = pneg %p2320_p3  ;;  %p2046_p7 = scmp.ne.s32.totalorder %s270_s14, %s2045_s24 }
  0x31   : > { %s2050_s22 = sshll.u32 %s2177_s15, 4  ;;  %s2051_s22 = int_to_ptr.vmem [resolvable:$false] %s2050_s22 }
  0x32   : > { %p2048_p6 = pnand %p2046_p7, %p2034_p5  ;;  %s2052_s8 = scalar_lea.vmem %s2051_s22, 1024 }
  0x33   : > { %p2053_p9 = scmp.lt.s32.totalorder %s270_s14, %s2051_s22  ;;  %p2054_p11 = scmp.lt.s32.totalorder %s2052_s8, %s2045_s24 }
  0x34   : > { %p2049_p4 = pneg %p2048_p6 }
  0x35   : > { %p2055_p10 = por %p2054_p11, %p2053_p9 }
  0x37   : > { %p2056_p2 = pnand %p2055_p10, %p2049_p4 }
  0x39   : > { %2059 = shalt.err (!%p2056_p2)
}
  0x3a   : > { %s2178_s16 = smov 16   ;;  %s2179_s6 = smov 1  }
  0x3b   : > { %1936 = dma.hbm_to_vmem [thread:$0]  (!%p2320_p3), %s268_s12, 512, %s270_s14, %s258_s9, %s2178_s16, %s2178_s16, %s2179_s6  }
  0x3c   : > { %281 = sbr.rel (%p2270_p8) target bundleno = 1025 (0x401), region = 36  ;;  %s2331_s25 = sand.u32 (!%p2270_p8), 1, %s2156_s19  }
  0x3d   : > { %s1746_s10 = sshll.u32 (!%p2270_p8), %s2331_s25, 5  ;;  %s284_s22 = scalar_lea.sflag (!%p2270_p8), [#allocation3], %s2331_s25 }
  0x3e   : > { %s2335_s11 = scalar_lea.vmem (!%p2270_p8), [#allocation2], %s1746_s10  ;;  %p3355_p10 = scmp.ne.s32.totalorder (!%p2270_p8), %s3346_s28, 0 }
  0x41   : > { %2135 = dma.done.wait (%p3355_p10), %s284_s22, 512  }
  0x42   : > { %2137 = vsyncadd (%p3355_p10), %s284_s22, 4294966784 }
  0x43   : > { %2139 = dma.done.wait (%p2250_p1), [#allocation6], 512  }
  0x44   : > { %2141 = vsyncadd (%p2250_p1), [#allocation6], 4294966784  ;;  %s1748_s3 = sshll.u32 %s2331_s25, 8  ;;  %p1749_p2 = scmp.ne.s32.totalorder %s2164_s21, 0 }
  0x45   : > { %s2346_s30 = scalar_lea.vmem [#allocation7], %s1748_s3 }
  0x46   : > { %339 = sbr.rel (%p1749_p2) target bundleno = 78 (0x4e), region = 48 }
  0x4b   : > { %v340_v0 = vld [vmem:[#allocation5] sm:$0xff]  ;;  %v341_v1 = vld [vmem:[#allocation5 + $0x8] sm:$0xff]  ;;  %v342_v2 = vld [vmem:[#allocation5 + $0x10] sm:$0xff] }
  0x4c   : > { %344 = vst [vmem:[#allocation8] sm:$0xff] %v340_v0  ;;  %345 = vst [vmem:[#allocation8 + $0x8] sm:$0xff] %v341_v1  ;;  %v343_v3 = vld [vmem:[#allocation5 + $0x18] sm:$0xff] }
  0x4d   : > { %346 = vst [vmem:[#allocation8 + $0x10] sm:$0xff] %v342_v2  ;;  %347 = vst [vmem:[#allocation8 + $0x18] sm:$0xff] %v343_v3 }
  0x4e PF: > { %v348_v4 = vld [vmem:[%s3332_s1] sm:$0xff]  ;;  %v2180_v5 = vmov 0   ;;  %v2181_v34 = vmov 0.0   ;;  %p357_p1 = scmp.lt.s32.totalorder %s2164_s21, 1  ;;  %s1916_s14 = sshll.u32 %s2164_s21, 12 }
  0x4f   : > { %2005 = vset.pattern.permute.xlu0 %v2180_v5  ;;  %v349_v6 = vld [vmem:[%s3333_s2] sm:$0xff]  ;;  %s1573_s24 = sshll.u32 %s2346_s30, 4  ;;  %s2182_s15 = smov [#allocation8]   ;;  %s3251_s24 = int_to_ptr.vmem [resolvable:$true] %s1573_s24 }
  0x50   : > { %363 = vperm.xlu0 %2005, %v348_v4   ;;  %v1750_v9 = vld [vmem:[%s2335_s11] ss:$0 sm:$0xff]  ;;  %v1754_v30 = vld [vmem:[%s2335_s11 + $0x1] ss:$0 sm:$0xff]  ;;  %v1759_v55 = vld [vmem:[%s2335_s11 + $0x2] ss:$0 sm:$0xff]  ;;  %s3249_s10 = scalar_lea.hbm %s3335_s4, %s1916_s14 }
  0x51   : > { %s672_s13 = scalar_select %p357_p1, 1, 0 }
  0x52   : > { %s1589_s8 = sshll.u32 %s2182_s15, 4  ;;  %s1558_s21 = scalar_lea.sflag [#allocation4], %s2331_s25  ;;  %s3263_s8 = int_to_ptr.vmem [resolvable:$true] %s1589_s8 }
  0x53   : > { %v352_v7 = vld [vmem:[#allocation8 + $0x8] sm:$0xff]  ;;  %v350_v14 = vld [vmem:[#allocation8] sm:$0xff]  ;;  %s2060_s22 = scalar_lea.vmem %s3251_s24, 4096 }
  0x54   : > { %383 = vperm.xlu0 %2005, %v349_v6   ;;  %v354_v8 = vld [vmem:[#allocation8 + $0x10] sm:$0xff]  ;;  %v359_v10 = vmul.f32 0.8, %v352_v7  ;;  %v373_v16 = vmul.f32 0.95, %v350_v14  ;;  %v356_v20 = vld [vmem:[#allocation8 + $0x18] sm:$0xff]  ;;  %p2061_p8 = scmp.ne.s32.totalorder %s3251_s24, %s2060_s22 }
  0x55   : > { %v360_v12 = vmul.f32 0.98, %v354_v8  ;;  %v379_v22 = vmul.f32 0.99, %v356_v20 }
  0x56   : > { %p2062_p12 = pnand %p2061_p8, %p2303_p13 }
  0x57   : > { %v392_v28 = vadd.f32 -0.6, %v360_v12 }
  0x58   : > { %p2063_p0 = pneg %p2062_p12 }
  0xcb   : > { %v2356_v11 = vpop.permute.xlu0 %363 }
  0xcc   : > { %v372_v13 = vmul.f32 %v1750_v9, %v2356_v11  ;;  %v410_v37 = vmul.f32 %v1754_v30, %v2356_v11  ;;  %v444_v61 = vmul.f32 %v1759_v55, %v2356_v11 }
  0xce   : > { %v374_v15 = vadd.f32 %v372_v13, %v359_v10 }
  0xcf   : > { %v2359_v24 = vpop.permute.xlu0 %383 }
  0xd0   : > { %v375_v17 = vadd.f32 %v374_v15, %v360_v12 }
  0xd2   : > { %v376_v18 = vmul.f32 0.001, %v375_v17 }
  0xd4   : > { %v377_v19 = vadd.f32 %v376_v18, %v373_v16  ;;  %v1764_v16 = vld [vmem:[%s2335_s11 + $0x3] ss:$0 sm:$0xff] }
  0xd6   : > { %v378_v21 = vadd.f32 -0.0035, %v377_v19 }
  0xd8   : > { %v1751_v23 = vadd.f32 0.07, %v378_v21 }
  0xda   : > { %v386_v25 = vmul.f32 %v1751_v23, %v2359_v24 }
  0xdc   : > { %v387_v26 = vadd.f32 %v386_v25, %v379_v22  ;;  %v478_v22 = vmul.f32 %v1764_v16, %v2356_v11 }
  0xde   : > { %v388_v27 = vadd.f32 -0.0005, %v387_v26 }
  0xe0   : > { %v389_v29 = vsub.f32 %v378_v21, %v388_v27  ;;  %v394_v44 = vmax.f32 %v388_v27, -0.06 }
  0xe2   : > { %vm2363_vm0 = vcmp.gt.f32.partialorder %v389_v29, 0.0 }
  0xe3   : > { %v391_v32 = vsel %vm2363_vm0, 10.0, %v359_v10  ;;  %v393_v33 = vsel %vm2363_vm0, %v392_v28, %v360_v12  ;;  %v1752_v35 = vsel %vm2363_vm0, 1.0, %v2181_v34  ;;  %v396_v40 = vsel %vm2363_vm0, -0.07, %v378_v21 }
  0xe4   : > { %v402_v36 = vmul.f32 0.8, %v391_v32  ;;  %399 = vst [vmem:[%s2346_s30] sm:$0xff] %v1752_v35  ;;  %v403_v38 = vmul.f32 0.98, %v393_v33  ;;  %v411_v42 = vmul.f32 0.95, %v396_v40  ;;  %v395_v47 = vsel %vm2363_vm0, %v394_v44, %v388_v27 }
  0xe5   : > { %v417_v49 = vmul.f32 0.99, %v395_v47 }
  0xe6   : > { %v412_v39 = vadd.f32 %v410_v37, %v402_v36  ;;  %v425_v54 = vadd.f32 -0.6, %v403_v38 }
  0xe8   : > { %v413_v41 = vadd.f32 %v412_v39, %v403_v38 }
  0xea   : > { %v414_v43 = vmul.f32 0.001, %v413_v41 }
  0xec   : > { %v415_v45 = vadd.f32 %v414_v43, %v411_v42  ;;  %v1769_v42 = vld [vmem:[%s2335_s11 + $0x4] ss:$0 sm:$0xff] }
  0xee   : > { %v416_v46 = vadd.f32 -0.0035, %v415_v45 }
  0xf0   : > { %v1755_v48 = vadd.f32 0.07, %v416_v46 }
  0xf2   : > { %v419_v50 = vmul.f32 %v1755_v48, %v2359_v24  ;;  %v512_v48 = vmul.f32 %v1769_v42, %v2356_v11 }
  0xf4   : > { %v420_v51 = vadd.f32 %v419_v50, %v417_v49 }
  0xf6   : > { %v421_v52 = vadd.f32 -0.0005, %v420_v51 }
  0xf8   : > { %v422_v53 = vsub.f32 %v416_v46, %v421_v52  ;;  %v427_v4 = vmax.f32 %v421_v52, -0.06 }
  0xfa   : > { %vm2382_vm1 = vcmp.gt.f32.partialorder %v422_v53, 0.0 }
  0xfb   : > { %v424_v57 = vsel %vm2382_vm1, 10.0, %v402_v36  ;;  %v426_v58 = vsel %vm2382_vm1, %v425_v54, %v403_v38  ;;  %v1756_v59 = vsel %vm2382_vm1, 1.0, %v2181_v34  ;;  %v429_v0 = vsel %vm2382_vm1, -0.07, %v416_v46 }
  0xfc   : > { %v436_v60 = vmul.f32 0.8, %v424_v57  ;;  %1757 = vst [vmem:[%s2346_s30 + $0x8] sm:$0xff] %v1756_v59  ;;  %v437_v62 = vmul.f32 0.98, %v426_v58  ;;  %v428_v7 = vsel %vm2382_vm1, %v427_v4, %v421_v52 }
  0xfd   : > { %v445_v2 = vmul.f32 0.95, %v429_v0  ;;  %v451_v9 = vmul.f32 0.99, %v428_v7 }
  0xfe   : > { %v446_v63 = vadd.f32 %v444_v61, %v436_v60  ;;  %v459_v15 = vadd.f32 -0.6, %v437_v62 }
 0x100   : > { %v447_v1 = vadd.f32 %v446_v63, %v437_v62 }
 0x102   : > { %v448_v3 = vmul.f32 0.001, %v447_v1 }
 0x104   : > { %v449_v5 = vadd.f32 %v448_v3, %v445_v2  ;;  %v1774_v2 = vld [vmem:[%s2335_s11 + $0x5] ss:$0 sm:$0xff] }
 0x106   : > { %v450_v6 = vadd.f32 -0.0035, %v449_v5 }
 0x108   : > { %v1760_v8 = vadd.f32 0.07, %v450_v6 }
 0x10a   : > { %v453_v10 = vmul.f32 %v1760_v8, %v2359_v24  ;;  %v546_v8 = vmul.f32 %v1774_v2, %v2356_v11 }
 0x10c   : > { %v454_v12 = vadd.f32 %v453_v10, %v451_v9 }
 0x10e   : > { %v455_v13 = vadd.f32 -0.0005, %v454_v12 }
 0x110   : > { %v456_v14 = vsub.f32 %v450_v6, %v455_v13  ;;  %v461_v30 = vmax.f32 %v455_v13, -0.06 }
 0x112   : > { %vm2401_vm2 = vcmp.gt.f32.partialorder %v456_v14, 0.0 }
 0x113   : > { %v458_v18 = vsel %vm2401_vm2, 10.0, %v436_v60  ;;  %v460_v19 = vsel %vm2401_vm2, %v459_v15, %v437_v62  ;;  %v1761_v20 = vsel %vm2401_vm2, 1.0, %v2181_v34  ;;  %v463_v26 = vsel %vm2401_vm2, -0.07, %v450_v6 }
 0x114   : > { %v470_v21 = vmul.f32 0.8, %v458_v18  ;;  %1762 = vst [vmem:[%s2346_s30 + $0x10] sm:$0xff] %v1761_v20  ;;  %v471_v23 = vmul.f32 0.98, %v460_v19  ;;  %v462_v33 = vsel %vm2401_vm2, %v461_v30, %v455_v13 }
 0x115   : > { %v479_v28 = vmul.f32 0.95, %v463_v26  ;;  %v485_v36 = vmul.f32 0.99, %v462_v33 }
 0x116   : > { %v480_v25 = vadd.f32 %v478_v22, %v470_v21  ;;  %v493_v41 = vadd.f32 -0.6, %v471_v23 }
 0x118   : > { %v481_v27 = vadd.f32 %v480_v25, %v471_v23 }
 0x11a   : > { %v482_v29 = vmul.f32 0.001, %v481_v27 }
 0x11c   : > { %v483_v31 = vadd.f32 %v482_v29, %v479_v28  ;;  %v1779_v28 = vld [vmem:[%s2335_s11 + $0x6] ss:$0 sm:$0xff] }
 0x11e   : > { %v484_v32 = vadd.f32 -0.0035, %v483_v31 }
 0x120   : > { %v1765_v35 = vadd.f32 0.07, %v484_v32 }
 0x122   : > { %v487_v37 = vmul.f32 %v1765_v35, %v2359_v24  ;;  %v580_v35 = vmul.f32 %v1779_v28, %v2356_v11 }
 0x124   : > { %v488_v38 = vadd.f32 %v487_v37, %v485_v36 }
 0x126   : > { %v489_v39 = vadd.f32 -0.0005, %v488_v38 }
 0x128   : > { %v490_v40 = vsub.f32 %v484_v32, %v489_v39  ;;  %v495_v55 = vmax.f32 %v489_v39, -0.06 }
 0x12a   : > { %vm2420_vm3 = vcmp.gt.f32.partialorder %v490_v40, 0.0 }
 0x12b   : > { %v492_v44 = vsel %vm2420_vm3, 10.0, %v470_v21  ;;  %v494_v45 = vsel %vm2420_vm3, %v493_v41, %v471_v23  ;;  %v1766_v46 = vsel %vm2420_vm3, 1.0, %v2181_v34  ;;  %v497_v51 = vsel %vm2420_vm3, -0.07, %v484_v32 }
 0x12c   : > { %v504_v47 = vmul.f32 0.8, %v492_v44  ;;  %1767 = vst [vmem:[%s2346_s30 + $0x18] sm:$0xff] %v1766_v46  ;;  %v505_v49 = vmul.f32 0.98, %v494_v45  ;;  %v496_v58 = vsel %vm2420_vm3, %v495_v55, %v489_v39 }
 0x12d   : > { %v513_v53 = vmul.f32 0.95, %v497_v51  ;;  %v519_v60 = vmul.f32 0.99, %v496_v58 }
 0x12e   : > { %v514_v50 = vadd.f32 %v512_v48, %v504_v47  ;;  %v527_v1 = vadd.f32 -0.6, %v505_v49 }
 0x130   : > { %v515_v52 = vadd.f32 %v514_v50, %v505_v49 }
 0x132   : > { %v516_v54 = vmul.f32 0.001, %v515_v52 }
 0x134   : > { %v517_v56 = vadd.f32 %v516_v54, %v513_v53  ;;  %v1784_v53 = vld [vmem:[%s2335_s11 + $0x7] ss:$0 sm:$0xff] }
 0x136   : > { %v518_v57 = vadd.f32 -0.0035, %v517_v56 }
 0x138   : > { %v1770_v59 = vadd.f32 0.07, %v518_v57 }
 0x13a   : > { %v521_v61 = vmul.f32 %v1770_v59, %v2359_v24  ;;  %v614_v59 = vmul.f32 %v1784_v53, %v2356_v11 }
 0x13c   : > { %v522_v62 = vadd.f32 %v521_v61, %v519_v60 }
 0x13e   : > { %v523_v63 = vadd.f32 -0.0005, %v522_v62 }
 0x140   : > { %v524_v0 = vsub.f32 %v518_v57, %v523_v63  ;;  %v529_v16 = vmax.f32 %v523_v63, -0.06 }
 0x142   : > { %vm2439_vm4 = vcmp.gt.f32.partialorder %v524_v0, 0.0 }
 0x143   : > { %v526_v4 = vsel %vm2439_vm4, 10.0, %v504_v47  ;;  %v528_v5 = vsel %vm2439_vm4, %v527_v1, %v505_v49  ;;  %v1771_v6 = vsel %vm2439_vm4, 1.0, %v2181_v34  ;;  %v531_v12 = vsel %vm2439_vm4, -0.07, %v518_v57 }
 0x144   : > { %v538_v7 = vmul.f32 0.8, %v526_v4  ;;  %1772 = vst [vmem:[%s2346_s30 + $0x20] sm:$0xff] %v1771_v6  ;;  %v539_v9 = vmul.f32 0.98, %v528_v5  ;;  %v530_v19 = vsel %vm2439_vm4, %v529_v16, %v523_v63 }
 0x145   : > { %v547_v14 = vmul.f32 0.95, %v531_v12  ;;  %v553_v21 = vmul.f32 0.99, %v530_v19 }
 0x146   : > { %v548_v10 = vadd.f32 %v546_v8, %v538_v7  ;;  %v561_v27 = vadd.f32 -0.6, %v539_v9 }
 0x148   : > { %v549_v13 = vadd.f32 %v548_v10, %v539_v9 }
 0x14a   : > { %v550_v15 = vmul.f32 0.001, %v549_v13 }
 0x14c   : > { %v551_v17 = vadd.f32 %v550_v15, %v547_v14  ;;  %v1789_v14 = vld [vmem:[%s2335_s11 + $0x8] ss:$0 sm:$0xff] }
 0x14e   : > { %v552_v18 = vadd.f32 -0.0035, %v551_v17 }
 0x150   : > { %v1775_v20 = vadd.f32 0.07, %v552_v18 }
 0x152   : > { %v555_v22 = vmul.f32 %v1775_v20, %v2359_v24  ;;  %v648_v20 = vmul.f32 %v1789_v14, %v2356_v11 }
 0x154   : > { %v556_v23 = vadd.f32 %v555_v22, %v553_v21 }
 0x156   : > { %v557_v25 = vadd.f32 -0.0005, %v556_v23 }
 0x158   : > { %v558_v26 = vsub.f32 %v552_v18, %v557_v25  ;;  %v563_v42 = vmax.f32 %v557_v25, -0.06 }
 0x15a   : > { %vm2458_vm5 = vcmp.gt.f32.partialorder %v558_v26, 0.0 }
 0x15b   : > { %v560_v30 = vsel %vm2458_vm5, 10.0, %v538_v7  ;;  %v562_v31 = vsel %vm2458_vm5, %v561_v27, %v539_v9  ;;  %v1776_v32 = vsel %vm2458_vm5, 1.0, %v2181_v34  ;;  %v565_v38 = vsel %vm2458_vm5, -0.07, %v552_v18 }
 0x15c   : > { %v572_v33 = vmul.f32 0.8, %v560_v30  ;;  %1777 = vst [vmem:[%s2346_s30 + $0x28] sm:$0xff] %v1776_v32  ;;  %v573_v36 = vmul.f32 0.98, %v562_v31  ;;  %v564_v45 = vsel %vm2458_vm5, %v563_v42, %v557_v25 }
 0x15d   : > { %v581_v40 = vmul.f32 0.95, %v565_v38  ;;  %v587_v47 = vmul.f32 0.99, %v564_v45  ;;  %v673_v38 = vstv %s672_s13 }
 0x15e   : > { %v582_v37 = vadd.f32 %v580_v35, %v572_v33  ;;  %v595_v52 = vadd.f32 -0.6, %v573_v36  ;;  %vm2527_vm8 = vcmp.eq.s32.totalorder %v673_v38, 1 }
 0x160   : > { %v583_v39 = vadd.f32 %v582_v37, %v573_v36 }
 0x162   : > { %v584_v41 = vmul.f32 0.001, %v583_v39 }
 0x164   : > { %v585_v43 = vadd.f32 %v584_v41, %v581_v40 }
 0x166   : > { %v586_v44 = vadd.f32 -0.0035, %v585_v43  ;;  %v1794_v43 = vld [vmem:[%s2335_s11 + $0x9] ss:$0 sm:$0xff] }
 0x168   : > { %v1780_v46 = vadd.f32 0.07, %v586_v44 }
 0x16a   : > { %v589_v48 = vmul.f32 %v1780_v46, %v2359_v24 }
 0x16c   : > { %v590_v49 = vadd.f32 %v589_v48, %v587_v47 }
 0x16e   : > { %v591_v50 = vadd.f32 -0.0005, %v590_v49 }
 0x170   : > { %v592_v51 = vsub.f32 %v586_v44, %v591_v50  ;;  %v597_v2 = vmax.f32 %v591_v50, -0.06 }
 0x172   : > { %vm2477_vm6 = vcmp.gt.f32.partialorder %v592_v51, 0.0  ;;  %v689_v51 = vmul.f32 %v1794_v43, %v2356_v11  ;;  %v1804_v43 = vld [vmem:[%s2335_s11 + $0xb] ss:$0 sm:$0xff] }
 0x173   : > { %v594_v55 = vsel %vm2477_vm6, 10.0, %v572_v33  ;;  %v596_v56 = vsel %vm2477_vm6, %v595_v52, %v573_v36  ;;  %v1781_v57 = vsel %vm2477_vm6, 1.0, %v2181_v34  ;;  %v599_v62 = vsel %vm2477_vm6, -0.07, %v586_v44 }
 0x174   : > { %v606_v58 = vmul.f32 0.8, %v594_v55  ;;  %1782 = vst [vmem:[%s2346_s30 + $0x30] sm:$0xff] %v1781_v57  ;;  %v607_v60 = vmul.f32 0.98, %v596_v56  ;;  %v598_v5 = vsel %vm2477_vm6, %v597_v2, %v591_v50 }
 0x175   : > { %v615_v0 = vmul.f32 0.95, %v599_v62  ;;  %v621_v7 = vmul.f32 0.99, %v598_v5 }
 0x176   : > { %v616_v61 = vadd.f32 %v614_v59, %v606_v58  ;;  %v629_v13 = vadd.f32 -0.6, %v607_v60 }
 0x178   : > { %v617_v63 = vadd.f32 %v616_v61, %v607_v60 }
 0x17a   : > { %v618_v1 = vmul.f32 0.001, %v617_v63 }
 0x17c   : > { %v619_v3 = vadd.f32 %v618_v1, %v615_v0 }
 0x17e   : > { %v620_v4 = vadd.f32 -0.0035, %v619_v3 }
 0x180   : > { %v1785_v6 = vadd.f32 0.07, %v620_v4 }
 0x182   : > { %v623_v8 = vmul.f32 %v1785_v6, %v2359_v24 }
 0x184   : > { %v624_v9 = vadd.f32 %v623_v8, %v621_v7  ;;  %v1799_v7 = vld [vmem:[%s2335_s11 + $0xa] ss:$0 sm:$0xff] }
 0x186   : > { %v625_v10 = vadd.f32 -0.0005, %v624_v9 }
 0x188   : > { %v626_v12 = vsub.f32 %v620_v4, %v625_v10  ;;  %v631_v28 = vmax.f32 %v625_v10, -0.06 }
 0x18a   : > { %vm2496_vm7 = vcmp.gt.f32.partialorder %v626_v12, 0.0 }
 0x18b   : > { %v2502_v16 = vsel %vm2496_vm7, 10.0, %v606_v58  ;;  %v2506_v17 = vsel %vm2496_vm7, %v629_v13, %v607_v60  ;;  %v1786_v18 = vsel %vm2496_vm7, 1.0, %v2181_v34  ;;  %v2517_v23 = vsel %vm2496_vm7, -0.07, %v620_v4 }
 0x18c   : > { %v640_v19 = vmul.f32 0.8, %v2502_v16  ;;  %1787 = vst [vmem:[%s2346_s30 + $0x38] sm:$0xff] %v1786_v18  ;;  %v641_v21 = vmul.f32 0.98, %v2506_v17  ;;  %v2523_v31 = vsel %vm2496_vm7, %v631_v28, %v625_v10  ;;  %v727_v18 = vmul.f32 %v1799_v7, %v2356_v11 }
 0x18d   : > { %v649_v26 = vmul.f32 0.95, %v2517_v23  ;;  %v655_v33 = vmul.f32 0.99, %v2523_v31  ;;  %v1809_v7 = vld [vmem:[%s2335_s11 + $0xc] ss:$0 sm:$0xff] }
 0x18e   : > { %v650_v22 = vadd.f32 %v648_v20, %v640_v19  ;;  %v663_v40 = vadd.f32 -0.6, %v641_v21 }
 0x190   : > { %v651_v25 = vadd.f32 %v650_v22, %v641_v21 }
 0x192   : > { %v652_v27 = vmul.f32 0.001, %v651_v25 }
 0x194   : > { %v653_v29 = vadd.f32 %v652_v27, %v649_v26 }
 0x196   : > { %v654_v30 = vadd.f32 -0.0035, %v653_v29 }
 0x198   : > { %v1790_v32 = vadd.f32 0.07, %v654_v30 }
 0x19a   : > { %v657_v35 = vmul.f32 %v1790_v32, %v2359_v24 }
 0x19c   : > { %v658_v36 = vadd.f32 %v657_v35, %v655_v33 }
 0x19e   : > { %v659_v37 = vadd.f32 -0.0005, %v658_v36 }
 0x1a0   : > { %v660_v39 = vsub.f32 %v654_v30, %v659_v37  ;;  %v665_v55 = vmax.f32 %v659_v37, -0.06 }
 0x1a2   : > { %vm2531_vm9 = vcmp.gt.f32.partialorder %v660_v39, 0.0 }
 0x1a3   : > { %v662_v44 = vsel %vm2531_vm9, 10.0, %v640_v19  ;;  %v664_v45 = vsel %vm2531_vm9, %v663_v40, %v641_v21  ;;  %v1791_v46 = vsel %vm2531_vm9, 1.0, %v2181_v34  ;;  %v667_v49 = vsel %vm2531_vm9, -0.07, %v654_v30 }
 0x1a4   : > { %v676_v47 = vsel %vm2527_vm8, %v662_v44, %v2502_v16  ;;  %v677_v48 = vsel %vm2527_vm8, %v664_v45, %v2506_v17  ;;  %1792 = vst [vmem:[%s2346_s30 + $0x40] sm:$0xff] %v1791_v46  ;;  %v675_v54 = vsel %vm2527_vm8, %v667_v49, %v2517_v23  ;;  %v666_v59 = vsel %vm2531_vm9, %v665_v55, %v659_v37 }
 0x1a5   : > { %v681_v50 = vmul.f32 0.8, %v676_v47  ;;  %v682_v52 = vmul.f32 0.98, %v677_v48  ;;  %v690_v57 = vmul.f32 0.95, %v675_v54  ;;  %v678_v62 = vsel %vm2527_vm8, %v666_v59, %v2523_v31 }
 0x1a6   : > { %v696_v0 = vmul.f32 0.99, %v678_v62 }
 0x1a7   : > { %v691_v53 = vadd.f32 %v689_v51, %v681_v50  ;;  %v704_v5 = vadd.f32 -0.6, %v682_v52  ;;  %v765_v51 = vmul.f32 %v1804_v43, %v2356_v11  ;;  %v1814_v43 = vld [vmem:[%s2335_s11 + $0xd] ss:$0 sm:$0xff] }
 0x1a9   : > { %v692_v56 = vadd.f32 %v691_v53, %v682_v52 }
 0x1ab   : > { %v693_v58 = vmul.f32 0.001, %v692_v56 }
 0x1ad   : > { %v694_v60 = vadd.f32 %v693_v58, %v690_v57 }
 0x1af   : > { %v695_v61 = vadd.f32 -0.0035, %v694_v60 }
 0x1b1   : > { %v1795_v63 = vadd.f32 0.07, %v695_v61 }
 0x1b3   : > { %v698_v1 = vmul.f32 %v1795_v63, %v2359_v24 }
 0x1b5   : > { %v699_v2 = vadd.f32 %v698_v1, %v696_v0 }
 0x1b7   : > { %v700_v3 = vadd.f32 -0.0005, %v699_v2 }
 0x1b9   : > { %v701_v4 = vsub.f32 %v695_v61, %v700_v3  ;;  %v706_v22 = vmax.f32 %v700_v3, -0.06 }
 0x1bb   : > { %vm2562_vm10 = vcmp.gt.f32.partialorder %v701_v4, 0.0 }
 0x1bc   : > { %v703_v8 = vsel %vm2562_vm10, 10.0, %v681_v50  ;;  %v705_v9 = vsel %vm2562_vm10, %v704_v5, %v682_v52  ;;  %v1796_v10 = vsel %vm2562_vm10, 1.0, %v2181_v34  ;;  %v708_v14 = vsel %vm2562_vm10, -0.07, %v695_v61 }
 0x1bd   : > { %v714_v12 = vsel %vm2527_vm8, %v703_v8, %v2502_v16  ;;  %v715_v13 = vsel %vm2527_vm8, %v705_v9, %v2506_v17  ;;  %1797 = vst [vmem:[%s2346_s30 + $0x48] sm:$0xff] %v1796_v10  ;;  %v713_v21 = vsel %vm2527_vm8, %v708_v14, %v2517_v23  ;;  %v707_v28 = vsel %vm2562_vm10, %v706_v22, %v700_v3 }
 0x1be   : > { %v719_v15 = vmul.f32 0.8, %v714_v12  ;;  %v720_v19 = vmul.f32 0.98, %v715_v13  ;;  %v728_v26 = vmul.f32 0.95, %v713_v21  ;;  %v716_v32 = vsel %vm2527_vm8, %v707_v28, %v2523_v31 }
 0x1bf   : > { %v734_v35 = vmul.f32 0.99, %v716_v32 }
 0x1c0   : > { %v729_v20 = vadd.f32 %v727_v18, %v719_v15  ;;  %v742_v40 = vadd.f32 -0.6, %v720_v19  ;;  %v803_v18 = vmul.f32 %v1809_v7, %v2356_v11  ;;  %v1819_v7 = vld [vmem:[%s2335_s11 + $0xe] ss:$0 sm:$0xff] }
 0x1c2   : > { %v730_v25 = vadd.f32 %v729_v20, %v720_v19 }
 0x1c4   : > { %v731_v27 = vmul.f32 0.001, %v730_v25 }
 0x1c6   : > { %v732_v29 = vadd.f32 %v731_v27, %v728_v26 }
 0x1c8   : > { %v733_v30 = vadd.f32 -0.0035, %v732_v29 }
 0x1ca   : > { %v1800_v33 = vadd.f32 0.07, %v733_v30 }
 0x1cc   : > { %v736_v36 = vmul.f32 %v1800_v33, %v2359_v24 }
 0x1ce   : > { %v737_v37 = vadd.f32 %v736_v36, %v734_v35 }
 0x1d0   : > { %v738_v38 = vadd.f32 -0.0005, %v737_v37 }
 0x1d2   : > { %v739_v39 = vsub.f32 %v733_v30, %v738_v38  ;;  %v744_v55 = vmax.f32 %v738_v38, -0.06 }
 0x1d4   : > { %vm2593_vm11 = vcmp.gt.f32.partialorder %v739_v39, 0.0 }
 0x1d5   : > { %v741_v44 = vsel %vm2593_vm11, 10.0, %v719_v15  ;;  %v743_v45 = vsel %vm2593_vm11, %v742_v40, %v720_v19  ;;  %v1801_v46 = vsel %vm2593_vm11, 1.0, %v2181_v34  ;;  %v746_v49 = vsel %vm2593_vm11, -0.07, %v733_v30 }
 0x1d6   : > { %v752_v47 = vsel %vm2527_vm8, %v741_v44, %v2502_v16  ;;  %v753_v48 = vsel %vm2527_vm8, %v743_v45, %v2506_v17  ;;  %1802 = vst [vmem:[%s2346_s30 + $0x50] sm:$0xff] %v1801_v46  ;;  %v751_v54 = vsel %vm2527_vm8, %v746_v49, %v2517_v23  ;;  %v745_v59 = vsel %vm2593_vm11, %v744_v55, %v738_v38 }
 0x1d7   : > { %v757_v50 = vmul.f32 0.8, %v752_v47  ;;  %v758_v52 = vmul.f32 0.98, %v753_v48  ;;  %v766_v57 = vmul.f32 0.95, %v751_v54  ;;  %v754_v62 = vsel %vm2527_vm8, %v745_v59, %v2523_v31 }
 0x1d8   : > { %v772_v0 = vmul.f32 0.99, %v754_v62 }
 0x1d9   : > { %v767_v53 = vadd.f32 %v765_v51, %v757_v50  ;;  %v780_v5 = vadd.f32 -0.6, %v758_v52  ;;  %v841_v51 = vmul.f32 %v1814_v43, %v2356_v11  ;;  %v1824_v43 = vld [vmem:[%s2335_s11 + $0xf] ss:$0 sm:$0xff] }
 0x1db   : > { %v768_v56 = vadd.f32 %v767_v53, %v758_v52 }
 0x1dd   : > { %v769_v58 = vmul.f32 0.001, %v768_v56 }
 0x1df   : > { %v770_v60 = vadd.f32 %v769_v58, %v766_v57 }
 0x1e1   : > { %v771_v61 = vadd.f32 -0.0035, %v770_v60 }
 0x1e3   : > { %v1805_v63 = vadd.f32 0.07, %v771_v61 }
 0x1e5   : > { %v774_v1 = vmul.f32 %v1805_v63, %v2359_v24 }
 0x1e7   : > { %v775_v2 = vadd.f32 %v774_v1, %v772_v0 }
 0x1e9   : > { %v776_v3 = vadd.f32 -0.0005, %v775_v2 }
 0x1eb   : > { %v777_v4 = vsub.f32 %v771_v61, %v776_v3  ;;  %v782_v22 = vmax.f32 %v776_v3, -0.06 }
 0x1ed   : > { %vm2624_vm12 = vcmp.gt.f32.partialorder %v777_v4, 0.0 }
 0x1ee   : > { %v779_v8 = vsel %vm2624_vm12, 10.0, %v757_v50  ;;  %v781_v9 = vsel %vm2624_vm12, %v780_v5, %v758_v52  ;;  %v1806_v10 = vsel %vm2624_vm12, 1.0, %v2181_v34  ;;  %v784_v14 = vsel %vm2624_vm12, -0.07, %v771_v61 }
 0x1ef   : > { %v790_v12 = vsel %vm2527_vm8, %v779_v8, %v2502_v16  ;;  %v791_v13 = vsel %vm2527_vm8, %v781_v9, %v2506_v17  ;;  %1807 = vst [vmem:[%s2346_s30 + $0x58] sm:$0xff] %v1806_v10  ;;  %v789_v21 = vsel %vm2527_vm8, %v784_v14, %v2517_v23  ;;  %v783_v28 = vsel %vm2624_vm12, %v782_v22, %v776_v3 }
 0x1f0   : > { %v795_v15 = vmul.f32 0.8, %v790_v12  ;;  %v796_v19 = vmul.f32 0.98, %v791_v13  ;;  %v804_v26 = vmul.f32 0.95, %v789_v21  ;;  %v792_v32 = vsel %vm2527_vm8, %v783_v28, %v2523_v31 }
 0x1f1   : > { %v810_v35 = vmul.f32 0.99, %v792_v32 }
 0x1f2   : > { %v805_v20 = vadd.f32 %v803_v18, %v795_v15  ;;  %v818_v40 = vadd.f32 -0.6, %v796_v19  ;;  %v879_v18 = vmul.f32 %v1819_v7, %v2356_v11  ;;  %v1829_v7 = vld [vmem:[%s2335_s11 + $0x10] ss:$0 sm:$0xff] }
 0x1f4   : > { %v806_v25 = vadd.f32 %v805_v20, %v796_v19 }
 0x1f6   : > { %v807_v27 = vmul.f32 0.001, %v806_v25 }
 0x1f8   : > { %v808_v29 = vadd.f32 %v807_v27, %v804_v26 }
 0x1fa   : > { %v809_v30 = vadd.f32 -0.0035, %v808_v29 }
 0x1fc   : > { %v1810_v33 = vadd.f32 0.07, %v809_v30 }
 0x1fe   : > { %v812_v36 = vmul.f32 %v1810_v33, %v2359_v24 }
 0x200   : > { %v813_v37 = vadd.f32 %v812_v36, %v810_v35 }
 0x202   : > { %v814_v38 = vadd.f32 -0.0005, %v813_v37 }
 0x204   : > { %v815_v39 = vsub.f32 %v809_v30, %v814_v38  ;;  %v820_v55 = vmax.f32 %v814_v38, -0.06 }
 0x206   : > { %vm2655_vm13 = vcmp.gt.f32.partialorder %v815_v39, 0.0 }
 0x207   : > { %v817_v44 = vsel %vm2655_vm13, 10.0, %v795_v15  ;;  %v819_v45 = vsel %vm2655_vm13, %v818_v40, %v796_v19  ;;  %v1811_v46 = vsel %vm2655_vm13, 1.0, %v2181_v34  ;;  %v822_v49 = vsel %vm2655_vm13, -0.07, %v809_v30 }
 0x208   : > { %v828_v47 = vsel %vm2527_vm8, %v817_v44, %v2502_v16  ;;  %v829_v48 = vsel %vm2527_vm8, %v819_v45, %v2506_v17  ;;  %1812 = vst [vmem:[%s2346_s30 + $0x60] sm:$0xff] %v1811_v46  ;;  %v827_v54 = vsel %vm2527_vm8, %v822_v49, %v2517_v23  ;;  %v821_v59 = vsel %vm2655_vm13, %v820_v55, %v814_v38 }
 0x209   : > { %v833_v50 = vmul.f32 0.8, %v828_v47  ;;  %v834_v52 = vmul.f32 0.98, %v829_v48  ;;  %v842_v57 = vmul.f32 0.95, %v827_v54  ;;  %v830_v62 = vsel %vm2527_vm8, %v821_v59, %v2523_v31 }
 0x20a   : > { %v848_v0 = vmul.f32 0.99, %v830_v62 }
 0x20b   : > { %v843_v53 = vadd.f32 %v841_v51, %v833_v50  ;;  %v856_v5 = vadd.f32 -0.6, %v834_v52  ;;  %v917_v51 = vmul.f32 %v1824_v43, %v2356_v11  ;;  %v1834_v43 = vld [vmem:[%s2335_s11 + $0x11] ss:$0 sm:$0xff] }
 0x20d   : > { %v844_v56 = vadd.f32 %v843_v53, %v834_v52 }
 0x20f   : > { %v845_v58 = vmul.f32 0.001, %v844_v56 }
 0x211   : > { %v846_v60 = vadd.f32 %v845_v58, %v842_v57 }
 0x213   : > { %v847_v61 = vadd.f32 -0.0035, %v846_v60 }
 0x215   : > { %v1815_v63 = vadd.f32 0.07, %v847_v61 }
 0x217   : > { %v850_v1 = vmul.f32 %v1815_v63, %v2359_v24 }
 0x219   : > { %v851_v2 = vadd.f32 %v850_v1, %v848_v0 }
 0x21b   : > { %v852_v3 = vadd.f32 -0.0005, %v851_v2 }
 0x21d   : > { %v853_v4 = vsub.f32 %v847_v61, %v852_v3  ;;  %v858_v22 = vmax.f32 %v852_v3, -0.06 }
 0x21f   : > { %vm2686_vm14 = vcmp.gt.f32.partialorder %v853_v4, 0.0 }
 0x220   : > { %v855_v8 = vsel %vm2686_vm14, 10.0, %v833_v50  ;;  %v857_v9 = vsel %vm2686_vm14, %v856_v5, %v834_v52  ;;  %v1816_v10 = vsel %vm2686_vm14, 1.0, %v2181_v34  ;;  %v860_v14 = vsel %vm2686_vm14, -0.07, %v847_v61 }
 0x221   : > { %v866_v12 = vsel %vm2527_vm8, %v855_v8, %v2502_v16  ;;  %v867_v13 = vsel %vm2527_vm8, %v857_v9, %v2506_v17  ;;  %1817 = vst [vmem:[%s2346_s30 + $0x68] sm:$0xff] %v1816_v10  ;;  %v865_v21 = vsel %vm2527_vm8, %v860_v14, %v2517_v23  ;;  %v859_v28 = vsel %vm2686_vm14, %v858_v22, %v852_v3 }
 0x222   : > { %v871_v15 = vmul.f32 0.8, %v866_v12  ;;  %v872_v19 = vmul.f32 0.98, %v867_v13  ;;  %v880_v26 = vmul.f32 0.95, %v865_v21  ;;  %v868_v32 = vsel %vm2527_vm8, %v859_v28, %v2523_v31 }
 0x223   : > { %v886_v35 = vmul.f32 0.99, %v868_v32 }
 0x224   : > { %v881_v20 = vadd.f32 %v879_v18, %v871_v15  ;;  %v894_v40 = vadd.f32 -0.6, %v872_v19  ;;  %v955_v18 = vmul.f32 %v1829_v7, %v2356_v11  ;;  %v1839_v7 = vld [vmem:[%s2335_s11 + $0x12] ss:$0 sm:$0xff] }
 0x226   : > { %v882_v25 = vadd.f32 %v881_v20, %v872_v19 }
 0x228   : > { %v883_v27 = vmul.f32 0.001, %v882_v25 }
 0x22a   : > { %v884_v29 = vadd.f32 %v883_v27, %v880_v26 }
 0x22c   : > { %v885_v30 = vadd.f32 -0.0035, %v884_v29 }
 0x22e   : > { %v1820_v33 = vadd.f32 0.07, %v885_v30 }
 0x230   : > { %v888_v36 = vmul.f32 %v1820_v33, %v2359_v24 }
 0x232   : > { %v889_v37 = vadd.f32 %v888_v36, %v886_v35 }
 0x234   : > { %v890_v38 = vadd.f32 -0.0005, %v889_v37 }
 0x236   : > { %v891_v39 = vsub.f32 %v885_v30, %v890_v38  ;;  %v896_v55 = vmax.f32 %v890_v38, -0.06 }
 0x238   : > { %vm2717_vm15 = vcmp.gt.f32.partialorder %v891_v39, 0.0 }
 0x239   : > { %v893_v44 = vsel %vm2717_vm15, 10.0, %v871_v15  ;;  %v895_v45 = vsel %vm2717_vm15, %v894_v40, %v872_v19  ;;  %v1821_v46 = vsel %vm2717_vm15, 1.0, %v2181_v34  ;;  %v898_v49 = vsel %vm2717_vm15, -0.07, %v885_v30 }
 0x23a   : > { %v904_v47 = vsel %vm2527_vm8, %v893_v44, %v2502_v16  ;;  %v905_v48 = vsel %vm2527_vm8, %v895_v45, %v2506_v17  ;;  %1822 = vst [vmem:[%s2346_s30 + $0x70] sm:$0xff] %v1821_v46  ;;  %v903_v54 = vsel %vm2527_vm8, %v898_v49, %v2517_v23  ;;  %v897_v59 = vsel %vm2717_vm15, %v896_v55, %v890_v38 }
 0x23b   : > { %v909_v50 = vmul.f32 0.8, %v904_v47  ;;  %v910_v52 = vmul.f32 0.98, %v905_v48  ;;  %v918_v57 = vmul.f32 0.95, %v903_v54  ;;  %v906_v62 = vsel %vm2527_vm8, %v897_v59, %v2523_v31 }
 0x23c   : > { %v924_v0 = vmul.f32 0.99, %v906_v62 }
 0x23d   : > { %v919_v53 = vadd.f32 %v917_v51, %v909_v50  ;;  %v932_v5 = vadd.f32 -0.6, %v910_v52  ;;  %v993_v51 = vmul.f32 %v1834_v43, %v2356_v11  ;;  %v1844_v43 = vld [vmem:[%s2335_s11 + $0x13] ss:$0 sm:$0xff] }
 0x23f   : > { %v920_v56 = vadd.f32 %v919_v53, %v910_v52 }
 0x241   : > { %v921_v58 = vmul.f32 0.001, %v920_v56 }
 0x243   : > { %v922_v60 = vadd.f32 %v921_v58, %v918_v57 }
 0x245   : > { %v923_v61 = vadd.f32 -0.0035, %v922_v60 }
 0x247   : > { %v1825_v63 = vadd.f32 0.07, %v923_v61 }
 0x249   : > { %v926_v1 = vmul.f32 %v1825_v63, %v2359_v24 }
 0x24b   : > { %v927_v2 = vadd.f32 %v926_v1, %v924_v0 }
 0x24d   : > { %v928_v3 = vadd.f32 -0.0005, %v927_v2 }
 0x24f   : > { %v929_v4 = vsub.f32 %v923_v61, %v928_v3  ;;  %v934_v22 = vmax.f32 %v928_v3, -0.06 }
 0x251   : > { %vm2748_vm0 = vcmp.gt.f32.partialorder %v929_v4, 0.0 }
 0x252   : > { %v931_v8 = vsel %vm2748_vm0, 10.0, %v909_v50  ;;  %v933_v9 = vsel %vm2748_vm0, %v932_v5, %v910_v52  ;;  %v1826_v10 = vsel %vm2748_vm0, 1.0, %v2181_v34  ;;  %v936_v14 = vsel %vm2748_vm0, -0.07, %v923_v61 }
 0x253   : > { %v942_v12 = vsel %vm2527_vm8, %v931_v8, %v2502_v16  ;;  %v943_v13 = vsel %vm2527_vm8, %v933_v9, %v2506_v17  ;;  %1827 = vst [vmem:[%s2346_s30 + $0x78] sm:$0xff] %v1826_v10  ;;  %v941_v21 = vsel %vm2527_vm8, %v936_v14, %v2517_v23  ;;  %v935_v28 = vsel %vm2748_vm0, %v934_v22, %v928_v3 }
 0x254   : > { %v947_v15 = vmul.f32 0.8, %v942_v12  ;;  %v948_v19 = vmul.f32 0.98, %v943_v13  ;;  %v956_v26 = vmul.f32 0.95, %v941_v21  ;;  %v944_v32 = vsel %vm2527_vm8, %v935_v28, %v2523_v31 }
 0x255   : > { %v962_v35 = vmul.f32 0.99, %v944_v32 }
 0x256   : > { %v957_v20 = vadd.f32 %v955_v18, %v947_v15  ;;  %v970_v40 = vadd.f32 -0.6, %v948_v19  ;;  %v1031_v18 = vmul.f32 %v1839_v7, %v2356_v11  ;;  %v1849_v7 = vld [vmem:[%s2335_s11 + $0x14] ss:$0 sm:$0xff] }
 0x258   : > { %v958_v25 = vadd.f32 %v957_v20, %v948_v19 }
 0x25a   : > { %v959_v27 = vmul.f32 0.001, %v958_v25 }
 0x25c   : > { %v960_v29 = vadd.f32 %v959_v27, %v956_v26 }
 0x25e   : > { %v961_v30 = vadd.f32 -0.0035, %v960_v29 }
 0x260   : > { %v1830_v33 = vadd.f32 0.07, %v961_v30 }
 0x262   : > { %v964_v36 = vmul.f32 %v1830_v33, %v2359_v24 }
 0x264   : > { %v965_v37 = vadd.f32 %v964_v36, %v962_v35 }
 0x266   : > { %v966_v38 = vadd.f32 -0.0005, %v965_v37 }
 0x268   : > { %v967_v39 = vsub.f32 %v961_v30, %v966_v38  ;;  %v972_v55 = vmax.f32 %v966_v38, -0.06 }
 0x26a   : > { %vm2779_vm1 = vcmp.gt.f32.partialorder %v967_v39, 0.0 }
 0x26b   : > { %v969_v44 = vsel %vm2779_vm1, 10.0, %v947_v15  ;;  %v971_v45 = vsel %vm2779_vm1, %v970_v40, %v948_v19  ;;  %v1831_v46 = vsel %vm2779_vm1, 1.0, %v2181_v34  ;;  %v974_v49 = vsel %vm2779_vm1, -0.07, %v961_v30 }
 0x26c   : > { %v980_v47 = vsel %vm2527_vm8, %v969_v44, %v2502_v16  ;;  %v981_v48 = vsel %vm2527_vm8, %v971_v45, %v2506_v17  ;;  %1832 = vst [vmem:[%s2346_s30 + $0x80] sm:$0xff] %v1831_v46  ;;  %v979_v54 = vsel %vm2527_vm8, %v974_v49, %v2517_v23  ;;  %v973_v59 = vsel %vm2779_vm1, %v972_v55, %v966_v38 }
 0x26d   : > { %v985_v50 = vmul.f32 0.8, %v980_v47  ;;  %v986_v52 = vmul.f32 0.98, %v981_v48  ;;  %v994_v57 = vmul.f32 0.95, %v979_v54  ;;  %v982_v62 = vsel %vm2527_vm8, %v973_v59, %v2523_v31 }
 0x26e   : > { %v1000_v0 = vmul.f32 0.99, %v982_v62 }
 0x26f   : > { %v995_v53 = vadd.f32 %v993_v51, %v985_v50  ;;  %v1008_v5 = vadd.f32 -0.6, %v986_v52  ;;  %v1069_v51 = vmul.f32 %v1844_v43, %v2356_v11  ;;  %v1854_v43 = vld [vmem:[%s2335_s11 + $0x15] ss:$0 sm:$0xff] }
 0x271   : > { %v996_v56 = vadd.f32 %v995_v53, %v986_v52 }
 0x273   : > { %v997_v58 = vmul.f32 0.001, %v996_v56 }
 0x275   : > { %v998_v60 = vadd.f32 %v997_v58, %v994_v57 }
 0x277   : > { %v999_v61 = vadd.f32 -0.0035, %v998_v60 }
 0x279   : > { %v1835_v63 = vadd.f32 0.07, %v999_v61 }
 0x27b   : > { %v1002_v1 = vmul.f32 %v1835_v63, %v2359_v24 }
 0x27d   : > { %v1003_v2 = vadd.f32 %v1002_v1, %v1000_v0 }
 0x27f   : > { %v1004_v3 = vadd.f32 -0.0005, %v1003_v2 }
 0x281   : > { %v1005_v4 = vsub.f32 %v999_v61, %v1004_v3  ;;  %v1010_v22 = vmax.f32 %v1004_v3, -0.06 }
 0x283   : > { %vm2810_vm2 = vcmp.gt.f32.partialorder %v1005_v4, 0.0 }
 0x284   : > { %v1007_v8 = vsel %vm2810_vm2, 10.0, %v985_v50  ;;  %v1009_v9 = vsel %vm2810_vm2, %v1008_v5, %v986_v52  ;;  %v1836_v10 = vsel %vm2810_vm2, 1.0, %v2181_v34  ;;  %v1012_v14 = vsel %vm2810_vm2, -0.07, %v999_v61 }
 0x285   : > { %v1018_v12 = vsel %vm2527_vm8, %v1007_v8, %v2502_v16  ;;  %v1019_v13 = vsel %vm2527_vm8, %v1009_v9, %v2506_v17  ;;  %1837 = vst [vmem:[%s2346_s30 + $0x88] sm:$0xff] %v1836_v10  ;;  %v1017_v21 = vsel %vm2527_vm8, %v1012_v14, %v2517_v23  ;;  %v1011_v28 = vsel %vm2810_vm2, %v1010_v22, %v1004_v3 }
 0x286   : > { %v1023_v15 = vmul.f32 0.8, %v1018_v12  ;;  %v1024_v19 = vmul.f32 0.98, %v1019_v13  ;;  %v1032_v26 = vmul.f32 0.95, %v1017_v21  ;;  %v1020_v32 = vsel %vm2527_vm8, %v1011_v28, %v2523_v31 }
 0x287   : > { %v1038_v35 = vmul.f32 0.99, %v1020_v32 }
 0x288   : > { %v1033_v20 = vadd.f32 %v1031_v18, %v1023_v15  ;;  %v1046_v40 = vadd.f32 -0.6, %v1024_v19  ;;  %v1107_v18 = vmul.f32 %v1849_v7, %v2356_v11  ;;  %v1859_v7 = vld [vmem:[%s2335_s11 + $0x16] ss:$0 sm:$0xff] }
 0x28a   : > { %v1034_v25 = vadd.f32 %v1033_v20, %v1024_v19 }
 0x28c   : > { %v1035_v27 = vmul.f32 0.001, %v1034_v25 }
 0x28e   : > { %v1036_v29 = vadd.f32 %v1035_v27, %v1032_v26 }
 0x290   : > { %v1037_v30 = vadd.f32 -0.0035, %v1036_v29 }
 0x292   : > { %v1840_v33 = vadd.f32 0.07, %v1037_v30 }
 0x294   : > { %v1040_v36 = vmul.f32 %v1840_v33, %v2359_v24 }
 0x296   : > { %v1041_v37 = vadd.f32 %v1040_v36, %v1038_v35 }
 0x298   : > { %v1042_v38 = vadd.f32 -0.0005, %v1041_v37 }
 0x29a   : > { %v1043_v39 = vsub.f32 %v1037_v30, %v1042_v38  ;;  %v1048_v55 = vmax.f32 %v1042_v38, -0.06 }
 0x29c   : > { %vm2841_vm3 = vcmp.gt.f32.partialorder %v1043_v39, 0.0 }
 0x29d   : > { %v1045_v44 = vsel %vm2841_vm3, 10.0, %v1023_v15  ;;  %v1047_v45 = vsel %vm2841_vm3, %v1046_v40, %v1024_v19  ;;  %v1841_v46 = vsel %vm2841_vm3, 1.0, %v2181_v34  ;;  %v1050_v49 = vsel %vm2841_vm3, -0.07, %v1037_v30 }
 0x29e   : > { %v1056_v47 = vsel %vm2527_vm8, %v1045_v44, %v2502_v16  ;;  %v1057_v48 = vsel %vm2527_vm8, %v1047_v45, %v2506_v17  ;;  %1842 = vst [vmem:[%s2346_s30 + $0x90] sm:$0xff] %v1841_v46  ;;  %v1055_v54 = vsel %vm2527_vm8, %v1050_v49, %v2517_v23  ;;  %v1049_v59 = vsel %vm2841_vm3, %v1048_v55, %v1042_v38 }
 0x29f   : > { %v1061_v50 = vmul.f32 0.8, %v1056_v47  ;;  %v1062_v52 = vmul.f32 0.98, %v1057_v48  ;;  %v1070_v57 = vmul.f32 0.95, %v1055_v54  ;;  %v1058_v62 = vsel %vm2527_vm8, %v1049_v59, %v2523_v31 }
 0x2a0   : > { %v1076_v0 = vmul.f32 0.99, %v1058_v62 }
 0x2a1   : > { %v1071_v53 = vadd.f32 %v1069_v51, %v1061_v50  ;;  %v1084_v5 = vadd.f32 -0.6, %v1062_v52  ;;  %v1145_v51 = vmul.f32 %v1854_v43, %v2356_v11  ;;  %v1864_v43 = vld [vmem:[%s2335_s11 + $0x17] ss:$0 sm:$0xff] }
 0x2a3   : > { %v1072_v56 = vadd.f32 %v1071_v53, %v1062_v52 }
 0x2a5   : > { %v1073_v58 = vmul.f32 0.001, %v1072_v56 }
 0x2a7   : > { %v1074_v60 = vadd.f32 %v1073_v58, %v1070_v57 }
 0x2a9   : > { %v1075_v61 = vadd.f32 -0.0035, %v1074_v60 }
 0x2ab   : > { %v1845_v63 = vadd.f32 0.07, %v1075_v61 }
 0x2ad   : > { %v1078_v1 = vmul.f32 %v1845_v63, %v2359_v24 }
 0x2af   : > { %v1079_v2 = vadd.f32 %v1078_v1, %v1076_v0 }
 0x2b1   : > { %v1080_v3 = vadd.f32 -0.0005, %v1079_v2 }
 0x2b3   : > { %v1081_v4 = vsub.f32 %v1075_v61, %v1080_v3  ;;  %v1086_v22 = vmax.f32 %v1080_v3, -0.06 }
 0x2b5   : > { %vm2872_vm4 = vcmp.gt.f32.partialorder %v1081_v4, 0.0 }
 0x2b6   : > { %v1083_v8 = vsel %vm2872_vm4, 10.0, %v1061_v50  ;;  %v1085_v9 = vsel %vm2872_vm4, %v1084_v5, %v1062_v52  ;;  %v1846_v10 = vsel %vm2872_vm4, 1.0, %v2181_v34  ;;  %v1088_v14 = vsel %vm2872_vm4, -0.07, %v1075_v61 }
 0x2b7   : > { %v1094_v12 = vsel %vm2527_vm8, %v1083_v8, %v2502_v16  ;;  %v1095_v13 = vsel %vm2527_vm8, %v1085_v9, %v2506_v17  ;;  %1847 = vst [vmem:[%s2346_s30 + $0x98] sm:$0xff] %v1846_v10  ;;  %v1093_v21 = vsel %vm2527_vm8, %v1088_v14, %v2517_v23  ;;  %v1087_v28 = vsel %vm2872_vm4, %v1086_v22, %v1080_v3 }
 0x2b8   : > { %v1099_v15 = vmul.f32 0.8, %v1094_v12  ;;  %v1100_v19 = vmul.f32 0.98, %v1095_v13  ;;  %v1108_v26 = vmul.f32 0.95, %v1093_v21  ;;  %v1096_v32 = vsel %vm2527_vm8, %v1087_v28, %v2523_v31 }
 0x2b9   : > { %v1114_v35 = vmul.f32 0.99, %v1096_v32 }
 0x2ba   : > { %v1109_v20 = vadd.f32 %v1107_v18, %v1099_v15  ;;  %v1122_v40 = vadd.f32 -0.6, %v1100_v19  ;;  %v1183_v18 = vmul.f32 %v1859_v7, %v2356_v11  ;;  %v1869_v7 = vld [vmem:[%s2335_s11 + $0x18] ss:$0 sm:$0xff] }
 0x2bc   : > { %v1110_v25 = vadd.f32 %v1109_v20, %v1100_v19 }
 0x2be   : > { %v1111_v27 = vmul.f32 0.001, %v1110_v25 }
 0x2c0   : > { %v1112_v29 = vadd.f32 %v1111_v27, %v1108_v26 }
 0x2c2   : > { %v1113_v30 = vadd.f32 -0.0035, %v1112_v29 }
 0x2c4   : > { %v1850_v33 = vadd.f32 0.07, %v1113_v30 }
 0x2c6   : > { %v1116_v36 = vmul.f32 %v1850_v33, %v2359_v24 }
 0x2c8   : > { %v1117_v37 = vadd.f32 %v1116_v36, %v1114_v35 }
 0x2ca   : > { %v1118_v38 = vadd.f32 -0.0005, %v1117_v37 }
 0x2cc   : > { %v1119_v39 = vsub.f32 %v1113_v30, %v1118_v38  ;;  %v1124_v55 = vmax.f32 %v1118_v38, -0.06 }
 0x2ce   : > { %vm2903_vm5 = vcmp.gt.f32.partialorder %v1119_v39, 0.0 }
 0x2cf   : > { %v1121_v44 = vsel %vm2903_vm5, 10.0, %v1099_v15  ;;  %v1123_v45 = vsel %vm2903_vm5, %v1122_v40, %v1100_v19  ;;  %v1851_v46 = vsel %vm2903_vm5, 1.0, %v2181_v34  ;;  %v1126_v49 = vsel %vm2903_vm5, -0.07, %v1113_v30 }
 0x2d0   : > { %v1132_v47 = vsel %vm2527_vm8, %v1121_v44, %v2502_v16  ;;  %v1133_v48 = vsel %vm2527_vm8, %v1123_v45, %v2506_v17  ;;  %1852 = vst [vmem:[%s2346_s30 + $0xa0] sm:$0xff] %v1851_v46  ;;  %v1131_v54 = vsel %vm2527_vm8, %v1126_v49, %v2517_v23  ;;  %v1125_v59 = vsel %vm2903_vm5, %v1124_v55, %v1118_v38 }
 0x2d1   : > { %v1137_v50 = vmul.f32 0.8, %v1132_v47  ;;  %v1138_v52 = vmul.f32 0.98, %v1133_v48  ;;  %v1146_v57 = vmul.f32 0.95, %v1131_v54  ;;  %v1134_v62 = vsel %vm2527_vm8, %v1125_v59, %v2523_v31 }
 0x2d2   : > { %v1152_v0 = vmul.f32 0.99, %v1134_v62 }
 0x2d3   : > { %v1147_v53 = vadd.f32 %v1145_v51, %v1137_v50  ;;  %v1160_v5 = vadd.f32 -0.6, %v1138_v52  ;;  %v1221_v51 = vmul.f32 %v1864_v43, %v2356_v11  ;;  %v1874_v43 = vld [vmem:[%s2335_s11 + $0x19] ss:$0 sm:$0xff] }
 0x2d5   : > { %v1148_v56 = vadd.f32 %v1147_v53, %v1138_v52 }
 0x2d7   : > { %v1149_v58 = vmul.f32 0.001, %v1148_v56 }
 0x2d9   : > { %v1150_v60 = vadd.f32 %v1149_v58, %v1146_v57 }
 0x2db   : > { %v1151_v61 = vadd.f32 -0.0035, %v1150_v60 }
 0x2dd   : > { %v1855_v63 = vadd.f32 0.07, %v1151_v61 }
 0x2df   : > { %v1154_v1 = vmul.f32 %v1855_v63, %v2359_v24 }
 0x2e1   : > { %v1155_v2 = vadd.f32 %v1154_v1, %v1152_v0 }
 0x2e3   : > { %v1156_v3 = vadd.f32 -0.0005, %v1155_v2 }
 0x2e5   : > { %v1157_v4 = vsub.f32 %v1151_v61, %v1156_v3  ;;  %v1162_v22 = vmax.f32 %v1156_v3, -0.06 }
 0x2e7   : > { %vm2934_vm6 = vcmp.gt.f32.partialorder %v1157_v4, 0.0 }
 0x2e8   : > { %v1159_v8 = vsel %vm2934_vm6, 10.0, %v1137_v50  ;;  %v1161_v9 = vsel %vm2934_vm6, %v1160_v5, %v1138_v52  ;;  %v1856_v10 = vsel %vm2934_vm6, 1.0, %v2181_v34  ;;  %v1164_v14 = vsel %vm2934_vm6, -0.07, %v1151_v61 }
 0x2e9   : > { %v1170_v12 = vsel %vm2527_vm8, %v1159_v8, %v2502_v16  ;;  %v1171_v13 = vsel %vm2527_vm8, %v1161_v9, %v2506_v17  ;;  %1857 = vst [vmem:[%s2346_s30 + $0xa8] sm:$0xff] %v1856_v10  ;;  %v1169_v21 = vsel %vm2527_vm8, %v1164_v14, %v2517_v23  ;;  %v1163_v28 = vsel %vm2934_vm6, %v1162_v22, %v1156_v3 }
 0x2ea   : > { %v1175_v15 = vmul.f32 0.8, %v1170_v12  ;;  %v1176_v19 = vmul.f32 0.98, %v1171_v13  ;;  %v1184_v26 = vmul.f32 0.95, %v1169_v21  ;;  %v1172_v32 = vsel %vm2527_vm8, %v1163_v28, %v2523_v31 }
 0x2eb   : > { %v1190_v35 = vmul.f32 0.99, %v1172_v32 }
 0x2ec   : > { %v1185_v20 = vadd.f32 %v1183_v18, %v1175_v15  ;;  %v1198_v40 = vadd.f32 -0.6, %v1176_v19  ;;  %v1259_v18 = vmul.f32 %v1869_v7, %v2356_v11  ;;  %v1879_v7 = vld [vmem:[%s2335_s11 + $0x1a] ss:$0 sm:$0xff] }
 0x2ee   : > { %v1186_v25 = vadd.f32 %v1185_v20, %v1176_v19 }
 0x2f0   : > { %v1187_v27 = vmul.f32 0.001, %v1186_v25 }
 0x2f2   : > { %v1188_v29 = vadd.f32 %v1187_v27, %v1184_v26 }
 0x2f4   : > { %v1189_v30 = vadd.f32 -0.0035, %v1188_v29 }
 0x2f6   : > { %v1860_v33 = vadd.f32 0.07, %v1189_v30 }
 0x2f8   : > { %v1192_v36 = vmul.f32 %v1860_v33, %v2359_v24 }
 0x2fa   : > { %v1193_v37 = vadd.f32 %v1192_v36, %v1190_v35 }
 0x2fc   : > { %v1194_v38 = vadd.f32 -0.0005, %v1193_v37 }
 0x2fe   : > { %v1195_v39 = vsub.f32 %v1189_v30, %v1194_v38  ;;  %v1200_v55 = vmax.f32 %v1194_v38, -0.06 }
 0x300   : > { %vm2965_vm7 = vcmp.gt.f32.partialorder %v1195_v39, 0.0 }
 0x301   : > { %v1197_v44 = vsel %vm2965_vm7, 10.0, %v1175_v15  ;;  %v1199_v45 = vsel %vm2965_vm7, %v1198_v40, %v1176_v19  ;;  %v1861_v46 = vsel %vm2965_vm7, 1.0, %v2181_v34  ;;  %v1202_v49 = vsel %vm2965_vm7, -0.07, %v1189_v30 }
 0x302   : > { %v1208_v47 = vsel %vm2527_vm8, %v1197_v44, %v2502_v16  ;;  %v1209_v48 = vsel %vm2527_vm8, %v1199_v45, %v2506_v17  ;;  %1862 = vst [vmem:[%s2346_s30 + $0xb0] sm:$0xff] %v1861_v46  ;;  %v1207_v54 = vsel %vm2527_vm8, %v1202_v49, %v2517_v23  ;;  %v1201_v59 = vsel %vm2965_vm7, %v1200_v55, %v1194_v38 }
 0x303   : > { %v1213_v50 = vmul.f32 0.8, %v1208_v47  ;;  %v1214_v52 = vmul.f32 0.98, %v1209_v48  ;;  %v1222_v57 = vmul.f32 0.95, %v1207_v54  ;;  %v1210_v62 = vsel %vm2527_vm8, %v1201_v59, %v2523_v31 }
 0x304   : > { %v1228_v0 = vmul.f32 0.99, %v1210_v62 }
 0x305   : > { %v1223_v53 = vadd.f32 %v1221_v51, %v1213_v50  ;;  %v1236_v5 = vadd.f32 -0.6, %v1214_v52  ;;  %v1297_v51 = vmul.f32 %v1874_v43, %v2356_v11  ;;  %v1884_v43 = vld [vmem:[%s2335_s11 + $0x1b] ss:$0 sm:$0xff] }
 0x307   : > { %v1224_v56 = vadd.f32 %v1223_v53, %v1214_v52 }
 0x309   : > { %v1225_v58 = vmul.f32 0.001, %v1224_v56 }
 0x30b   : > { %v1226_v60 = vadd.f32 %v1225_v58, %v1222_v57 }
 0x30d   : > { %v1227_v61 = vadd.f32 -0.0035, %v1226_v60 }
 0x30f   : > { %v1865_v63 = vadd.f32 0.07, %v1227_v61 }
 0x311   : > { %v1230_v1 = vmul.f32 %v1865_v63, %v2359_v24 }
 0x313   : > { %v1231_v2 = vadd.f32 %v1230_v1, %v1228_v0 }
 0x315   : > { %v1232_v3 = vadd.f32 -0.0005, %v1231_v2 }
 0x317   : > { %v1233_v4 = vsub.f32 %v1227_v61, %v1232_v3  ;;  %v1238_v22 = vmax.f32 %v1232_v3, -0.06 }
 0x319   : > { %vm2996_vm9 = vcmp.gt.f32.partialorder %v1233_v4, 0.0 }
 0x31a   : > { %v1235_v8 = vsel %vm2996_vm9, 10.0, %v1213_v50  ;;  %v1237_v9 = vsel %vm2996_vm9, %v1236_v5, %v1214_v52  ;;  %v1866_v10 = vsel %vm2996_vm9, 1.0, %v2181_v34  ;;  %v1240_v14 = vsel %vm2996_vm9, -0.07, %v1227_v61 }
 0x31b   : > { %v1246_v12 = vsel %vm2527_vm8, %v1235_v8, %v2502_v16  ;;  %v1247_v13 = vsel %vm2527_vm8, %v1237_v9, %v2506_v17  ;;  %1867 = vst [vmem:[%s2346_s30 + $0xb8] sm:$0xff] %v1866_v10  ;;  %v1245_v21 = vsel %vm2527_vm8, %v1240_v14, %v2517_v23  ;;  %v1239_v28 = vsel %vm2996_vm9, %v1238_v22, %v1232_v3 }
 0x31c   : > { %v1251_v15 = vmul.f32 0.8, %v1246_v12  ;;  %v1252_v19 = vmul.f32 0.98, %v1247_v13  ;;  %v1260_v26 = vmul.f32 0.95, %v1245_v21  ;;  %v1248_v32 = vsel %vm2527_vm8, %v1239_v28, %v2523_v31 }
 0x31d   : > { %v1266_v35 = vmul.f32 0.99, %v1248_v32 }
 0x31e   : > { %v1261_v20 = vadd.f32 %v1259_v18, %v1251_v15  ;;  %v1274_v40 = vadd.f32 -0.6, %v1252_v19  ;;  %v1335_v18 = vmul.f32 %v1879_v7, %v2356_v11  ;;  %v1889_v7 = vld [vmem:[%s2335_s11 + $0x1c] ss:$0 sm:$0xff] }
 0x320   : > { %v1262_v25 = vadd.f32 %v1261_v20, %v1252_v19 }
 0x322   : > { %v1263_v27 = vmul.f32 0.001, %v1262_v25 }
 0x324   : > { %v1264_v29 = vadd.f32 %v1263_v27, %v1260_v26 }
 0x326   : > { %v1265_v30 = vadd.f32 -0.0035, %v1264_v29 }
 0x328   : > { %v1870_v33 = vadd.f32 0.07, %v1265_v30 }
 0x32a   : > { %v1268_v36 = vmul.f32 %v1870_v33, %v2359_v24 }
 0x32c   : > { %v1269_v37 = vadd.f32 %v1268_v36, %v1266_v35 }
 0x32e   : > { %v1270_v38 = vadd.f32 -0.0005, %v1269_v37 }
 0x330   : > { %v1271_v39 = vsub.f32 %v1265_v30, %v1270_v38  ;;  %v1276_v55 = vmax.f32 %v1270_v38, -0.06 }
 0x332   : > { %vm3027_vm10 = vcmp.gt.f32.partialorder %v1271_v39, 0.0 }
 0x333   : > { %v1273_v44 = vsel %vm3027_vm10, 10.0, %v1251_v15  ;;  %v1275_v45 = vsel %vm3027_vm10, %v1274_v40, %v1252_v19  ;;  %v1871_v46 = vsel %vm3027_vm10, 1.0, %v2181_v34  ;;  %v1278_v49 = vsel %vm3027_vm10, -0.07, %v1265_v30 }
 0x334   : > { %v1284_v47 = vsel %vm2527_vm8, %v1273_v44, %v2502_v16  ;;  %v1285_v48 = vsel %vm2527_vm8, %v1275_v45, %v2506_v17  ;;  %1872 = vst [vmem:[%s2346_s30 + $0xc0] sm:$0xff] %v1871_v46  ;;  %v1283_v54 = vsel %vm2527_vm8, %v1278_v49, %v2517_v23  ;;  %v1277_v59 = vsel %vm3027_vm10, %v1276_v55, %v1270_v38 }
 0x335   : > { %v1289_v50 = vmul.f32 0.8, %v1284_v47  ;;  %v1290_v52 = vmul.f32 0.98, %v1285_v48  ;;  %v1298_v57 = vmul.f32 0.95, %v1283_v54  ;;  %v1286_v62 = vsel %vm2527_vm8, %v1277_v59, %v2523_v31 }
 0x336   : > { %v1304_v0 = vmul.f32 0.99, %v1286_v62 }
 0x337   : > { %v1299_v53 = vadd.f32 %v1297_v51, %v1289_v50  ;;  %v1312_v5 = vadd.f32 -0.6, %v1290_v52  ;;  %v1373_v51 = vmul.f32 %v1884_v43, %v2356_v11  ;;  %v1894_v43 = vld [vmem:[%s2335_s11 + $0x1d] ss:$0 sm:$0xff] }
 0x339   : > { %v1300_v56 = vadd.f32 %v1299_v53, %v1290_v52 }
 0x33b   : > { %v1301_v58 = vmul.f32 0.001, %v1300_v56 }
 0x33d   : > { %v1302_v60 = vadd.f32 %v1301_v58, %v1298_v57 }
 0x33f   : > { %v1303_v61 = vadd.f32 -0.0035, %v1302_v60 }
 0x341   : > { %v1875_v63 = vadd.f32 0.07, %v1303_v61 }
 0x343   : > { %v1306_v1 = vmul.f32 %v1875_v63, %v2359_v24 }
 0x345   : > { %v1307_v2 = vadd.f32 %v1306_v1, %v1304_v0 }
 0x347   : > { %v1308_v3 = vadd.f32 -0.0005, %v1307_v2 }
 0x349   : > { %v1309_v4 = vsub.f32 %v1303_v61, %v1308_v3  ;;  %v1314_v22 = vmax.f32 %v1308_v3, -0.06 }
 0x34b   : > { %vm3058_vm11 = vcmp.gt.f32.partialorder %v1309_v4, 0.0 }
 0x34c   : > { %v1311_v8 = vsel %vm3058_vm11, 10.0, %v1289_v50  ;;  %v1313_v9 = vsel %vm3058_vm11, %v1312_v5, %v1290_v52  ;;  %v1876_v10 = vsel %vm3058_vm11, 1.0, %v2181_v34  ;;  %v1316_v14 = vsel %vm3058_vm11, -0.07, %v1303_v61 }
 0x34d   : > { %v1322_v12 = vsel %vm2527_vm8, %v1311_v8, %v2502_v16  ;;  %v1323_v13 = vsel %vm2527_vm8, %v1313_v9, %v2506_v17  ;;  %1877 = vst [vmem:[%s2346_s30 + $0xc8] sm:$0xff] %v1876_v10  ;;  %v1321_v21 = vsel %vm2527_vm8, %v1316_v14, %v2517_v23  ;;  %v1315_v28 = vsel %vm3058_vm11, %v1314_v22, %v1308_v3 }
 0x34e   : > { %v1327_v15 = vmul.f32 0.8, %v1322_v12  ;;  %v1328_v19 = vmul.f32 0.98, %v1323_v13  ;;  %v1336_v26 = vmul.f32 0.95, %v1321_v21  ;;  %v1324_v32 = vsel %vm2527_vm8, %v1315_v28, %v2523_v31 }
 0x34f   : > { %v1342_v35 = vmul.f32 0.99, %v1324_v32 }
 0x350   : > { %v1337_v20 = vadd.f32 %v1335_v18, %v1327_v15  ;;  %v1350_v40 = vadd.f32 -0.6, %v1328_v19  ;;  %v1411_v18 = vmul.f32 %v1889_v7, %v2356_v11  ;;  %v1899_v7 = vld [vmem:[%s2335_s11 + $0x1e] ss:$0 sm:$0xff] }
 0x352   : > { %v1338_v25 = vadd.f32 %v1337_v20, %v1328_v19 }
 0x354   : > { %v1339_v27 = vmul.f32 0.001, %v1338_v25 }
 0x356   : > { %v1340_v29 = vadd.f32 %v1339_v27, %v1336_v26 }
 0x358   : > { %v1341_v30 = vadd.f32 -0.0035, %v1340_v29 }
 0x35a   : > { %v1880_v33 = vadd.f32 0.07, %v1341_v30 }
 0x35c   : > { %v1344_v36 = vmul.f32 %v1880_v33, %v2359_v24 }
 0x35e   : > { %v1345_v37 = vadd.f32 %v1344_v36, %v1342_v35 }
 0x360   : > { %v1346_v38 = vadd.f32 -0.0005, %v1345_v37 }
 0x362   : > { %v1347_v39 = vsub.f32 %v1341_v30, %v1346_v38  ;;  %v1352_v55 = vmax.f32 %v1346_v38, -0.06 }
 0x364   : > { %vm3089_vm12 = vcmp.gt.f32.partialorder %v1347_v39, 0.0 }
 0x365   : > { %v1349_v44 = vsel %vm3089_vm12, 10.0, %v1327_v15  ;;  %v1351_v45 = vsel %vm3089_vm12, %v1350_v40, %v1328_v19  ;;  %v1881_v46 = vsel %vm3089_vm12, 1.0, %v2181_v34  ;;  %v1354_v49 = vsel %vm3089_vm12, -0.07, %v1341_v30 }
 0x366   : > { %v1360_v47 = vsel %vm2527_vm8, %v1349_v44, %v2502_v16  ;;  %v1361_v48 = vsel %vm2527_vm8, %v1351_v45, %v2506_v17  ;;  %1882 = vst [vmem:[%s2346_s30 + $0xd0] sm:$0xff] %v1881_v46  ;;  %v1359_v54 = vsel %vm2527_vm8, %v1354_v49, %v2517_v23  ;;  %v1353_v59 = vsel %vm3089_vm12, %v1352_v55, %v1346_v38 }
 0x367   : > { %v1365_v50 = vmul.f32 0.8, %v1360_v47  ;;  %v1366_v52 = vmul.f32 0.98, %v1361_v48  ;;  %v1374_v57 = vmul.f32 0.95, %v1359_v54  ;;  %v1362_v62 = vsel %vm2527_vm8, %v1353_v59, %v2523_v31 }
 0x368   : > { %v1380_v0 = vmul.f32 0.99, %v1362_v62 }
 0x369   : > { %v1375_v53 = vadd.f32 %v1373_v51, %v1365_v50  ;;  %v1388_v5 = vadd.f32 -0.6, %v1366_v52  ;;  %v1449_v51 = vmul.f32 %v1894_v43, %v2356_v11  ;;  %v1904_v43 = vld [vmem:[%s2335_s11 + $0x1f] ss:$0 sm:$0xff]  ;;  %s2183_s11 = smov [#allocation7]  }
 0x36a   : > { %s2064_s3 = sshll.u32 %s2183_s11, 4  ;;  %s2065_s3 = int_to_ptr.vmem [resolvable:$false] %s2064_s3 }
 0x36b   : > { %v1376_v56 = vadd.f32 %v1375_v53, %v1366_v52  ;;  %s2066_s28 = scalar_lea.vmem %s2065_s3, 8192  ;;  %p2067_p3 = scmp.lt.s32.totalorder %s3251_s24, %s2065_s3 }
 0x36c   : > { %p2068_p5 = scmp.lt.s32.totalorder %s2066_s28, %s2060_s22 }
 0x36d   : > { %v1377_v58 = vmul.f32 0.001, %v1376_v56 }
 0x36e   : > { %p2069_p7 = por %p2068_p5, %p2067_p3 }
 0x36f   : > { %v1378_v60 = vadd.f32 %v1377_v58, %v1374_v57 }
 0x370   : > { %p2070_p6 = pnand %p2069_p7, %p2063_p0 }
 0x371   : > { %v1379_v61 = vadd.f32 -0.0035, %v1378_v60 }
 0x373   : > { %v1885_v63 = vadd.f32 0.07, %v1379_v61 }
 0x375   : > { %v1382_v1 = vmul.f32 %v1885_v63, %v2359_v24 }
 0x377   : > { %v1383_v2 = vadd.f32 %v1382_v1, %v1380_v0 }
 0x379   : > { %v1384_v3 = vadd.f32 -0.0005, %v1383_v2 }
 0x37b   : > { %v1385_v4 = vsub.f32 %v1379_v61, %v1384_v3  ;;  %v1390_v22 = vmax.f32 %v1384_v3, -0.06 }
 0x37d   : > { %vm3120_vm13 = vcmp.gt.f32.partialorder %v1385_v4, 0.0 }
 0x37e   : > { %v1387_v8 = vsel %vm3120_vm13, 10.0, %v1365_v50  ;;  %v1389_v9 = vsel %vm3120_vm13, %v1388_v5, %v1366_v52  ;;  %v1886_v10 = vsel %vm3120_vm13, 1.0, %v2181_v34  ;;  %v1392_v14 = vsel %vm3120_vm13, -0.07, %v1379_v61 }
 0x37f   : > { %v1398_v12 = vsel %vm2527_vm8, %v1387_v8, %v2502_v16  ;;  %v1399_v13 = vsel %vm2527_vm8, %v1389_v9, %v2506_v17  ;;  %1887 = vst [vmem:[%s2346_s30 + $0xd8] sm:$0xff] %v1886_v10  ;;  %v1397_v21 = vsel %vm2527_vm8, %v1392_v14, %v2517_v23  ;;  %v1391_v28 = vsel %vm3120_vm13, %v1390_v22, %v1384_v3 }
 0x380   : > { %v1403_v15 = vmul.f32 0.8, %v1398_v12  ;;  %v1404_v19 = vmul.f32 0.98, %v1399_v13  ;;  %v1412_v26 = vmul.f32 0.95, %v1397_v21  ;;  %v1400_v32 = vsel %vm2527_vm8, %v1391_v28, %v2523_v31 }
 0x381   : > { %v1418_v35 = vmul.f32 0.99, %v1400_v32 }
 0x382   : > { %v1413_v20 = vadd.f32 %v1411_v18, %v1403_v15  ;;  %v1426_v40 = vadd.f32 -0.6, %v1404_v19  ;;  %v1487_v18 = vmul.f32 %v1899_v7, %v2356_v11 }
 0x384   : > { %v1414_v25 = vadd.f32 %v1413_v20, %v1404_v19 }
 0x386   : > { %v1415_v27 = vmul.f32 0.001, %v1414_v25 }
 0x388   : > { %v1416_v29 = vadd.f32 %v1415_v27, %v1412_v26 }
 0x38a   : > { %v1417_v30 = vadd.f32 -0.0035, %v1416_v29 }
 0x38c   : > { %v1890_v33 = vadd.f32 0.07, %v1417_v30 }
 0x38e   : > { %v1420_v36 = vmul.f32 %v1890_v33, %v2359_v24 }
 0x390   : > { %v1421_v37 = vadd.f32 %v1420_v36, %v1418_v35 }
 0x392   : > { %v1422_v38 = vadd.f32 -0.0005, %v1421_v37 }
 0x394   : > { %v1423_v39 = vsub.f32 %v1417_v30, %v1422_v38  ;;  %v1428_v55 = vmax.f32 %v1422_v38, -0.06 }
 0x396   : > { %vm3151_vm14 = vcmp.gt.f32.partialorder %v1423_v39, 0.0 }
 0x397   : > { %v1425_v44 = vsel %vm3151_vm14, 10.0, %v1403_v15  ;;  %v1427_v45 = vsel %vm3151_vm14, %v1426_v40, %v1404_v19  ;;  %v1891_v46 = vsel %vm3151_vm14, 1.0, %v2181_v34  ;;  %v1430_v49 = vsel %vm3151_vm14, -0.07, %v1417_v30 }
 0x398   : > { %v1436_v47 = vsel %vm2527_vm8, %v1425_v44, %v2502_v16  ;;  %v1437_v48 = vsel %vm2527_vm8, %v1427_v45, %v2506_v17  ;;  %1892 = vst [vmem:[%s2346_s30 + $0xe0] sm:$0xff] %v1891_v46  ;;  %v1435_v54 = vsel %vm2527_vm8, %v1430_v49, %v2517_v23  ;;  %v1429_v59 = vsel %vm3151_vm14, %v1428_v55, %v1422_v38 }
 0x399   : > { %v1441_v50 = vmul.f32 0.8, %v1436_v47  ;;  %v1442_v52 = vmul.f32 0.98, %v1437_v48  ;;  %v1450_v57 = vmul.f32 0.95, %v1435_v54  ;;  %v1438_v62 = vsel %vm2527_vm8, %v1429_v59, %v2523_v31 }
 0x39a   : > { %v1456_v0 = vmul.f32 0.99, %v1438_v62 }
 0x39b   : > { %v1451_v53 = vadd.f32 %v1449_v51, %v1441_v50  ;;  %v1464_v5 = vadd.f32 -0.6, %v1442_v52  ;;  %v1525_v51 = vmul.f32 %v1904_v43, %v2356_v11 }
 0x39d   : > { %v1452_v56 = vadd.f32 %v1451_v53, %v1442_v52 }
 0x39f   : > { %v1453_v58 = vmul.f32 0.001, %v1452_v56 }
 0x3a1   : > { %v1454_v60 = vadd.f32 %v1453_v58, %v1450_v57 }
 0x3a3   : > { %v1455_v61 = vadd.f32 -0.0035, %v1454_v60 }
 0x3a5   : > { %v1895_v63 = vadd.f32 0.07, %v1455_v61 }
 0x3a7   : > { %v1458_v1 = vmul.f32 %v1895_v63, %v2359_v24 }
 0x3a9   : > { %v1459_v2 = vadd.f32 %v1458_v1, %v1456_v0 }
 0x3ab   : > { %v1460_v3 = vadd.f32 -0.0005, %v1459_v2 }
 0x3ad   : > { %v1461_v4 = vsub.f32 %v1455_v61, %v1460_v3  ;;  %v1466_v22 = vmax.f32 %v1460_v3, -0.06 }
 0x3af   : > { %vm3182_vm15 = vcmp.gt.f32.partialorder %v1461_v4, 0.0 }
 0x3b0   : > { %v1463_v8 = vsel %vm3182_vm15, 10.0, %v1441_v50  ;;  %v1465_v9 = vsel %vm3182_vm15, %v1464_v5, %v1442_v52  ;;  %v1896_v10 = vsel %vm3182_vm15, 1.0, %v2181_v34  ;;  %v1468_v14 = vsel %vm3182_vm15, -0.07, %v1455_v61 }
 0x3b1   : > { %v1474_v12 = vsel %vm2527_vm8, %v1463_v8, %v2502_v16  ;;  %v1475_v13 = vsel %vm2527_vm8, %v1465_v9, %v2506_v17  ;;  %1897 = vst [vmem:[%s2346_s30 + $0xe8] sm:$0xff] %v1896_v10  ;;  %v1473_v21 = vsel %vm2527_vm8, %v1468_v14, %v2517_v23  ;;  %v1467_v28 = vsel %vm3182_vm15, %v1466_v22, %v1460_v3 }
 0x3b2   : > { %v1479_v15 = vmul.f32 0.8, %v1474_v12  ;;  %v1480_v19 = vmul.f32 0.98, %v1475_v13  ;;  %v1488_v26 = vmul.f32 0.95, %v1473_v21  ;;  %v1476_v32 = vsel %vm2527_vm8, %v1467_v28, %v2523_v31 }
 0x3b3   : > { %v1494_v35 = vmul.f32 0.99, %v1476_v32 }
 0x3b4   : > { %v1489_v20 = vadd.f32 %v1487_v18, %v1479_v15  ;;  %v1502_v40 = vadd.f32 -0.6, %v1480_v19 }
 0x3b6   : > { %v1490_v25 = vadd.f32 %v1489_v20, %v1480_v19 }
 0x3b8   : > { %v1491_v27 = vmul.f32 0.001, %v1490_v25 }
 0x3ba   : > { %v1492_v29 = vadd.f32 %v1491_v27, %v1488_v26 }
 0x3bc   : > { %v1493_v30 = vadd.f32 -0.0035, %v1492_v29 }
 0x3be   : > { %v1900_v33 = vadd.f32 0.07, %v1493_v30 }
 0x3c0   : > { %v1496_v36 = vmul.f32 %v1900_v33, %v2359_v24 }
 0x3c2   : > { %v1497_v37 = vadd.f32 %v1496_v36, %v1494_v35 }
 0x3c4   : > { %v1498_v38 = vadd.f32 -0.0005, %v1497_v37 }
 0x3c6   : > { %v1499_v39 = vsub.f32 %v1493_v30, %v1498_v38  ;;  %v1504_v55 = vmax.f32 %v1498_v38, -0.06 }
 0x3c8   : > { %vm3213_vm0 = vcmp.gt.f32.partialorder %v1499_v39, 0.0 }
 0x3c9   : > { %v1501_v44 = vsel %vm3213_vm0, 10.0, %v1479_v15  ;;  %v1503_v45 = vsel %vm3213_vm0, %v1502_v40, %v1480_v19  ;;  %v1901_v46 = vsel %vm3213_vm0, 1.0, %v2181_v34  ;;  %v1506_v49 = vsel %vm3213_vm0, -0.07, %v1493_v30 }
 0x3ca   : > { %v1512_v47 = vsel %vm2527_vm8, %v1501_v44, %v2502_v16  ;;  %v1513_v48 = vsel %vm2527_vm8, %v1503_v45, %v2506_v17  ;;  %1902 = vst [vmem:[%s2346_s30 + $0xf0] sm:$0xff] %v1901_v46  ;;  %v1511_v54 = vsel %vm2527_vm8, %v1506_v49, %v2517_v23  ;;  %v1505_v59 = vsel %vm3213_vm0, %v1504_v55, %v1498_v38 }
 0x3cb   : > { %v1517_v50 = vmul.f32 0.8, %v1512_v47  ;;  %v1518_v52 = vmul.f32 0.98, %v1513_v48  ;;  %v1526_v57 = vmul.f32 0.95, %v1511_v54  ;;  %v1514_v11 = vsel %vm2527_vm8, %v1505_v59, %v2523_v31 }
 0x3cc   : > { %v1532_v63 = vmul.f32 0.99, %v1514_v11 }
 0x3cd   : > { %v1527_v53 = vadd.f32 %v1525_v51, %v1517_v50  ;;  %v1540_v5 = vadd.f32 -0.6, %v1518_v52 }
 0x3cf   : > { %v1528_v56 = vadd.f32 %v1527_v53, %v1518_v52 }
 0x3d1   : > { %v1529_v58 = vmul.f32 0.001, %v1528_v56 }
 0x3d3   : > { %v1530_v60 = vadd.f32 %v1529_v58, %v1526_v57 }
 0x3d5   : > { %v1531_v61 = vadd.f32 -0.0035, %v1530_v60 }
 0x3d7   : > { %v1905_v62 = vadd.f32 0.07, %v1531_v61 }
 0x3d9   : > { %v1534_v0 = vmul.f32 %v1905_v62, %v2359_v24 }
 0x3db   : > { %v1535_v1 = vadd.f32 %v1534_v0, %v1532_v63 }
 0x3dd   : > { %v1536_v2 = vadd.f32 -0.0005, %v1535_v1 }
 0x3df   : > { %v1537_v3 = vsub.f32 %v1531_v61, %v1536_v2  ;;  %v1542_v4 = vmax.f32 %v1536_v2, -0.06 }
 0x3e1   : > { %vm1538_vm1 = vcmp.gt.f32.partialorder %v1537_v3, 0.0 }
 0x3e2   : > { %v1539_v24 = vsel %vm1538_vm1, 10.0, %v1517_v50  ;;  %v1541_v6 = vsel %vm1538_vm1, %v1540_v5, %v1518_v52  ;;  %v1543_v7 = vsel %vm1538_vm1, %v1542_v4, %v1536_v2  ;;  %v1544_v8 = vsel %vm1538_vm1, -0.07, %v1531_v61 }
 0x3e3   : > { %v1906_v9 = vsel %vm1538_vm1, 1.0, %v2181_v34  ;;  %v1549_v10 = vsel %vm2527_vm8, %v1544_v8, %v2517_v23  ;;  %v1550_v12 = vsel %vm2527_vm8, %v1539_v24, %v2502_v16  ;;  %v1551_v13 = vsel %vm2527_vm8, %v1541_v6, %v2506_v17 }
 0x3e4   : > { %1907 = vst [vmem:[%s2346_s30 + $0xf8] sm:$0xff] %v1906_v9  ;;  %v1552_v34 = vsel %vm2527_vm8, %v1543_v7, %v2523_v31  ;;  %1553 = vst [vmem:[#allocation8] sm:$0xff] %v1549_v10 }
 0x3e5   : > { %1554 = vst [vmem:[#allocation8 + $0x8] sm:$0xff] %v1550_v12  ;;  %1555 = vst [vmem:[#allocation8 + $0x10] sm:$0xff] %v1551_v13 }
 0x3e6   : > { %1556 = vst [vmem:[#allocation8 + $0x18] sm:$0xff] %v1552_v34 }
 0x3e7   : > { %2073 = shalt.err (!%p2070_p6)
}
 0x3e8   : > { %s2074_s30 = scalar_lea.hbm %s3249_s10, 4096  ;;  %s2078_s12 = scalar_lea.hbm %s3335_s4, 8192 }
 0x3e9   : > { %p2075_p4 = scmp.ne.s32.totalorder %s3249_s10, %s2074_s30  ;;  %p2079_p10 = scmp.lt.s32.totalorder %s3249_s10, %s3335_s4 }
 0x3ea   : > { %p2080_p2 = scmp.lt.s32.totalorder %s2078_s12, %s2074_s30 }
 0x3eb   : > { %p2076_p9 = pnand %p2075_p4, %p2303_p13 }
 0x3ec   : > { %p2081_p1 = por %p2080_p2, %p2079_p10 }
 0x3ed   : > { %p2077_p11 = pneg %p2076_p9 }
 0x3ef   : > { %p2082_p8 = pnand %p2081_p1, %p2077_p11 }
 0x3f1   : > { %2085 = shalt.err (!%p2082_p8)
}
 0x3f2   : > { %s2184_s15 = smov 128   ;;  %s2185_s16 = smov 8  }
 0x3f3   : > { %1923 = dma.vmem_to_hbm [thread:$0]  (%p2303_p13), %s3251_s24, 4096, %s3249_s10, %s1558_s21, %s2184_s15, %s2184_s15, %s2185_s16  }
 0x3f4   : > { %s2086_s6 = scalar_lea.vmem %s3263_s8, 512  ;;  %p3420_p0 = scmp.ne.s32.totalorder %s3345_s27, 0 }
 0x3f5   : > { %p2087_p12 = scmp.ne.s32.totalorder %s3263_s8, %s2086_s6  ;;  %p2093_p7 = scmp.lt.s32.totalorder %s3263_s8, %s3263_s8 }
 0x3f6   : > { %p2094_p6 = scmp.lt.s32.totalorder %s2086_s6, %s2086_s6 }
 0x3f7   : > { %p2088_p3 = pnand %p2087_p12, %p3420_p0 }
 0x3f8   : > { %p2095_p4 = por %p2094_p6, %p2093_p7 }
 0x3f9   : > { %p2089_p5 = pneg %p2088_p3 }
 0x3fb   : > { %p2096_p9 = pnand %p2095_p4, %p2089_p5 }
 0x3fd   : > { %2099 = shalt.err (!%p2096_p9)
}
 0x3fe   : > { %1925 = dma.vmem_to_hbm [thread:$0]  (%p3420_p0), %s3263_s8, 512, %s3336_s5, [#allocation9], %s2184_s15, %s2184_s15, %s2185_s16  }
 0x3ff   : > { %2143 = dma.done.wait (%p3420_p0), [#allocation9], 512  }
 0x400   : > { %2145 = vsyncadd (%p3420_p0), [#allocation9], 4294966784 }
 0x401 PF: > { %s1608_s17 = sand.u32 1, %s2152_s18   ;;  %p3421_p13 = scmp.ne.s32.totalorder %s3347_s29, 0 }
 0x402   : > { %p3422_p11 = scmp.ge.s32.totalorder %s2172_s23, 2  ;;  %s1609_s25 = scalar_lea.sflag [#allocation4], %s1608_s17 }
 0x404   : > { %p1938_p10 = pnand %p3422_p11, %p3421_p13 }
 0x406   : > { %p1939_p2 = pneg %p1938_p10 }
 0x408   : > { %2147 = dma.done.wait (%p1939_p2), %s1609_s25, 4096  }
 0x409   : > { %2149 = vsyncadd (%p1939_p2), %s1609_s25, 4294963200  ;;  %s24_s23 = sadd.s32 1, %s2172_s23   ;;  %s3423_s21 = sld [smem:[#allocation14_spill]] }
 0x40a   : > { %p21_p1 = scmp.ge.s32.totalorder %s24_s23, 4   ;;  %s3424_s22 = sld [smem:[#allocation15_spill]] }
 0x40b   : > { %s3425_s18 = smov %s2156_s19  ;;  %s3426_s19 = smov %s2160_s20 }
 0x40c   : > { %s3427_s20 = smov %s2312_s7  ;;  %23 = sbr.rel (!%p21_p1) target bundleno = 10 (0xa), region = 170 }
 0x411   :  { %1614 = vsyncpa [#allocation3], 1 }
 0x412   :  { %1616 = vsyncpa [#allocation3 + $0x1], 1 }
 0x413   :  { %1617 = vsyncpa [#allocation6], 1 }
 0x414   :  { %1618 = vsyncpa [#allocation4], 1 }
 0x415   :  { %1620 = vsyncpa [#allocation4 + $0x1], 1 }
 0x416   :  { %1621 = vsyncpa [#allocation9], 1 }

</bundles_post_ra>
